<compile_context>
chip_gen: v7x
topology: tpu7x:2x2x1
jax: 0.10.0
libtpu: 0.0.40
codegen_flags: <defaults>
</compile_context>

<pallas_src>
import jax
import jax.numpy as jnp
import numpy as np
from jax.experimental import pallas as pl
from jax.experimental.pallas import tpu as pltpu


# -----------------------------------------------------------------------------
# LSTM layer kernel: grid over directions ("parallel"); hoisted input projection;
# statically indexed, direction-specialized recurrence inside.
# -----------------------------------------------------------------------------
def _make_lstm_layer_kernel(T, B, H, num_dirs, emit_seq):
    def kernel(x_ref, wih_ref, whh_ref, b_ref, *refs):
        if emit_seq:
            seq_ref, last_ref, xg_ref = refs
        else:
            last_ref, xg_ref = refs

        # ---- Hoisted input projection: one dense MXU matmul over all timesteps. ----
        # x_ref: (T*B, E_in) bf16, wih_ref: (E_in, 4H) bf16, b_ref: (1, 4H) f32.
        xg = jnp.dot(x_ref[...], wih_ref[...],
                     preferred_element_type=jnp.float32) + b_ref[...]
        xg_ref[...] = xg                                   # (T*B, 4H) f32 scratch

        whh = whh_ref[...]                                 # (H, 4H) bf16

        def run(reverse):
            h = jnp.zeros((B, H), jnp.float32)
            c = jnp.zeros((B, H), jnp.float32)
            order = range(T - 1, -1, -1) if reverse else range(T)
            for t in order:                                # fully unrolled, static indices
                g_in = xg_ref[pl.ds(t * B, B), :]          # (B, 4H) static-offset load
                gates = g_in + jnp.dot(h.astype(jnp.bfloat16), whh,
                                       preferred_element_type=jnp.float32)
                i = jax.nn.sigmoid(gates[:, 0 * H:1 * H])
                f = jax.nn.sigmoid(gates[:, 1 * H:2 * H])
                g = jnp.tanh(gates[:, 2 * H:3 * H])
                o = jax.nn.sigmoid(gates[:, 3 * H:4 * H])
                c = f * c + i * g
                h = o * jnp.tanh(c)
                if emit_seq:
                    seq_ref[t] = h.astype(seq_ref.dtype)   # static-address store
                if t == T - 1:                             # single store per direction
                    last_ref[...] = h.astype(last_ref.dtype)

        if num_dirs == 1:
            run(reverse=False)
        else:
            @pl.when(pl.program_id(0) == 0)
            def _fwd():
                run(reverse=False)

            @pl.when(pl.program_id(0) == 1)
            def _bwd():
                run(reverse=True)

    return kernel


def lstm_layer(x2d, wih_stack, whh_stack, b_stack, *, T, B, num_dirs, emit_seq):
    """x2d: (T*B, E_in) bf16, time-major flattened.
    wih_stack: (nd, E_in, 4H) bf16; whh_stack: (nd, H, 4H) bf16; b_stack: (nd, 1, 4H) f32.
    Returns (seq, last): seq (nd, T, B, H) bf16 or None; last (nd, B, H) f32."""
    TB, E_in = x2d.shape
    H = whh_stack.shape[1]
    G = 4 * H

    spec_last = pl.BlockSpec((None, B, H), lambda d: (d, 0, 0))
    if emit_seq:
        out_shape = (jax.ShapeDtypeStruct((num_dirs, T, B, H), jnp.bfloat16),
                     jax.ShapeDtypeStruct((num_dirs, B, H), jnp.float32))
        out_specs = [pl.BlockSpec((None, T, B, H), lambda d: (d, 0, 0, 0)), spec_last]
    else:
        out_shape = jax.ShapeDtypeStruct((num_dirs, B, H), jnp.float32)
        out_specs = spec_last

    outs = pl.pallas_call(
        _make_lstm_layer_kernel(T, B, H, num_dirs, emit_seq),
        out_shape=out_shape,
        grid_spec=pltpu.PrefetchScalarGridSpec(
            num_scalar_prefetch=0,
            grid=(num_dirs,),
            in_specs=[
                pl.BlockSpec((TB, E_in), lambda d: (0, 0)),        # whole sequence in VMEM
                pl.BlockSpec((None, E_in, G), lambda d: (d, 0, 0)),  # per-direction Wih
                pl.BlockSpec((None, H, G), lambda d: (d, 0, 0)),     # per-direction Whh
                pl.BlockSpec((None, 1, G), lambda d: (d, 0, 0)),     # per-direction bias
            ],
            out_specs=out_specs,
            scratch_shapes=[pltpu.VMEM((TB, G), jnp.float32)],       # precomputed gates xg
        ),
        compiler_params=pltpu.CompilerParams(
            dimension_semantics=("parallel",),
            vmem_limit_bytes=32 * 1024 * 1024,
        ),
    )(x2d, wih_stack, whh_stack, b_stack)

    if emit_seq:
        seq, last = outs
        return seq, last
    return None, outs


# -----------------------------------------------------------------------------
# Classification head kernel: concat dirs -> linear -> sigmoid -> (dropout=id)
#                             -> linear -> softmax, all in one call.
# -----------------------------------------------------------------------------
def _make_head_kernel(add_output_layer, num_dirs):
    def kernel(x_ref, w1_ref, b1_ref, w2_ref, b2_ref, x_out_ref, y_ref):
        parts = [x_ref[d] for d in range(num_dirs)]            # static per-direction slices
        x_last = parts[0] if num_dirs == 1 else jnp.concatenate(parts, axis=-1)  # (B, Hd)

        if add_output_layer:
            z = jnp.dot(x_last.astype(jnp.bfloat16), w1_ref[...],
                        preferred_element_type=jnp.float32) + b1_ref[...]
            x_out = jax.nn.sigmoid(z)
            # dropout (eval mode) == identity
        else:
            x_out = x_last

        logits = jnp.dot(x_out.astype(jnp.bfloat16), w2_ref[...],
                         preferred_element_type=jnp.float32) + b2_ref[...]
        m = jnp.max(logits, axis=-1, keepdims=True)
        e = jnp.exp(logits - m)
        denom = jnp.sum(e, axis=-1, keepdims=True)
        y = e * pl.reciprocal(denom, approx=True)              # EUP slot, not a VALU divide

        x_out_ref[...] = x_out.astype(x_out_ref.dtype)
        y_ref[...] = y.astype(y_ref.dtype)

    return kernel


def head(x_last_stack, w1, b1, w2, b2, *, add_output_layer=True):
    nd, B, H = x_last_stack.shape
    Hd = nd * H
    L = w2.shape[1]
    return pl.pallas_call(
        _make_head_kernel(add_output_layer, nd),
        out_shape=(jax.ShapeDtypeStruct((B, Hd), jnp.float32),
                   jax.ShapeDtypeStruct((B, L), jnp.float32)),
    )(x_last_stack, w1.astype(jnp.bfloat16), b1.reshape(1, -1),
      w2.astype(jnp.bfloat16), b2.reshape(1, -1))


# -----------------------------------------------------------------------------
# Full forward pass.  XLA glue: embedding gather, weight stacking, inter-layer concat.
# -----------------------------------------------------------------------------
def lstm_classifier_forward(ids, params, *, bidirectional, lstm_layers, add_output_layer=True):
    num_dirs = 2 if bidirectional else 1
    dirs = ["fwd", "bwd"][:num_dirs]

    emb = params["embedding"]
    x_emb = emb[ids]                               # (B, T, E) gather
    B, T, E = x_emb.shape
    x_tm = jnp.transpose(x_emb, (1, 0, 2))         # (T, B, E) time-major
    layer_in = x_tm.reshape(T * B, E).astype(jnp.bfloat16)   # free reshape, bf16 MXU operand

    last = None
    for layer in range(lstm_layers):
        wih = jnp.stack([params["lstm"][layer][d][0] for d in dirs]).astype(jnp.bfloat16)
        whh = jnp.stack([params["lstm"][layer][d][1] for d in dirs]).astype(jnp.bfloat16)
        b = jnp.stack([params["lstm"][layer][d][2] for d in dirs])[:, None, :]  # (nd,1,4H) f32

        emit_seq = layer < lstm_layers - 1          # last layer: only need the last step
        seq, last = lstm_layer(layer_in, wih, whh, b, T=T, B=B,
                               num_dirs=num_dirs, emit_seq=emit_seq)

        if emit_seq:
            H = last.shape[-1]
            # (nd, T, B, H) -> (T*B, nd*H): per-timestep concat of [fwd, bwd] hidden states.
            layer_in = jnp.transpose(seq, (1, 2, 0, 3)).reshape(T * B, num_dirs * H)

    return head(last, params["w1"], params["b1"], params["w2"], params["b2"],
                add_output_layer=add_output_layer)


# -----------------------------------------------------------------------------
# Pure-JAX f32 reference (for correctness check).
# -----------------------------------------------------------------------------
def _lstm_dir_ref(x_tm, wih, whh, b):
    T, B, E = x_tm.shape
    H = whh.shape[0]

    def step(carry, x_t):
        h, c = carry
        gates = x_t @ wih + h @ whh + b
        i = jax.nn.sigmoid(gates[:, :H])
        f = jax.nn.sigmoid(gates[:, H:2 * H])
        g = jnp.tanh(gates[:, 2 * H:3 * H])
        o = jax.nn.sigmoid(gates[:, 3 * H:])
        c = f * c + i * g
        h = o * jnp.tanh(c)
        return (h, c), h

    init = (jnp.zeros((B, H), jnp.float32), jnp.zeros((B, H), jnp.float32))
    _, out = jax.lax.scan(step, init, x_tm)
    return out


def reference_forward(ids, params, *, bidirectional, lstm_layers, add_output_layer=True):
    x_emb = params["embedding"][ids]
    layer_in = jnp.transpose(x_emb, (1, 0, 2))
    for layer in range(lstm_layers):
        outs = [_lstm_dir_ref(layer_in, *params["lstm"][layer]["fwd"])]
        if bidirectional:
            outs.append(_lstm_dir_ref(layer_in[::-1], *params["lstm"][layer]["bwd"])[::-1])
        layer_in = jnp.concatenate(outs, axis=-1)
    x_last = layer_in[-1]
    if add_output_layer:
        x = jax.nn.sigmoid(x_last @ params["w1"] + params["b1"])
    else:
        x = x_last
    logits = x @ params["w2"] + params["b2"]
    y = jax.nn.softmax(logits, axis=1)
    return x, y


# -----------------------------------------------------------------------------
# Deterministic parameter initialization (shapes from module __init__).
# -----------------------------------------------------------------------------
def init_params(key, *, vocab_size, embeddings_dim, hidden_dim, num_labels,
                lstm_layers, bidirectional):
    num_dirs = 2 if bidirectional else 1
    hd = hidden_dim * num_dirs
    keys = iter(jax.random.split(key, 8 + 8 * lstm_layers * num_dirs))

    emb = jax.random.normal(next(keys), (vocab_size, embeddings_dim), jnp.float32)
    emb = emb.at[0].set(0.0)  # padding_idx=0

    bound = 1.0 / np.sqrt(hidden_dim)
    lstm_params = []
    for layer in range(lstm_layers):
        e_in = embeddings_dim if layer == 0 else hd
        layer_p = {}
        for d in (["fwd", "bwd"] if bidirectional else ["fwd"]):
            wih = jax.random.uniform(next(keys), (e_in, 4 * hidden_dim),
                                     jnp.float32, -bound, bound)
            whh = jax.random.uniform(next(keys), (hidden_dim, 4 * hidden_dim),
                                     jnp.float32, -bound, bound)
            bih = jax.random.uniform(next(keys), (4 * hidden_dim,), jnp.float32, -bound, bound)
            bhh = jax.random.uniform(next(keys), (4 * hidden_dim,), jnp.float32, -bound, bound)
            layer_p[d] = (wih, whh, bih + bhh)
        lstm_params.append(layer_p)

    bound1 = 1.0 / np.sqrt(hd)
    w1 = jax.random.uniform(next(keys), (hd, hd), jnp.float32, -bound1, bound1)
    b1 = jax.random.uniform(next(keys), (hd,), jnp.float32, -bound1, bound1)
    w2 = jax.random.uniform(next(keys), (hd, num_labels), jnp.float32, -bound1, bound1)
    b2 = jax.random.uniform(next(keys), (num_labels,), jnp.float32, -bound1, bound1)

    return {"embedding": emb, "lstm": lstm_params, "w1": w1, "b1": b1, "w2": w2, "b2": b2}


if __name__ == "__main__":
    # Small, module-consistent config (2 layers so both kernel variants are exercised).
    VOCAB, EMB, HID, LABELS = 50, 16, 32, 8
    LAYERS, BIDIR = 2, True
    B, T = 2, 8

    key = jax.random.PRNGKey(0)
    pkey, ikey = jax.random.split(key)
    params = init_params(pkey, vocab_size=VOCAB, embeddings_dim=EMB, hidden_dim=HID,
                         num_labels=LABELS, lstm_layers=LAYERS, bidirectional=BIDIR)
    ids = jax.random.randint(ikey, (B, T), 0, VOCAB, dtype=jnp.int32)

    fwd = jax.jit(lstm_classifier_forward,
                  static_argnames=("bidirectional", "lstm_layers", "add_output_layer"))
    x_out, y = fwd(ids, params, bidirectional=BIDIR, lstm_layers=LAYERS)
    x_out = jax.block_until_ready(x_out)
    y = jax.block_until_ready(y)

    x_ref, y_ref = reference_forward(ids, params, bidirectional=BIDIR, lstm_layers=LAYERS)
    # Tolerance loosened vs the pure-f32 version: MXU operands are bf16 (gate math stays f32).
    np.testing.assert_allclose(np.asarray(x_out), np.asarray(x_ref), rtol=2e-2, atol=2e-2)
    np.testing.assert_allclose(np.asarray(y), np.asarray(y_ref), rtol=2e-2, atol=2e-2)
    assert x_out.shape == (B, HID * 2) and y.shape == (B, LABELS)

    print("KERNEL_OK")
</pallas_src>

<mosaic_0001>
module attributes {stable_mosaic.version = 11 : i64} {
  func.func @kernel(%arg0: i32, %arg1: memref<16x16xbf16, #tpu.memory_space<vmem>>, %arg2: memref<1x16x128xbf16, #tpu.memory_space<vmem>>, %arg3: memref<1x32x128xbf16, #tpu.memory_space<vmem>>, %arg4: memref<1x1x128xf32, #tpu.memory_space<vmem>>, %arg5: memref<1x8x2x32xbf16, #tpu.memory_space<vmem>>, %arg6: memref<1x2x32xf32, #tpu.memory_space<vmem>>, %arg7: memref<16x128xf32, #tpu.memory_space<vmem>>) attributes {dimension_semantics = [#tpu.dimension_semantics<parallel>], iteration_bounds = array<i64: 2>, scalar_prefetch = 0 : i64, scratch_operands = 1 : i64, tpu.core_type = #tpu.core_type<tc>, window_params = [{pipeline_mode = #tpu.pipeline_mode<synchronous>, transform_indices = @transform_0, window_bounds = array<i64: 16, 16>}, {transform_indices = @transform_1, window_bounds = array<i64: 1, 16, 128>}, {transform_indices = @transform_2, window_bounds = array<i64: 1, 32, 128>}, {transform_indices = @transform_3, window_bounds = array<i64: 1, 1, 128>}, {transform_indices = @transform_4, window_bounds = array<i64: 1, 8, 2, 32>}, {transform_indices = @transform_5, window_bounds = array<i64: 1, 2, 32>}]} {
    %c0 = arith.constant 0 : index
    %c0_0 = arith.constant 0 : index
    %0 = vector.load %arg1[%c0, %c0_0] : memref<16x16xbf16, #tpu.memory_space<vmem>>, vector<16x16xbf16>
    %c0_1 = arith.constant 0 : index
    %c0_2 = arith.constant 0 : index
    %c0_3 = arith.constant 0 : index
    %1 = vector.load %arg2[%c0_1, %c0_2, %c0_3] : memref<1x16x128xbf16, #tpu.memory_space<vmem>>, vector<1x16x128xbf16>
    %2 = vector.shape_cast %1 : vector<1x16x128xbf16> to vector<16x128xbf16>
    %cst = arith.constant dense<0.000000e+00> : vector<16x128xf32>
    %3 = tpu.matmul %0, %2, %cst {dimension_numbers = #tpu.dot_dimension_numbers<[1], [0], [0], [1], [0, 0, 1, 1], [], []>} : vector<16x16xbf16>, vector<16x128xbf16>, vector<16x128xf32> -> vector<16x128xf32>
    %c0_4 = arith.constant 0 : index
    %c0_5 = arith.constant 0 : index
    %c0_6 = arith.constant 0 : index
    %4 = vector.load %arg4[%c0_4, %c0_5, %c0_6] : memref<1x1x128xf32, #tpu.memory_space<vmem>>, vector<1x1x128xf32>
    %5 = vector.shape_cast %4 : vector<1x1x128xf32> to vector<1x128xf32>
    %6 = vector.broadcast %5 : vector<1x128xf32> to vector<16x128xf32>
    %7 = arith.addf %3, %6 : vector<16x128xf32>
    %c0_7 = arith.constant 0 : index
    %c0_8 = arith.constant 0 : index
    %8 = vector.load %arg7[%c0_7, %c0_8] : memref<16x128xf32, #tpu.memory_space<vmem>>, vector<16x128xf32>
    tpu.vector_store %arg7[%c0_7, %c0_8], %7 {strides = array<i32>} : memref<16x128xf32, #tpu.memory_space<vmem>>, vector<16x128xf32>,
    %c0_9 = arith.constant 0 : index
    %c0_10 = arith.constant 0 : index
    %c0_11 = arith.constant 0 : index
    %9 = vector.load %arg3[%c0_9, %c0_10, %c0_11] : memref<1x32x128xbf16, #tpu.memory_space<vmem>>, vector<1x32x128xbf16>
    %10 = vector.shape_cast %9 : vector<1x32x128xbf16> to vector<32x128xbf16>
    %c0_i32 = arith.constant 0 : i32
    %11 = arith.cmpi eq, %arg0, %c0_i32 : i32
    %12 = arith.extui %11 : i1 to i32
    %c0_i32_12 = arith.constant 0 : i32
    %13 = arith.cmpi ne, %12, %c0_i32_12 : i32
    scf.if %13 {
      %cst_14 = arith.constant 0.000000e+00 : f32
      %17 = vector.broadcast %cst_14 : f32 to vector<2x32xf32>
      %cst_15 = arith.constant 0.000000e+00 : f32
      %18 = vector.broadcast %cst_15 : f32 to vector<2x32xf32>
      %c0_16 = arith.constant 0 : index
      %c0_17 = arith.constant 0 : index
      %19 = vector.load %arg7[%c0_16, %c0_17] : memref<16x128xf32, #tpu.memory_space<vmem>>, vector<2x128xf32>
      %20 = arith.truncf %17 : vector<2x32xf32> to vector<2x32xbf16>
      %cst_18 = arith.constant dense<0.000000e+00> : vector<2x128xf32>
      %21 = tpu.matmul %20, %10, %cst_18 {dimension_numbers = #tpu.dot_dimension_numbers<[1], [0], [0], [1], [0, 0, 1, 1], [], []>} : vector<2x32xbf16>, vector<32x128xbf16>, vector<2x128xf32> -> vector<2x128xf32>
      %22 = arith.addf %19, %21 : vector<2x128xf32>
      %23 = vector.extract_strided_slice %22 {offsets = [0, 0], sizes = [2, 32], strides = [1, 1]} : vector<2x128xf32> to vector<2x32xf32>
      %24 = arith.negf %23 : vector<2x32xf32>
      %25 = math.exp %24 : vector<2x32xf32>
      %cst_19 = arith.constant 1.000000e+00 : f32
      %26 = vector.broadcast %cst_19 : f32 to vector<2x32xf32>
      %27 = arith.addf %26, %25 : vector<2x32xf32>
      %28 = arith.divf %26, %27 : vector<2x32xf32>
      %29 = vector.extract_strided_slice %22 {offsets = [0, 32], sizes = [2, 32], strides = [1, 1]} : vector<2x128xf32> to vector<2x32xf32>
      %30 = arith.negf %29 : vector<2x32xf32>
      %31 = math.exp %30 : vector<2x32xf32>
      %cst_20 = arith.constant 1.000000e+00 : f32
      %32 = vector.broadcast %cst_20 : f32 to vector<2x32xf32>
      %33 = arith.addf %32, %31 : vector<2x32xf32>
      %34 = arith.divf %32, %33 : vector<2x32xf32>
      %35 = vector.extract_strided_slice %22 {offsets = [0, 64], sizes = [2, 32], strides = [1, 1]} : vector<2x128xf32> to vector<2x32xf32>
      %36 = math.tanh %35 : vector<2x32xf32>
      %37 = vector.extract_strided_slice %22 {offsets = [0, 96], sizes = [2, 32], strides = [1, 1]} : vector<2x128xf32> to vector<2x32xf32>
      %38 = arith.negf %37 : vector<2x32xf32>
      %39 = math.exp %38 : vector<2x32xf32>
      %cst_21 = arith.constant 1.000000e+00 : f32
      %40 = vector.broadcast %cst_21 : f32 to vector<2x32xf32>
      %41 = arith.addf %40, %39 : vector<2x32xf32>
      %42 = arith.divf %40, %41 : vector<2x32xf32>
      %43 = arith.mulf %34, %18 : vector<2x32xf32>
      %44 = arith.mulf %28, %36 : vector<2x32xf32>
      %45 = arith.addf %43, %44 : vector<2x32xf32>
      %46 = math.tanh %45 : vector<2x32xf32>
      %47 = arith.mulf %42, %46 : vector<2x32xf32>
      %48 = arith.truncf %47 : vector<2x32xf32> to vector<2x32xbf16>
      %c0_22 = arith.constant 0 : index
      %c0_23 = arith.constant 0 : index
      %c0_24 = arith.constant 0 : index
      %c0_25 = arith.constant 0 : index
      %49 = vector.load %arg5[%c0_22, %c0_23, %c0_24, %c0_25] : memref<1x8x2x32xbf16, #tpu.memory_space<vmem>>, vector<1x1x2x32xbf16>
      %50 = vector.shape_cast %49 : vector<1x1x2x32xbf16> to vector<2x32xbf16>
      %51 = vector.shape_cast %48 : vector<2x32xbf16> to vector<1x1x2x32xbf16>
      tpu.vector_store %arg5[%c0_22, %c0_23, %c0_24, %c0_25], %51 {strides = array<i32>} : memref<1x8x2x32xbf16, #tpu.memory_space<vmem>>, vector<1x1x2x32xbf16>,
      %c2 = arith.constant 2 : index
      %c0_26 = arith.constant 0 : index
      %52 = vector.load %arg7[%c2, %c0_26] : memref<16x128xf32, #tpu.memory_space<vmem>>, vector<2x128xf32>
      %53 = arith.truncf %47 : vector<2x32xf32> to vector<2x32xbf16>
      %cst_27 = arith.constant dense<0.000000e+00> : vector<2x128xf32>
      %54 = tpu.matmul %53, %10, %cst_27 {dimension_numbers = #tpu.dot_dimension_numbers<[1], [0], [0], [1], [0, 0, 1, 1], [], []>} : vector<2x32xbf16>, vector<32x128xbf16>, vector<2x128xf32> -> vector<2x128xf32>
      %55 = arith.addf %52, %54 : vector<2x128xf32>
      %56 = vector.extract_strided_slice %55 {offsets = [0, 0], sizes = [2, 32], strides = [1, 1]} : vector<2x128xf32> to vector<2x32xf32>
      %57 = arith.negf %56 : vector<2x32xf32>
      %58 = math.exp %57 : vector<2x32xf32>
      %cst_28 = arith.constant 1.000000e+00 : f32
      %59 = vector.broadcast %cst_28 : f32 to vector<2x32xf32>
      %60 = arith.addf %59, %58 : vector<2x32xf32>
      %61 = arith.divf %59, %60 : vector<2x32xf32>
      %62 = vector.extract_strided_slice %55 {offsets = [0, 32], sizes = [2, 32], strides = [1, 1]} : vector<2x128xf32> to vector<2x32xf32>
      %63 = arith.negf %62 : vector<2x32xf32>
      %64 = math.exp %63 : vector<2x32xf32>
      %cst_29 = arith.constant 1.000000e+00 : f32
      %65 = vector.broadcast %cst_29 : f32 to vector<2x32xf32>
      %66 = arith.addf %65, %64 : vector<2x32xf32>
      %67 = arith.divf %65, %66 : vector<2x32xf32>
      %68 = vector.extract_strided_slice %55 {offsets = [0, 64], sizes = [2, 32], strides = [1, 1]} : vector<2x128xf32> to vector<2x32xf32>
      %69 = math.tanh %68 : vector<2x32xf32>
      %70 = vector.extract_strided_slice %55 {offsets = [0, 96], sizes = [2, 32], strides = [1, 1]} : vector<2x128xf32> to vector<2x32xf32>
      %71 = arith.negf %70 : vector<2x32xf32>
      %72 = math.exp %71 : vector<2x32xf32>
      %cst_30 = arith.constant 1.000000e+00 : f32
      %73 = vector.broadcast %cst_30 : f32 to vector<2x32xf32>
      %74 = arith.addf %73, %72 : vector<2x32xf32>
      %75 = arith.divf %73, %74 : vector<2x32xf32>
      %76 = arith.mulf %67, %45 : vector<2x32xf32>
      %77 = arith.mulf %61, %69 : vector<2x32xf32>
      %78 = arith.addf %76, %77 : vector<2x32xf32>
      %79 = math.tanh %78 : vector<2x32xf32>
      %80 = arith.mulf %75, %79 : vector<2x32xf32>
      %81 = arith.truncf %80 : vector<2x32xf32> to vector<2x32xbf16>
      %c0_31 = arith.constant 0 : index
      %c1 = arith.constant 1 : index
      %c0_32 = arith.constant 0 : index
      %c0_33 = arith.constant 0 : index
      %82 = vector.load %arg5[%c0_31, %c1, %c0_32, %c0_33] : memref<1x8x2x32xbf16, #tpu.memory_space<vmem>>, vector<1x1x2x32xbf16>
      %83 = vector.shape_cast %82 : vector<1x1x2x32xbf16> to vector<2x32xbf16>
      %84 = vector.shape_cast %81 : vector<2x32xbf16> to vector<1x1x2x32xbf16>
      tpu.vector_store %arg5[%c0_31, %c1, %c0_32, %c0_33], %84 {strides = array<i32>} : memref<1x8x2x32xbf16, #tpu.memory_space<vmem>>, vector<1x1x2x32xbf16>,
      %c4 = arith.constant 4 : index
      %c0_34 = arith.constant 0 : index
      %85 = vector.load %arg7[%c4, %c0_34] : memref<16x128xf32, #tpu.memory_space<vmem>>, vector<2x128xf32>
      %86 = arith.truncf %80 : vector<2x32xf32> to vector<2x32xbf16>
      %cst_35 = arith.constant dense<0.000000e+00> : vector<2x128xf32>
      %87 = tpu.matmul %86, %10, %cst_35 {dimension_numbers = #tpu.dot_dimension_numbers<[1], [0], [0], [1], [0, 0, 1, 1], [], []>} : vector<2x32xbf16>, vector<32x128xbf16>, vector<2x128xf32> -> vector<2x128xf32>
      %88 = arith.addf %85, %87 : vector<2x128xf32>
      %89 = vector.extract_strided_slice %88 {offsets = [0, 0], sizes = [2, 32], strides = [1, 1]} : vector<2x128xf32> to vector<2x32xf32>
      %90 = arith.negf %89 : vector<2x32xf32>
      %91 = math.exp %90 : vector<2x32xf32>
      %cst_36 = arith.constant 1.000000e+00 : f32
      %92 = vector.broadcast %cst_36 : f32 to vector<2x32xf32>
      %93 = arith.addf %92, %91 : vector<2x32xf32>
      %94 = arith.divf %92, %93 : vector<2x32xf32>
      %95 = vector.extract_strided_slice %88 {offsets = [0, 32], sizes = [2, 32], strides = [1, 1]} : vector<2x128xf32> to vector<2x32xf32>
      %96 = arith.negf %95 : vector<2x32xf32>
      %97 = math.exp %96 : vector<2x32xf32>
      %cst_37 = arith.constant 1.000000e+00 : f32
      %98 = vector.broadcast %cst_37 : f32 to vector<2x32xf32>
      %99 = arith.addf %98, %97 : vector<2x32xf32>
      %100 = arith.divf %98, %99 : vector<2x32xf32>
      %101 = vector.extract_strided_slice %88 {offsets = [0, 64], sizes = [2, 32], strides = [1, 1]} : vector<2x128xf32> to vector<2x32xf32>
      %102 = math.tanh %101 : vector<2x32xf32>
      %103 = vector.extract_strided_slice %88 {offsets = [0, 96], sizes = [2, 32], strides = [1, 1]} : vector<2x128xf32> to vector<2x32xf32>
      %104 = arith.negf %103 : vector<2x32xf32>
      %105 = math.exp %104 : vector<2x32xf32>
      %cst_38 = arith.constant 1.000000e+00 : f32
      %106 = vector.broadcast %cst_38 : f32 to vector<2x32xf32>
      %107 = arith.addf %106, %105 : vector<2x32xf32>
      %108 = arith.divf %106, %107 : vector<2x32xf32>
      %109 = arith.mulf %100, %78 : vector<2x32xf32>
      %110 = arith.mulf %94, %102 : vector<2x32xf32>
      %111 = arith.addf %109, %110 : vector<2x32xf32>
      %112 = math.tanh %111 : vector<2x32xf32>
      %113 = arith.mulf %108, %112 : vector<2x32xf32>
      %114 = arith.truncf %113 : vector<2x32xf32> to vector<2x32xbf16>
      %c0_39 = arith.constant 0 : index
      %c2_40 = arith.constant 2 : index
      %c0_41 = arith.constant 0 : index
      %c0_42 = arith.constant 0 : index
      %115 = vector.load %arg5[%c0_39, %c2_40, %c0_41, %c0_42] : memref<1x8x2x32xbf16, #tpu.memory_space<vmem>>, vector<1x1x2x32xbf16>
      %116 = vector.shape_cast %115 : vector<1x1x2x32xbf16> to vector<2x32xbf16>
      %117 = vector.shape_cast %114 : vector<2x32xbf16> to vector<1x1x2x32xbf16>
      tpu.vector_store %arg5[%c0_39, %c2_40, %c0_41, %c0_42], %117 {strides = array<i32>} : memref<1x8x2x32xbf16, #tpu.memory_space<vmem>>, vector<1x1x2x32xbf16>,
      %c6 = arith.constant 6 : index
      %c0_43 = arith.constant 0 : index
      %118 = vector.load %arg7[%c6, %c0_43] : memref<16x128xf32, #tpu.memory_space<vmem>>, vector<2x128xf32>
      %119 = arith.truncf %113 : vector<2x32xf32> to vector<2x32xbf16>
      %cst_44 = arith.constant dense<0.000000e+00> : vector<2x128xf32>
      %120 = tpu.matmul %119, %10, %cst_44 {dimension_numbers = #tpu.dot_dimension_numbers<[1], [0], [0], [1], [0, 0, 1, 1], [], []>} : vector<2x32xbf16>, vector<32x128xbf16>, vector<2x128xf32> -> vector<2x128xf32>
      %121 = arith.addf %118, %120 : vector<2x128xf32>
      %122 = vector.extract_strided_slice %121 {offsets = [0, 0], sizes = [2, 32], strides = [1, 1]} : vector<2x128xf32> to vector<2x32xf32>
      %123 = arith.negf %122 : vector<2x32xf32>
      %124 = math.exp %123 : vector<2x32xf32>
      %cst_45 = arith.constant 1.000000e+00 : f32
      %125 = vector.broadcast %cst_45 : f32 to vector<2x32xf32>
      %126 = arith.addf %125, %124 : vector<2x32xf32>
      %127 = arith.divf %125, %126 : vector<2x32xf32>
      %128 = vector.extract_strided_slice %121 {offsets = [0, 32], sizes = [2, 32], strides = [1, 1]} : vector<2x128xf32> to vector<2x32xf32>
      %129 = arith.negf %128 : vector<2x32xf32>
      %130 = math.exp %129 : vector<2x32xf32>
      %cst_46 = arith.constant 1.000000e+00 : f32
      %131 = vector.broadcast %cst_46 : f32 to vector<2x32xf32>
      %132 = arith.addf %131, %130 : vector<2x32xf32>
      %133 = arith.divf %131, %132 : vector<2x32xf32>
      %134 = vector.extract_strided_slice %121 {offsets = [0, 64], sizes = [2, 32], strides = [1, 1]} : vector<2x128xf32> to vector<2x32xf32>
      %135 = math.tanh %134 : vector<2x32xf32>
      %136 = vector.extract_strided_slice %121 {offsets = [0, 96], sizes = [2, 32], strides = [1, 1]} : vector<2x128xf32> to vector<2x32xf32>
      %137 = arith.negf %136 : vector<2x32xf32>
      %138 = math.exp %137 : vector<2x32xf32>
      %cst_47 = arith.constant 1.000000e+00 : f32
      %139 = vector.broadcast %cst_47 : f32 to vector<2x32xf32>
      %140 = arith.addf %139, %138 : vector<2x32xf32>
      %141 = arith.divf %139, %140 : vector<2x32xf32>
      %142 = arith.mulf %133, %111 : vector<2x32xf32>
      %143 = arith.mulf %127, %135 : vector<2x32xf32>
      %144 = arith.addf %142, %143 : vector<2x32xf32>
      %145 = math.tanh %144 : vector<2x32xf32>
      %146 = arith.mulf %141, %145 : vector<2x32xf32>
      %147 = arith.truncf %146 : vector<2x32xf32> to vector<2x32xbf16>
      %c0_48 = arith.constant 0 : index
      %c3 = arith.constant 3 : index
      %c0_49 = arith.constant 0 : index
      %c0_50 = arith.constant 0 : index
      %148 = vector.load %arg5[%c0_48, %c3, %c0_49, %c0_50] : memref<1x8x2x32xbf16, #tpu.memory_space<vmem>>, vector<1x1x2x32xbf16>
      %149 = vector.shape_cast %148 : vector<1x1x2x32xbf16> to vector<2x32xbf16>
      %150 = vector.shape_cast %147 : vector<2x32xbf16> to vector<1x1x2x32xbf16>
      tpu.vector_store %arg5[%c0_48, %c3, %c0_49, %c0_50], %150 {strides = array<i32>} : memref<1x8x2x32xbf16, #tpu.memory_space<vmem>>, vector<1x1x2x32xbf16>,
      %c8 = arith.constant 8 : index
      %c0_51 = arith.constant 0 : index
      %151 = vector.load %arg7[%c8, %c0_51] : memref<16x128xf32, #tpu.memory_space<vmem>>, vector<2x128xf32>
      %152 = arith.truncf %146 : vector<2x32xf32> to vector<2x32xbf16>
      %cst_52 = arith.constant dense<0.000000e+00> : vector<2x128xf32>
      %153 = tpu.matmul %152, %10, %cst_52 {dimension_numbers = #tpu.dot_dimension_numbers<[1], [0], [0], [1], [0, 0, 1, 1], [], []>} : vector<2x32xbf16>, vector<32x128xbf16>, vector<2x128xf32> -> vector<2x128xf32>
      %154 = arith.addf %151, %153 : vector<2x128xf32>
      %155 = vector.extract_strided_slice %154 {offsets = [0, 0], sizes = [2, 32], strides = [1, 1]} : vector<2x128xf32> to vector<2x32xf32>
      %156 = arith.negf %155 : vector<2x32xf32>
      %157 = math.exp %156 : vector<2x32xf32>
      %cst_53 = arith.constant 1.000000e+00 : f32
      %158 = vector.broadcast %cst_53 : f32 to vector<2x32xf32>
      %159 = arith.addf %158, %157 : vector<2x32xf32>
      %160 = arith.divf %158, %159 : vector<2x32xf32>
      %161 = vector.extract_strided_slice %154 {offsets = [0, 32], sizes = [2, 32], strides = [1, 1]} : vector<2x128xf32> to vector<2x32xf32>
      %162 = arith.negf %161 : vector<2x32xf32>
      %163 = math.exp %162 : vector<2x32xf32>
      %cst_54 = arith.constant 1.000000e+00 : f32
      %164 = vector.broadcast %cst_54 : f32 to vector<2x32xf32>
      %165 = arith.addf %164, %163 : vector<2x32xf32>
      %166 = arith.divf %164, %165 : vector<2x32xf32>
      %167 = vector.extract_strided_slice %154 {offsets = [0, 64], sizes = [2, 32], strides = [1, 1]} : vector<2x128xf32> to vector<2x32xf32>
      %168 = math.tanh %167 : vector<2x32xf32>
      %169 = vector.extract_strided_slice %154 {offsets = [0, 96], sizes = [2, 32], strides = [1, 1]} : vector<2x128xf32> to vector<2x32xf32>
      %170 = arith.negf %169 : vector<2x32xf32>
      %171 = math.exp %170 : vector<2x32xf32>
      %cst_55 = arith.constant 1.000000e+00 : f32
      %172 = vector.broadcast %cst_55 : f32 to vector<2x32xf32>
      %173 = arith.addf %172, %171 : vector<2x32xf32>
      %174 = arith.divf %172, %173 : vector<2x32xf32>
      %175 = arith.mulf %166, %144 : vector<2x32xf32>
      %176 = arith.mulf %160, %168 : vector<2x32xf32>
      %177 = arith.addf %175, %176 : vector<2x32xf32>
      %178 = math.tanh %177 : vector<2x32xf32>
      %179 = arith.mulf %174, %178 : vector<2x32xf32>
      %180 = arith.truncf %179 : vector<2x32xf32> to vector<2x32xbf16>
      %c0_56 = arith.constant 0 : index
      %c4_57 = arith.constant 4 : index
      %c0_58 = arith.constant 0 : index
      %c0_59 = arith.constant 0 : index
      %181 = vector.load %arg5[%c0_56, %c4_57, %c0_58, %c0_59] : memref<1x8x2x32xbf16, #tpu.memory_space<vmem>>, vector<1x1x2x32xbf16>
      %182 = vector.shape_cast %181 : vector<1x1x2x32xbf16> to vector<2x32xbf16>
      %183 = vector.shape_cast %180 : vector<2x32xbf16> to vector<1x1x2x32xbf16>
      tpu.vector_store %arg5[%c0_56, %c4_57, %c0_58, %c0_59], %183 {strides = array<i32>} : memref<1x8x2x32xbf16, #tpu.memory_space<vmem>>, vector<1x1x2x32xbf16>,
      %c10 = arith.constant 10 : index
      %c0_60 = arith.constant 0 : index
      %184 = vector.load %arg7[%c10, %c0_60] : memref<16x128xf32, #tpu.memory_space<vmem>>, vector<2x128xf32>
      %185 = arith.truncf %179 : vector<2x32xf32> to vector<2x32xbf16>
      %cst_61 = arith.constant dense<0.000000e+00> : vector<2x128xf32>
      %186 = tpu.matmul %185, %10, %cst_61 {dimension_numbers = #tpu.dot_dimension_numbers<[1], [0], [0], [1], [0, 0, 1, 1], [], []>} : vector<2x32xbf16>, vector<32x128xbf16>, vector<2x128xf32> -> vector<2x128xf32>
      %187 = arith.addf %184, %186 : vector<2x128xf32>
      %188 = vector.extract_strided_slice %187 {offsets = [0, 0], sizes = [2, 32], strides = [1, 1]} : vector<2x128xf32> to vector<2x32xf32>
      %189 = arith.negf %188 : vector<2x32xf32>
      %190 = math.exp %189 : vector<2x32xf32>
      %cst_62 = arith.constant 1.000000e+00 : f32
      %191 = vector.broadcast %cst_62 : f32 to vector<2x32xf32>
      %192 = arith.addf %191, %190 : vector<2x32xf32>
      %193 = arith.divf %191, %192 : vector<2x32xf32>
      %194 = vector.extract_strided_slice %187 {offsets = [0, 32], sizes = [2, 32], strides = [1, 1]} : vector<2x128xf32> to vector<2x32xf32>
      %195 = arith.negf %194 : vector<2x32xf32>
      %196 = math.exp %195 : vector<2x32xf32>
      %cst_63 = arith.constant 1.000000e+00 : f32
      %197 = vector.broadcast %cst_63 : f32 to vector<2x32xf32>
      %198 = arith.addf %197, %196 : vector<2x32xf32>
      %199 = arith.divf %197, %198 : vector<2x32xf32>
      %200 = vector.extract_strided_slice %187 {offsets = [0, 64], sizes = [2, 32], strides = [1, 1]} : vector<2x128xf32> to vector<2x32xf32>
      %201 = math.tanh %200 : vector<2x32xf32>
      %202 = vector.extract_strided_slice %187 {offsets = [0, 96], sizes = [2, 32], strides = [1, 1]} : vector<2x128xf32> to vector<2x32xf32>
      %203 = arith.negf %202 : vector<2x32xf32>
      %204 = math.exp %203 : vector<2x32xf32>
      %cst_64 = arith.constant 1.000000e+00 : f32
      %205 = vector.broadcast %cst_64 : f32 to vector<2x32xf32>
      %206 = arith.addf %205, %204 : vector<2x32xf32>
      %207 = arith.divf %205, %206 : vector<2x32xf32>
      %208 = arith.mulf %199, %177 : vector<2x32xf32>
      %209 = arith.mulf %193, %201 : vector<2x32xf32>
      %210 = arith.addf %208, %209 : vector<2x32xf32>
      %211 = math.tanh %210 : vector<2x32xf32>
      %212 = arith.mulf %207, %211 : vector<2x32xf32>
      %213 = arith.truncf %212 : vector<2x32xf32> to vector<2x32xbf16>
      %c0_65 = arith.constant 0 : index
      %c5 = arith.constant 5 : index
      %c0_66 = arith.constant 0 : index
      %c0_67 = arith.constant 0 : index
      %214 = vector.load %arg5[%c0_65, %c5, %c0_66, %c0_67] : memref<1x8x2x32xbf16, #tpu.memory_space<vmem>>, vector<1x1x2x32xbf16>
      %215 = vector.shape_cast %214 : vector<1x1x2x32xbf16> to vector<2x32xbf16>
      %216 = vector.shape_cast %213 : vector<2x32xbf16> to vector<1x1x2x32xbf16>
      tpu.vector_store %arg5[%c0_65, %c5, %c0_66, %c0_67], %216 {strides = array<i32>} : memref<1x8x2x32xbf16, #tpu.memory_space<vmem>>, vector<1x1x2x32xbf16>,
      %c12 = arith.constant 12 : index
      %c0_68 = arith.constant 0 : index
      %217 = vector.load %arg7[%c12, %c0_68] : memref<16x128xf32, #tpu.memory_space<vmem>>, vector<2x128xf32>
      %218 = arith.truncf %212 : vector<2x32xf32> to vector<2x32xbf16>
      %cst_69 = arith.constant dense<0.000000e+00> : vector<2x128xf32>
      %219 = tpu.matmul %218, %10, %cst_69 {dimension_numbers = #tpu.dot_dimension_numbers<[1], [0], [0], [1], [0, 0, 1, 1], [], []>} : vector<2x32xbf16>, vector<32x128xbf16>, vector<2x128xf32> -> vector<2x128xf32>
      %220 = arith.addf %217, %219 : vector<2x128xf32>
      %221 = vector.extract_strided_slice %220 {offsets = [0, 0], sizes = [2, 32], strides = [1, 1]} : vector<2x128xf32> to vector<2x32xf32>
      %222 = arith.negf %221 : vector<2x32xf32>
      %223 = math.exp %222 : vector<2x32xf32>
      %cst_70 = arith.constant 1.000000e+00 : f32
      %224 = vector.broadcast %cst_70 : f32 to vector<2x32xf32>
      %225 = arith.addf %224, %223 : vector<2x32xf32>
      %226 = arith.divf %224, %225 : vector<2x32xf32>
      %227 = vector.extract_strided_slice %220 {offsets = [0, 32], sizes = [2, 32], strides = [1, 1]} : vector<2x128xf32> to vector<2x32xf32>
      %228 = arith.negf %227 : vector<2x32xf32>
      %229 = math.exp %228 : vector<2x32xf32>
      %cst_71 = arith.constant 1.000000e+00 : f32
      %230 = vector.broadcast %cst_71 : f32 to vector<2x32xf32>
      %231 = arith.addf %230, %229 : vector<2x32xf32>
      %232 = arith.divf %230, %231 : vector<2x32xf32>
      %233 = vector.extract_strided_slice %220 {offsets = [0, 64], sizes = [2, 32], strides = [1, 1]} : vector<2x128xf32> to vector<2x32xf32>
      %234 = math.tanh %233 : vector<2x32xf32>
      %235 = vector.extract_strided_slice %220 {offsets = [0, 96], sizes = [2, 32], strides = [1, 1]} : vector<2x128xf32> to vector<2x32xf32>
      %236 = arith.negf %235 : vector<2x32xf32>
      %237 = math.exp %236 : vector<2x32xf32>
      %cst_72 = arith.constant 1.000000e+00 : f32
      %238 = vector.broadcast %cst_72 : f32 to vector<2x32xf32>
      %239 = arith.addf %238, %237 : vector<2x32xf32>
      %240 = arith.divf %238, %239 : vector<2x32xf32>
      %241 = arith.mulf %232, %210 : vector<2x32xf32>
      %242 = arith.mulf %226, %234 : vector<2x32xf32>
      %243 = arith.addf %241, %242 : vector<2x32xf32>
      %244 = math.tanh %243 : vector<2x32xf32>
      %245 = arith.mulf %240, %244 : vector<2x32xf32>
      %246 = arith.truncf %245 : vector<2x32xf32> to vector<2x32xbf16>
      %c0_73 = arith.constant 0 : index
      %c6_74 = arith.constant 6 : index
      %c0_75 = arith.constant 0 : index
      %c0_76 = arith.constant 0 : index
      %247 = vector.load %arg5[%c0_73, %c6_74, %c0_75, %c0_76] : memref<1x8x2x32xbf16, #tpu.memory_space<vmem>>, vector<1x1x2x32xbf16>
      %248 = vector.shape_cast %247 : vector<1x1x2x32xbf16> to vector<2x32xbf16>
      %249 = vector.shape_cast %246 : vector<2x32xbf16> to vector<1x1x2x32xbf16>
      tpu.vector_store %arg5[%c0_73, %c6_74, %c0_75, %c0_76], %249 {strides = array<i32>} : memref<1x8x2x32xbf16, #tpu.memory_space<vmem>>, vector<1x1x2x32xbf16>,
      %c14 = arith.constant 14 : index
      %c0_77 = arith.constant 0 : index
      %250 = vector.load %arg7[%c14, %c0_77] : memref<16x128xf32, #tpu.memory_space<vmem>>, vector<2x128xf32>
      %251 = arith.truncf %245 : vector<2x32xf32> to vector<2x32xbf16>
      %cst_78 = arith.constant dense<0.000000e+00> : vector<2x128xf32>
      %252 = tpu.matmul %251, %10, %cst_78 {dimension_numbers = #tpu.dot_dimension_numbers<[1], [0], [0], [1], [0, 0, 1, 1], [], []>} : vector<2x32xbf16>, vector<32x128xbf16>, vector<2x128xf32> -> vector<2x128xf32>
      %253 = arith.addf %250, %252 : vector<2x128xf32>
      %254 = vector.extract_strided_slice %253 {offsets = [0, 0], sizes = [2, 32], strides = [1, 1]} : vector<2x128xf32> to vector<2x32xf32>
      %255 = arith.negf %254 : vector<2x32xf32>
      %256 = math.exp %255 : vector<2x32xf32>
      %cst_79 = arith.constant 1.000000e+00 : f32
      %257 = vector.broadcast %cst_79 : f32 to vector<2x32xf32>
      %258 = arith.addf %257, %256 : vector<2x32xf32>
      %259 = arith.divf %257, %258 : vector<2x32xf32>
      %260 = vector.extract_strided_slice %253 {offsets = [0, 32], sizes = [2, 32], strides = [1, 1]} : vector<2x128xf32> to vector<2x32xf32>
      %261 = arith.negf %260 : vector<2x32xf32>
      %262 = math.exp %261 : vector<2x32xf32>
      %cst_80 = arith.constant 1.000000e+00 : f32
      %263 = vector.broadcast %cst_80 : f32 to vector<2x32xf32>
      %264 = arith.addf %263, %262 : vector<2x32xf32>
      %265 = arith.divf %263, %264 : vector<2x32xf32>
      %266 = vector.extract_strided_slice %253 {offsets = [0, 64], sizes = [2, 32], strides = [1, 1]} : vector<2x128xf32> to vector<2x32xf32>
      %267 = math.tanh %266 : vector<2x32xf32>
      %268 = vector.extract_strided_slice %253 {offsets = [0, 96], sizes = [2, 32], strides = [1, 1]} : vector<2x128xf32> to vector<2x32xf32>
      %269 = arith.negf %268 : vector<2x32xf32>
      %270 = math.exp %269 : vector<2x32xf32>
      %cst_81 = arith.constant 1.000000e+00 : f32
      %271 = vector.broadcast %cst_81 : f32 to vector<2x32xf32>
      %272 = arith.addf %271, %270 : vector<2x32xf32>
      %273 = arith.divf %271, %272 : vector<2x32xf32>
      %274 = arith.mulf %265, %243 : vector<2x32xf32>
      %275 = arith.mulf %259, %267 : vector<2x32xf32>
      %276 = arith.addf %274, %275 : vector<2x32xf32>
      %277 = math.tanh %276 : vector<2x32xf32>
      %278 = arith.mulf %273, %277 : vector<2x32xf32>
      %279 = arith.truncf %278 : vector<2x32xf32> to vector<2x32xbf16>
      %c0_82 = arith.constant 0 : index
      %c7 = arith.constant 7 : index
      %c0_83 = arith.constant 0 : index
      %c0_84 = arith.constant 0 : index
      %280 = vector.load %arg5[%c0_82, %c7, %c0_83, %c0_84] : memref<1x8x2x32xbf16, #tpu.memory_space<vmem>>, vector<1x1x2x32xbf16>
      %281 = vector.shape_cast %280 : vector<1x1x2x32xbf16> to vector<2x32xbf16>
      %282 = vector.shape_cast %279 : vector<2x32xbf16> to vector<1x1x2x32xbf16>
      tpu.vector_store %arg5[%c0_82, %c7, %c0_83, %c0_84], %282 {strides = array<i32>} : memref<1x8x2x32xbf16, #tpu.memory_space<vmem>>, vector<1x1x2x32xbf16>,
      %c0_85 = arith.constant 0 : index
      %c0_86 = arith.constant 0 : index
      %c0_87 = arith.constant 0 : index
      %283 = vector.load %arg6[%c0_85, %c0_86, %c0_87] : memref<1x2x32xf32, #tpu.memory_space<vmem>>, vector<1x2x32xf32>
      %284 = vector.shape_cast %283 : vector<1x2x32xf32> to vector<2x32xf32>
      %285 = vector.shape_cast %278 : vector<2x32xf32> to vector<1x2x32xf32>
      tpu.vector_store %arg6[%c0_85, %c0_86, %c0_87], %285 {strides = array<i32>} : memref<1x2x32xf32, #tpu.memory_space<vmem>>, vector<1x2x32xf32>,
    } else {
    }
    %c1_i32 = arith.constant 1 : i32
    %14 = arith.cmpi eq, %arg0, %c1_i32 : i32
    %15 = arith.extui %14 : i1 to i32
    %c0_i32_13 = arith.constant 0 : i32
    %16 = arith.cmpi ne, %15, %c0_i32_13 : i32
    scf.if %16 {
      %cst_14 = arith.constant 0.000000e+00 : f32
      %17 = vector.broadcast %cst_14 : f32 to vector<2x32xf32>
      %cst_15 = arith.constant 0.000000e+00 : f32
      %18 = vector.broadcast %cst_15 : f32 to vector<2x32xf32>
      %c14 = arith.constant 14 : index
      %c0_16 = arith.constant 0 : index
      %19 = vector.load %arg7[%c14, %c0_16] : memref<16x128xf32, #tpu.memory_space<vmem>>, vector<2x128xf32>
      %20 = arith.truncf %17 : vector<2x32xf32> to vector<2x32xbf16>
      %cst_17 = arith.constant dense<0.000000e+00> : vector<2x128xf32>
      %21 = tpu.matmul %20, %10, %cst_17 {dimension_numbers = #tpu.dot_dimension_numbers<[1], [0], [0], [1], [0, 0, 1, 1], [], []>} : vector<2x32xbf16>, vector<32x128xbf16>, vector<2x128xf32> -> vector<2x128xf32>
      %22 = arith.addf %19, %21 : vector<2x128xf32>
      %23 = vector.extract_strided_slice %22 {offsets = [0, 0], sizes = [2, 32], strides = [1, 1]} : vector<2x128xf32> to vector<2x32xf32>
      %24 = arith.negf %23 : vector<2x32xf32>
      %25 = math.exp %24 : vector<2x32xf32>
      %cst_18 = arith.constant 1.000000e+00 : f32
      %26 = vector.broadcast %cst_18 : f32 to vector<2x32xf32>
      %27 = arith.addf %26, %25 : vector<2x32xf32>
      %28 = arith.divf %26, %27 : vector<2x32xf32>
      %29 = vector.extract_strided_slice %22 {offsets = [0, 32], sizes = [2, 32], strides = [1, 1]} : vector<2x128xf32> to vector<2x32xf32>
      %30 = arith.negf %29 : vector<2x32xf32>
      %31 = math.exp %30 : vector<2x32xf32>
      %cst_19 = arith.constant 1.000000e+00 : f32
      %32 = vector.broadcast %cst_19 : f32 to vector<2x32xf32>
      %33 = arith.addf %32, %31 : vector<2x32xf32>
      %34 = arith.divf %32, %33 : vector<2x32xf32>
      %35 = vector.extract_strided_slice %22 {offsets = [0, 64], sizes = [2, 32], strides = [1, 1]} : vector<2x128xf32> to vector<2x32xf32>
      %36 = math.tanh %35 : vector<2x32xf32>
      %37 = vector.extract_strided_slice %22 {offsets = [0, 96], sizes = [2, 32], strides = [1, 1]} : vector<2x128xf32> to vector<2x32xf32>
      %38 = arith.negf %37 : vector<2x32xf32>
      %39 = math.exp %38 : vector<2x32xf32>
      %cst_20 = arith.constant 1.000000e+00 : f32
      %40 = vector.broadcast %cst_20 : f32 to vector<2x32xf32>
      %41 = arith.addf %40, %39 : vector<2x32xf32>
      %42 = arith.divf %40, %41 : vector<2x32xf32>
      %43 = arith.mulf %34, %18 : vector<2x32xf32>
      %44 = arith.mulf %28, %36 : vector<2x32xf32>
      %45 = arith.addf %43, %44 : vector<2x32xf32>
      %46 = math.tanh %45 : vector<2x32xf32>
      %47 = arith.mulf %42, %46 : vector<2x32xf32>
      %48 = arith.truncf %47 : vector<2x32xf32> to vector<2x32xbf16>
      %c0_21 = arith.constant 0 : index
      %c7 = arith.constant 7 : index
      %c0_22 = arith.constant 0 : index
      %c0_23 = arith.constant 0 : index
      %49 = vector.load %arg5[%c0_21, %c7, %c0_22, %c0_23] : memref<1x8x2x32xbf16, #tpu.memory_space<vmem>>, vector<1x1x2x32xbf16>
      %50 = vector.shape_cast %49 : vector<1x1x2x32xbf16> to vector<2x32xbf16>
      %51 = vector.shape_cast %48 : vector<2x32xbf16> to vector<1x1x2x32xbf16>
      tpu.vector_store %arg5[%c0_21, %c7, %c0_22, %c0_23], %51 {strides = array<i32>} : memref<1x8x2x32xbf16, #tpu.memory_space<vmem>>, vector<1x1x2x32xbf16>,
      %c0_24 = arith.constant 0 : index
      %c0_25 = arith.constant 0 : index
      %c0_26 = arith.constant 0 : index
      %52 = vector.load %arg6[%c0_24, %c0_25, %c0_26] : memref<1x2x32xf32, #tpu.memory_space<vmem>>, vector<1x2x32xf32>
      %53 = vector.shape_cast %52 : vector<1x2x32xf32> to vector<2x32xf32>
      %54 = vector.shape_cast %47 : vector<2x32xf32> to vector<1x2x32xf32>
      tpu.vector_store %arg6[%c0_24, %c0_25, %c0_26], %54 {strides = array<i32>} : memref<1x2x32xf32, #tpu.memory_space<vmem>>, vector<1x2x32xf32>,
      %c12 = arith.constant 12 : index
      %c0_27 = arith.constant 0 : index
      %55 = vector.load %arg7[%c12, %c0_27] : memref<16x128xf32, #tpu.memory_space<vmem>>, vector<2x128xf32>
      %56 = arith.truncf %47 : vector<2x32xf32> to vector<2x32xbf16>
      %cst_28 = arith.constant dense<0.000000e+00> : vector<2x128xf32>
      %57 = tpu.matmul %56, %10, %cst_28 {dimension_numbers = #tpu.dot_dimension_numbers<[1], [0], [0], [1], [0, 0, 1, 1], [], []>} : vector<2x32xbf16>, vector<32x128xbf16>, vector<2x128xf32> -> vector<2x128xf32>
      %58 = arith.addf %55, %57 : vector<2x128xf32>
      %59 = vector.extract_strided_slice %58 {offsets = [0, 0], sizes = [2, 32], strides = [1, 1]} : vector<2x128xf32> to vector<2x32xf32>
      %60 = arith.negf %59 : vector<2x32xf32>
      %61 = math.exp %60 : vector<2x32xf32>
      %cst_29 = arith.constant 1.000000e+00 : f32
      %62 = vector.broadcast %cst_29 : f32 to vector<2x32xf32>
      %63 = arith.addf %62, %61 : vector<2x32xf32>
      %64 = arith.divf %62, %63 : vector<2x32xf32>
      %65 = vector.extract_strided_slice %58 {offsets = [0, 32], sizes = [2, 32], strides = [1, 1]} : vector<2x128xf32> to vector<2x32xf32>
      %66 = arith.negf %65 : vector<2x32xf32>
      %67 = math.exp %66 : vector<2x32xf32>
      %cst_30 = arith.constant 1.000000e+00 : f32
      %68 = vector.broadcast %cst_30 : f32 to vector<2x32xf32>
      %69 = arith.addf %68, %67 : vector<2x32xf32>
      %70 = arith.divf %68, %69 : vector<2x32xf32>
      %71 = vector.extract_strided_slice %58 {offsets = [0, 64], sizes = [2, 32], strides = [1, 1]} : vector<2x128xf32> to vector<2x32xf32>
      %72 = math.tanh %71 : vector<2x32xf32>
      %73 = vector.extract_strided_slice %58 {offsets = [0, 96], sizes = [2, 32], strides = [1, 1]} : vector<2x128xf32> to vector<2x32xf32>
      %74 = arith.negf %73 : vector<2x32xf32>
      %75 = math.exp %74 : vector<2x32xf32>
      %cst_31 = arith.constant 1.000000e+00 : f32
      %76 = vector.broadcast %cst_31 : f32 to vector<2x32xf32>
      %77 = arith.addf %76, %75 : vector<2x32xf32>
      %78 = arith.divf %76, %77 : vector<2x32xf32>
      %79 = arith.mulf %70, %45 : vector<2x32xf32>
      %80 = arith.mulf %64, %72 : vector<2x32xf32>
      %81 = arith.addf %79, %80 : vector<2x32xf32>
      %82 = math.tanh %81 : vector<2x32xf32>
      %83 = arith.mulf %78, %82 : vector<2x32xf32>
      %84 = arith.truncf %83 : vector<2x32xf32> to vector<2x32xbf16>
      %c0_32 = arith.constant 0 : index
      %c6 = arith.constant 6 : index
      %c0_33 = arith.constant 0 : index
      %c0_34 = arith.constant 0 : index
      %85 = vector.load %arg5[%c0_32, %c6, %c0_33, %c0_34] : memref<1x8x2x32xbf16, #tpu.memory_space<vmem>>, vector<1x1x2x32xbf16>
      %86 = vector.shape_cast %85 : vector<1x1x2x32xbf16> to vector<2x32xbf16>
      %87 = vector.shape_cast %84 : vector<2x32xbf16> to vector<1x1x2x32xbf16>
      tpu.vector_store %arg5[%c0_32, %c6, %c0_33, %c0_34], %87 {strides = array<i32>} : memref<1x8x2x32xbf16, #tpu.memory_space<vmem>>, vector<1x1x2x32xbf16>,
      %c10 = arith.constant 10 : index
      %c0_35 = arith.constant 0 : index
      %88 = vector.load %arg7[%c10, %c0_35] : memref<16x128xf32, #tpu.memory_space<vmem>>, vector<2x128xf32>
      %89 = arith.truncf %83 : vector<2x32xf32> to vector<2x32xbf16>
      %cst_36 = arith.constant dense<0.000000e+00> : vector<2x128xf32>
      %90 = tpu.matmul %89, %10, %cst_36 {dimension_numbers = #tpu.dot_dimension_numbers<[1], [0], [0], [1], [0, 0, 1, 1], [], []>} : vector<2x32xbf16>, vector<32x128xbf16>, vector<2x128xf32> -> vector<2x128xf32>
      %91 = arith.addf %88, %90 : vector<2x128xf32>
      %92 = vector.extract_strided_slice %91 {offsets = [0, 0], sizes = [2, 32], strides = [1, 1]} : vector<2x128xf32> to vector<2x32xf32>
      %93 = arith.negf %92 : vector<2x32xf32>
      %94 = math.exp %93 : vector<2x32xf32>
      %cst_37 = arith.constant 1.000000e+00 : f32
      %95 = vector.broadcast %cst_37 : f32 to vector<2x32xf32>
      %96 = arith.addf %95, %94 : vector<2x32xf32>
      %97 = arith.divf %95, %96 : vector<2x32xf32>
      %98 = vector.extract_strided_slice %91 {offsets = [0, 32], sizes = [2, 32], strides = [1, 1]} : vector<2x128xf32> to vector<2x32xf32>
      %99 = arith.negf %98 : vector<2x32xf32>
      %100 = math.exp %99 : vector<2x32xf32>
      %cst_38 = arith.constant 1.000000e+00 : f32
      %101 = vector.broadcast %cst_38 : f32 to vector<2x32xf32>
      %102 = arith.addf %101, %100 : vector<2x32xf32>
      %103 = arith.divf %101, %102 : vector<2x32xf32>
      %104 = vector.extract_strided_slice %91 {offsets = [0, 64], sizes = [2, 32], strides = [1, 1]} : vector<2x128xf32> to vector<2x32xf32>
      %105 = math.tanh %104 : vector<2x32xf32>
      %106 = vector.extract_strided_slice %91 {offsets = [0, 96], sizes = [2, 32], strides = [1, 1]} : vector<2x128xf32> to vector<2x32xf32>
      %107 = arith.negf %106 : vector<2x32xf32>
      %108 = math.exp %107 : vector<2x32xf32>
      %cst_39 = arith.constant 1.000000e+00 : f32
      %109 = vector.broadcast %cst_39 : f32 to vector<2x32xf32>
      %110 = arith.addf %109, %108 : vector<2x32xf32>
      %111 = arith.divf %109, %110 : vector<2x32xf32>
      %112 = arith.mulf %103, %81 : vector<2x32xf32>
      %113 = arith.mulf %97, %105 : vector<2x32xf32>
      %114 = arith.addf %112, %113 : vector<2x32xf32>
      %115 = math.tanh %114 : vector<2x32xf32>
      %116 = arith.mulf %111, %115 : vector<2x32xf32>
      %117 = arith.truncf %116 : vector<2x32xf32> to vector<2x32xbf16>
      %c0_40 = arith.constant 0 : index
      %c5 = arith.constant 5 : index
      %c0_41 = arith.constant 0 : index
      %c0_42 = arith.constant 0 : index
      %118 = vector.load %arg5[%c0_40, %c5, %c0_41, %c0_42] : memref<1x8x2x32xbf16, #tpu.memory_space<vmem>>, vector<1x1x2x32xbf16>
      %119 = vector.shape_cast %118 : vector<1x1x2x32xbf16> to vector<2x32xbf16>
      %120 = vector.shape_cast %117 : vector<2x32xbf16> to vector<1x1x2x32xbf16>
      tpu.vector_store %arg5[%c0_40, %c5, %c0_41, %c0_42], %120 {strides = array<i32>} : memref<1x8x2x32xbf16, #tpu.memory_space<vmem>>, vector<1x1x2x32xbf16>,
      %c8 = arith.constant 8 : index
      %c0_43 = arith.constant 0 : index
      %121 = vector.load %arg7[%c8, %c0_43] : memref<16x128xf32, #tpu.memory_space<vmem>>, vector<2x128xf32>
      %122 = arith.truncf %116 : vector<2x32xf32> to vector<2x32xbf16>
      %cst_44 = arith.constant dense<0.000000e+00> : vector<2x128xf32>
      %123 = tpu.matmul %122, %10, %cst_44 {dimension_numbers = #tpu.dot_dimension_numbers<[1], [0], [0], [1], [0, 0, 1, 1], [], []>} : vector<2x32xbf16>, vector<32x128xbf16>, vector<2x128xf32> -> vector<2x128xf32>
      %124 = arith.addf %121, %123 : vector<2x128xf32>
      %125 = vector.extract_strided_slice %124 {offsets = [0, 0], sizes = [2, 32], strides = [1, 1]} : vector<2x128xf32> to vector<2x32xf32>
      %126 = arith.negf %125 : vector<2x32xf32>
      %127 = math.exp %126 : vector<2x32xf32>
      %cst_45 = arith.constant 1.000000e+00 : f32
      %128 = vector.broadcast %cst_45 : f32 to vector<2x32xf32>
      %129 = arith.addf %128, %127 : vector<2x32xf32>
      %130 = arith.divf %128, %129 : vector<2x32xf32>
      %131 = vector.extract_strided_slice %124 {offsets = [0, 32], sizes = [2, 32], strides = [1, 1]} : vector<2x128xf32> to vector<2x32xf32>
      %132 = arith.negf %131 : vector<2x32xf32>
      %133 = math.exp %132 : vector<2x32xf32>
      %cst_46 = arith.constant 1.000000e+00 : f32
      %134 = vector.broadcast %cst_46 : f32 to vector<2x32xf32>
      %135 = arith.addf %134, %133 : vector<2x32xf32>
      %136 = arith.divf %134, %135 : vector<2x32xf32>
      %137 = vector.extract_strided_slice %124 {offsets = [0, 64], sizes = [2, 32], strides = [1, 1]} : vector<2x128xf32> to vector<2x32xf32>
      %138 = math.tanh %137 : vector<2x32xf32>
      %139 = vector.extract_strided_slice %124 {offsets = [0, 96], sizes = [2, 32], strides = [1, 1]} : vector<2x128xf32> to vector<2x32xf32>
      %140 = arith.negf %139 : vector<2x32xf32>
      %141 = math.exp %140 : vector<2x32xf32>
      %cst_47 = arith.constant 1.000000e+00 : f32
      %142 = vector.broadcast %cst_47 : f32 to vector<2x32xf32>
      %143 = arith.addf %142, %141 : vector<2x32xf32>
      %144 = arith.divf %142, %143 : vector<2x32xf32>
      %145 = arith.mulf %136, %114 : vector<2x32xf32>
      %146 = arith.mulf %130, %138 : vector<2x32xf32>
      %147 = arith.addf %145, %146 : vector<2x32xf32>
      %148 = math.tanh %147 : vector<2x32xf32>
      %149 = arith.mulf %144, %148 : vector<2x32xf32>
      %150 = arith.truncf %149 : vector<2x32xf32> to vector<2x32xbf16>
      %c0_48 = arith.constant 0 : index
      %c4 = arith.constant 4 : index
      %c0_49 = arith.constant 0 : index
      %c0_50 = arith.constant 0 : index
      %151 = vector.load %arg5[%c0_48, %c4, %c0_49, %c0_50] : memref<1x8x2x32xbf16, #tpu.memory_space<vmem>>, vector<1x1x2x32xbf16>
      %152 = vector.shape_cast %151 : vector<1x1x2x32xbf16> to vector<2x32xbf16>
      %153 = vector.shape_cast %150 : vector<2x32xbf16> to vector<1x1x2x32xbf16>
      tpu.vector_store %arg5[%c0_48, %c4, %c0_49, %c0_50], %153 {strides = array<i32>} : memref<1x8x2x32xbf16, #tpu.memory_space<vmem>>, vector<1x1x2x32xbf16>,
      %c6_51 = arith.constant 6 : index
      %c0_52 = arith.constant 0 : index
      %154 = vector.load %arg7[%c6_51, %c0_52] : memref<16x128xf32, #tpu.memory_space<vmem>>, vector<2x128xf32>
      %155 = arith.truncf %149 : vector<2x32xf32> to vector<2x32xbf16>
      %cst_53 = arith.constant dense<0.000000e+00> : vector<2x128xf32>
      %156 = tpu.matmul %155, %10, %cst_53 {dimension_numbers = #tpu.dot_dimension_numbers<[1], [0], [0], [1], [0, 0, 1, 1], [], []>} : vector<2x32xbf16>, vector<32x128xbf16>, vector<2x128xf32> -> vector<2x128xf32>
      %157 = arith.addf %154, %156 : vector<2x128xf32>
      %158 = vector.extract_strided_slice %157 {offsets = [0, 0], sizes = [2, 32], strides = [1, 1]} : vector<2x128xf32> to vector<2x32xf32>
      %159 = arith.negf %158 : vector<2x32xf32>
      %160 = math.exp %159 : vector<2x32xf32>
      %cst_54 = arith.constant 1.000000e+00 : f32
      %161 = vector.broadcast %cst_54 : f32 to vector<2x32xf32>
      %162 = arith.addf %161, %160 : vector<2x32xf32>
      %163 = arith.divf %161, %162 : vector<2x32xf32>
      %164 = vector.extract_strided_slice %157 {offsets = [0, 32], sizes = [2, 32], strides = [1, 1]} : vector<2x128xf32> to vector<2x32xf32>
      %165 = arith.negf %164 : vector<2x32xf32>
      %166 = math.exp %165 : vector<2x32xf32>
      %cst_55 = arith.constant 1.000000e+00 : f32
      %167 = vector.broadcast %cst_55 : f32 to vector<2x32xf32>
      %168 = arith.addf %167, %166 : vector<2x32xf32>
      %169 = arith.divf %167, %168 : vector<2x32xf32>
      %170 = vector.extract_strided_slice %157 {offsets = [0, 64], sizes = [2, 32], strides = [1, 1]} : vector<2x128xf32> to vector<2x32xf32>
      %171 = math.tanh %170 : vector<2x32xf32>
      %172 = vector.extract_strided_slice %157 {offsets = [0, 96], sizes = [2, 32], strides = [1, 1]} : vector<2x128xf32> to vector<2x32xf32>
      %173 = arith.negf %172 : vector<2x32xf32>
      %174 = math.exp %173 : vector<2x32xf32>
      %cst_56 = arith.constant 1.000000e+00 : f32
      %175 = vector.broadcast %cst_56 : f32 to vector<2x32xf32>
      %176 = arith.addf %175, %174 : vector<2x32xf32>
      %177 = arith.divf %175, %176 : vector<2x32xf32>
      %178 = arith.mulf %169, %147 : vector<2x32xf32>
      %179 = arith.mulf %163, %171 : vector<2x32xf32>
      %180 = arith.addf %178, %179 : vector<2x32xf32>
      %181 = math.tanh %180 : vector<2x32xf32>
      %182 = arith.mulf %177, %181 : vector<2x32xf32>
      %183 = arith.truncf %182 : vector<2x32xf32> to vector<2x32xbf16>
      %c0_57 = arith.constant 0 : index
      %c3 = arith.constant 3 : index
      %c0_58 = arith.constant 0 : index
      %c0_59 = arith.constant 0 : index
      %184 = vector.load %arg5[%c0_57, %c3, %c0_58, %c0_59] : memref<1x8x2x32xbf16, #tpu.memory_space<vmem>>, vector<1x1x2x32xbf16>
      %185 = vector.shape_cast %184 : vector<1x1x2x32xbf16> to vector<2x32xbf16>
      %186 = vector.shape_cast %183 : vector<2x32xbf16> to vector<1x1x2x32xbf16>
      tpu.vector_store %arg5[%c0_57, %c3, %c0_58, %c0_59], %186 {strides = array<i32>} : memref<1x8x2x32xbf16, #tpu.memory_space<vmem>>, vector<1x1x2x32xbf16>,
      %c4_60 = arith.constant 4 : index
      %c0_61 = arith.constant 0 : index
      %187 = vector.load %arg7[%c4_60, %c0_61] : memref<16x128xf32, #tpu.memory_space<vmem>>, vector<2x128xf32>
      %188 = arith.truncf %182 : vector<2x32xf32> to vector<2x32xbf16>
      %cst_62 = arith.constant dense<0.000000e+00> : vector<2x128xf32>
      %189 = tpu.matmul %188, %10, %cst_62 {dimension_numbers = #tpu.dot_dimension_numbers<[1], [0], [0], [1], [0, 0, 1, 1], [], []>} : vector<2x32xbf16>, vector<32x128xbf16>, vector<2x128xf32> -> vector<2x128xf32>
      %190 = arith.addf %187, %189 : vector<2x128xf32>
      %191 = vector.extract_strided_slice %190 {offsets = [0, 0], sizes = [2, 32], strides = [1, 1]} : vector<2x128xf32> to vector<2x32xf32>
      %192 = arith.negf %191 : vector<2x32xf32>
      %193 = math.exp %192 : vector<2x32xf32>
      %cst_63 = arith.constant 1.000000e+00 : f32
      %194 = vector.broadcast %cst_63 : f32 to vector<2x32xf32>
      %195 = arith.addf %194, %193 : vector<2x32xf32>
      %196 = arith.divf %194, %195 : vector<2x32xf32>
      %197 = vector.extract_strided_slice %190 {offsets = [0, 32], sizes = [2, 32], strides = [1, 1]} : vector<2x128xf32> to vector<2x32xf32>
      %198 = arith.negf %197 : vector<2x32xf32>
      %199 = math.exp %198 : vector<2x32xf32>
      %cst_64 = arith.constant 1.000000e+00 : f32
      %200 = vector.broadcast %cst_64 : f32 to vector<2x32xf32>
      %201 = arith.addf %200, %199 : vector<2x32xf32>
      %202 = arith.divf %200, %201 : vector<2x32xf32>
      %203 = vector.extract_strided_slice %190 {offsets = [0, 64], sizes = [2, 32], strides = [1, 1]} : vector<2x128xf32> to vector<2x32xf32>
      %204 = math.tanh %203 : vector<2x32xf32>
      %205 = vector.extract_strided_slice %190 {offsets = [0, 96], sizes = [2, 32], strides = [1, 1]} : vector<2x128xf32> to vector<2x32xf32>
      %206 = arith.negf %205 : vector<2x32xf32>
      %207 = math.exp %206 : vector<2x32xf32>
      %cst_65 = arith.constant 1.000000e+00 : f32
      %208 = vector.broadcast %cst_65 : f32 to vector<2x32xf32>
      %209 = arith.addf %208, %207 : vector<2x32xf32>
      %210 = arith.divf %208, %209 : vector<2x32xf32>
      %211 = arith.mulf %202, %180 : vector<2x32xf32>
      %212 = arith.mulf %196, %204 : vector<2x32xf32>
      %213 = arith.addf %211, %212 : vector<2x32xf32>
      %214 = math.tanh %213 : vector<2x32xf32>
      %215 = arith.mulf %210, %214 : vector<2x32xf32>
      %216 = arith.truncf %215 : vector<2x32xf32> to vector<2x32xbf16>
      %c0_66 = arith.constant 0 : index
      %c2 = arith.constant 2 : index
      %c0_67 = arith.constant 0 : index
      %c0_68 = arith.constant 0 : index
      %217 = vector.load %arg5[%c0_66, %c2, %c0_67, %c0_68] : memref<1x8x2x32xbf16, #tpu.memory_space<vmem>>, vector<1x1x2x32xbf16>
      %218 = vector.shape_cast %217 : vector<1x1x2x32xbf16> to vector<2x32xbf16>
      %219 = vector.shape_cast %216 : vector<2x32xbf16> to vector<1x1x2x32xbf16>
      tpu.vector_store %arg5[%c0_66, %c2, %c0_67, %c0_68], %219 {strides = array<i32>} : memref<1x8x2x32xbf16, #tpu.memory_space<vmem>>, vector<1x1x2x32xbf16>,
      %c2_69 = arith.constant 2 : index
      %c0_70 = arith.constant 0 : index
      %220 = vector.load %arg7[%c2_69, %c0_70] : memref<16x128xf32, #tpu.memory_space<vmem>>, vector<2x128xf32>
      %221 = arith.truncf %215 : vector<2x32xf32> to vector<2x32xbf16>
      %cst_71 = arith.constant dense<0.000000e+00> : vector<2x128xf32>
      %222 = tpu.matmul %221, %10, %cst_71 {dimension_numbers = #tpu.dot_dimension_numbers<[1], [0], [0], [1], [0, 0, 1, 1], [], []>} : vector<2x32xbf16>, vector<32x128xbf16>, vector<2x128xf32> -> vector<2x128xf32>
      %223 = arith.addf %220, %222 : vector<2x128xf32>
      %224 = vector.extract_strided_slice %223 {offsets = [0, 0], sizes = [2, 32], strides = [1, 1]} : vector<2x128xf32> to vector<2x32xf32>
      %225 = arith.negf %224 : vector<2x32xf32>
      %226 = math.exp %225 : vector<2x32xf32>
      %cst_72 = arith.constant 1.000000e+00 : f32
      %227 = vector.broadcast %cst_72 : f32 to vector<2x32xf32>
      %228 = arith.addf %227, %226 : vector<2x32xf32>
      %229 = arith.divf %227, %228 : vector<2x32xf32>
      %230 = vector.extract_strided_slice %223 {offsets = [0, 32], sizes = [2, 32], strides = [1, 1]} : vector<2x128xf32> to vector<2x32xf32>
      %231 = arith.negf %230 : vector<2x32xf32>
      %232 = math.exp %231 : vector<2x32xf32>
      %cst_73 = arith.constant 1.000000e+00 : f32
      %233 = vector.broadcast %cst_73 : f32 to vector<2x32xf32>
      %234 = arith.addf %233, %232 : vector<2x32xf32>
      %235 = arith.divf %233, %234 : vector<2x32xf32>
      %236 = vector.extract_strided_slice %223 {offsets = [0, 64], sizes = [2, 32], strides = [1, 1]} : vector<2x128xf32> to vector<2x32xf32>
      %237 = math.tanh %236 : vector<2x32xf32>
      %238 = vector.extract_strided_slice %223 {offsets = [0, 96], sizes = [2, 32], strides = [1, 1]} : vector<2x128xf32> to vector<2x32xf32>
      %239 = arith.negf %238 : vector<2x32xf32>
      %240 = math.exp %239 : vector<2x32xf32>
      %cst_74 = arith.constant 1.000000e+00 : f32
      %241 = vector.broadcast %cst_74 : f32 to vector<2x32xf32>
      %242 = arith.addf %241, %240 : vector<2x32xf32>
      %243 = arith.divf %241, %242 : vector<2x32xf32>
      %244 = arith.mulf %235, %213 : vector<2x32xf32>
      %245 = arith.mulf %229, %237 : vector<2x32xf32>
      %246 = arith.addf %244, %245 : vector<2x32xf32>
      %247 = math.tanh %246 : vector<2x32xf32>
      %248 = arith.mulf %243, %247 : vector<2x32xf32>
      %249 = arith.truncf %248 : vector<2x32xf32> to vector<2x32xbf16>
      %c0_75 = arith.constant 0 : index
      %c1 = arith.constant 1 : index
      %c0_76 = arith.constant 0 : index
      %c0_77 = arith.constant 0 : index
      %250 = vector.load %arg5[%c0_75, %c1, %c0_76, %c0_77] : memref<1x8x2x32xbf16, #tpu.memory_space<vmem>>, vector<1x1x2x32xbf16>
      %251 = vector.shape_cast %250 : vector<1x1x2x32xbf16> to vector<2x32xbf16>
      %252 = vector.shape_cast %249 : vector<2x32xbf16> to vector<1x1x2x32xbf16>
      tpu.vector_store %arg5[%c0_75, %c1, %c0_76, %c0_77], %252 {strides = array<i32>} : memref<1x8x2x32xbf16, #tpu.memory_space<vmem>>, vector<1x1x2x32xbf16>,
      %c0_78 = arith.constant 0 : index
      %c0_79 = arith.constant 0 : index
      %253 = vector.load %arg7[%c0_78, %c0_79] : memref<16x128xf32, #tpu.memory_space<vmem>>, vector<2x128xf32>
      %254 = arith.truncf %248 : vector<2x32xf32> to vector<2x32xbf16>
      %cst_80 = arith.constant dense<0.000000e+00> : vector<2x128xf32>
      %255 = tpu.matmul %254, %10, %cst_80 {dimension_numbers = #tpu.dot_dimension_numbers<[1], [0], [0], [1], [0, 0, 1, 1], [], []>} : vector<2x32xbf16>, vector<32x128xbf16>, vector<2x128xf32> -> vector<2x128xf32>
      %256 = arith.addf %253, %255 : vector<2x128xf32>
      %257 = vector.extract_strided_slice %256 {offsets = [0, 0], sizes = [2, 32], strides = [1, 1]} : vector<2x128xf32> to vector<2x32xf32>
      %258 = arith.negf %257 : vector<2x32xf32>
      %259 = math.exp %258 : vector<2x32xf32>
      %cst_81 = arith.constant 1.000000e+00 : f32
      %260 = vector.broadcast %cst_81 : f32 to vector<2x32xf32>
      %261 = arith.addf %260, %259 : vector<2x32xf32>
      %262 = arith.divf %260, %261 : vector<2x32xf32>
      %263 = vector.extract_strided_slice %256 {offsets = [0, 32], sizes = [2, 32], strides = [1, 1]} : vector<2x128xf32> to vector<2x32xf32>
      %264 = arith.negf %263 : vector<2x32xf32>
      %265 = math.exp %264 : vector<2x32xf32>
      %cst_82 = arith.constant 1.000000e+00 : f32
      %266 = vector.broadcast %cst_82 : f32 to vector<2x32xf32>
      %267 = arith.addf %266, %265 : vector<2x32xf32>
      %268 = arith.divf %266, %267 : vector<2x32xf32>
      %269 = vector.extract_strided_slice %256 {offsets = [0, 64], sizes = [2, 32], strides = [1, 1]} : vector<2x128xf32> to vector<2x32xf32>
      %270 = math.tanh %269 : vector<2x32xf32>
      %271 = vector.extract_strided_slice %256 {offsets = [0, 96], sizes = [2, 32], strides = [1, 1]} : vector<2x128xf32> to vector<2x32xf32>
      %272 = arith.negf %271 : vector<2x32xf32>
      %273 = math.exp %272 : vector<2x32xf32>
      %cst_83 = arith.constant 1.000000e+00 : f32
      %274 = vector.broadcast %cst_83 : f32 to vector<2x32xf32>
      %275 = arith.addf %274, %273 : vector<2x32xf32>
      %276 = arith.divf %274, %275 : vector<2x32xf32>
      %277 = arith.mulf %268, %246 : vector<2x32xf32>
      %278 = arith.mulf %262, %270 : vector<2x32xf32>
      %279 = arith.addf %277, %278 : vector<2x32xf32>
      %280 = math.tanh %279 : vector<2x32xf32>
      %281 = arith.mulf %276, %280 : vector<2x32xf32>
      %282 = arith.truncf %281 : vector<2x32xf32> to vector<2x32xbf16>
      %c0_84 = arith.constant 0 : index
      %c0_85 = arith.constant 0 : index
      %c0_86 = arith.constant 0 : index
      %c0_87 = arith.constant 0 : index
      %283 = vector.load %arg5[%c0_84, %c0_85, %c0_86, %c0_87] : memref<1x8x2x32xbf16, #tpu.memory_space<vmem>>, vector<1x1x2x32xbf16>
      %284 = vector.shape_cast %283 : vector<1x1x2x32xbf16> to vector<2x32xbf16>
      %285 = vector.shape_cast %282 : vector<2x32xbf16> to vector<1x1x2x32xbf16>
      tpu.vector_store %arg5[%c0_84, %c0_85, %c0_86, %c0_87], %285 {strides = array<i32>} : memref<1x8x2x32xbf16, #tpu.memory_space<vmem>>, vector<1x1x2x32xbf16>,
    } else {
    }
    return
  }
  func.func @transform_0(%arg0: i32) -> (i32, i32) {
    %c0_i32 = arith.constant 0 : i32
    %c0_i32_0 = arith.constant 0 : i32
    %c0_i32_1 = arith.constant 0 : i32
    return %c0_i32, %c0_i32_0 : i32, i32
  }
  func.func @transform_1(%arg0: i32) -> (i32, i32, i32) {
    %c0_i32 = arith.constant 0 : i32
    %c0_i32_0 = arith.constant 0 : i32
    %c0_i32_1 = arith.constant 0 : i32
    return %arg0, %c0_i32, %c0_i32_0 : i32, i32, i32
  }
  func.func @transform_2(%arg0: i32) -> (i32, i32, i32) {
    %c0_i32 = arith.constant 0 : i32
    %c0_i32_0 = arith.constant 0 : i32
    %c0_i32_1 = arith.constant 0 : i32
    return %arg0, %c0_i32, %c0_i32_0 : i32, i32, i32
  }
  func.func @transform_3(%arg0: i32) -> (i32, i32, i32) {
    %c0_i32 = arith.constant 0 : i32
    %c0_i32_0 = arith.constant 0 : i32
    %c0_i32_1 = arith.constant 0 : i32
    return %arg0, %c0_i32, %c0_i32_0 : i32, i32, i32
  }
  func.func @transform_4(%arg0: i32) -> (i32, i32, i32, i32) {
    %c0_i32 = arith.constant 0 : i32
    %c0_i32_0 = arith.constant 0 : i32
    %c0_i32_1 = arith.constant 0 : i32
    %c0_i32_2 = arith.constant 0 : i32
    return %arg0, %c0_i32, %c0_i32_0, %c0_i32_1 : i32, i32, i32, i32
  }
  func.func @transform_5(%arg0: i32) -> (i32, i32, i32) {
    %c0_i32 = arith.constant 0 : i32
    %c0_i32_0 = arith.constant 0 : i32
    %c0_i32_1 = arith.constant 0 : i32
    return %arg0, %c0_i32, %c0_i32_0 : i32, i32, i32
  }
}

module attributes {stable_mosaic.version = 11 : i64} {
  func.func @kernel(%arg0: i32, %arg1: memref<16x64xbf16, #tpu.memory_space<vmem>>, %arg2: memref<1x64x128xbf16, #tpu.memory_space<vmem>>, %arg3: memref<1x32x128xbf16, #tpu.memory_space<vmem>>, %arg4: memref<1x1x128xf32, #tpu.memory_space<vmem>>, %arg5: memref<1x2x32xf32, #tpu.memory_space<vmem>>, %arg6: memref<16x128xf32, #tpu.memory_space<vmem>>) attributes {dimension_semantics = [#tpu.dimension_semantics<parallel>], iteration_bounds = array<i64: 2>, scalar_prefetch = 0 : i64, scratch_operands = 1 : i64, tpu.core_type = #tpu.core_type<tc>, window_params = [{pipeline_mode = #tpu.pipeline_mode<synchronous>, transform_indices = @transform_0, window_bounds = array<i64: 16, 64>}, {transform_indices = @transform_1, window_bounds = array<i64: 1, 64, 128>}, {transform_indices = @transform_2, window_bounds = array<i64: 1, 32, 128>}, {transform_indices = @transform_3, window_bounds = array<i64: 1, 1, 128>}, {transform_indices = @transform_4, window_bounds = array<i64: 1, 2, 32>}]} {
    %c0 = arith.constant 0 : index
    %c0_0 = arith.constant 0 : index
    %0 = vector.load %arg1[%c0, %c0_0] : memref<16x64xbf16, #tpu.memory_space<vmem>>, vector<16x64xbf16>
    %c0_1 = arith.constant 0 : index
    %c0_2 = arith.constant 0 : index
    %c0_3 = arith.constant 0 : index
    %1 = vector.load %arg2[%c0_1, %c0_2, %c0_3] : memref<1x64x128xbf16, #tpu.memory_space<vmem>>, vector<1x64x128xbf16>
    %2 = vector.shape_cast %1 : vector<1x64x128xbf16> to vector<64x128xbf16>
    %cst = arith.constant dense<0.000000e+00> : vector<16x128xf32>
    %3 = tpu.matmul %0, %2, %cst {dimension_numbers = #tpu.dot_dimension_numbers<[1], [0], [0], [1], [0, 0, 1, 1], [], []>} : vector<16x64xbf16>, vector<64x128xbf16>, vector<16x128xf32> -> vector<16x128xf32>
    %c0_4 = arith.constant 0 : index
    %c0_5 = arith.constant 0 : index
    %c0_6 = arith.constant 0 : index
    %4 = vector.load %arg4[%c0_4, %c0_5, %c0_6] : memref<1x1x128xf32, #tpu.memory_space<vmem>>, vector<1x1x128xf32>
    %5 = vector.shape_cast %4 : vector<1x1x128xf32> to vector<1x128xf32>
    %6 = vector.broadcast %5 : vector<1x128xf32> to vector<16x128xf32>
    %7 = arith.addf %3, %6 : vector<16x128xf32>
    %c0_7 = arith.constant 0 : index
    %c0_8 = arith.constant 0 : index
    %8 = vector.load %arg6[%c0_7, %c0_8] : memref<16x128xf32, #tpu.memory_space<vmem>>, vector<16x128xf32>
    tpu.vector_store %arg6[%c0_7, %c0_8], %7 {strides = array<i32>} : memref<16x128xf32, #tpu.memory_space<vmem>>, vector<16x128xf32>,
    %c0_9 = arith.constant 0 : index
    %c0_10 = arith.constant 0 : index
    %c0_11 = arith.constant 0 : index
    %9 = vector.load %arg3[%c0_9, %c0_10, %c0_11] : memref<1x32x128xbf16, #tpu.memory_space<vmem>>, vector<1x32x128xbf16>
    %10 = vector.shape_cast %9 : vector<1x32x128xbf16> to vector<32x128xbf16>
    %c0_i32 = arith.constant 0 : i32
    %11 = arith.cmpi eq, %arg0, %c0_i32 : i32
    %12 = arith.extui %11 : i1 to i32
    %c0_i32_12 = arith.constant 0 : i32
    %13 = arith.cmpi ne, %12, %c0_i32_12 : i32
    scf.if %13 {
      %cst_14 = arith.constant 0.000000e+00 : f32
      %17 = vector.broadcast %cst_14 : f32 to vector<2x32xf32>
      %cst_15 = arith.constant 0.000000e+00 : f32
      %18 = vector.broadcast %cst_15 : f32 to vector<2x32xf32>
      %c0_16 = arith.constant 0 : index
      %c0_17 = arith.constant 0 : index
      %19 = vector.load %arg6[%c0_16, %c0_17] : memref<16x128xf32, #tpu.memory_space<vmem>>, vector<2x128xf32>
      %20 = arith.truncf %17 : vector<2x32xf32> to vector<2x32xbf16>
      %cst_18 = arith.constant dense<0.000000e+00> : vector<2x128xf32>
      %21 = tpu.matmul %20, %10, %cst_18 {dimension_numbers = #tpu.dot_dimension_numbers<[1], [0], [0], [1], [0, 0, 1, 1], [], []>} : vector<2x32xbf16>, vector<32x128xbf16>, vector<2x128xf32> -> vector<2x128xf32>
      %22 = arith.addf %19, %21 : vector<2x128xf32>
      %23 = vector.extract_strided_slice %22 {offsets = [0, 0], sizes = [2, 32], strides = [1, 1]} : vector<2x128xf32> to vector<2x32xf32>
      %24 = arith.negf %23 : vector<2x32xf32>
      %25 = math.exp %24 : vector<2x32xf32>
      %cst_19 = arith.constant 1.000000e+00 : f32
      %26 = vector.broadcast %cst_19 : f32 to vector<2x32xf32>
      %27 = arith.addf %26, %25 : vector<2x32xf32>
      %28 = arith.divf %26, %27 : vector<2x32xf32>
      %29 = vector.extract_strided_slice %22 {offsets = [0, 32], sizes = [2, 32], strides = [1, 1]} : vector<2x128xf32> to vector<2x32xf32>
      %30 = arith.negf %29 : vector<2x32xf32>
      %31 = math.exp %30 : vector<2x32xf32>
      %cst_20 = arith.constant 1.000000e+00 : f32
      %32 = vector.broadcast %cst_20 : f32 to vector<2x32xf32>
      %33 = arith.addf %32, %31 : vector<2x32xf32>
      %34 = arith.divf %32, %33 : vector<2x32xf32>
      %35 = vector.extract_strided_slice %22 {offsets = [0, 64], sizes = [2, 32], strides = [1, 1]} : vector<2x128xf32> to vector<2x32xf32>
      %36 = math.tanh %35 : vector<2x32xf32>
      %37 = vector.extract_strided_slice %22 {offsets = [0, 96], sizes = [2, 32], strides = [1, 1]} : vector<2x128xf32> to vector<2x32xf32>
      %38 = arith.negf %37 : vector<2x32xf32>
      %39 = math.exp %38 : vector<2x32xf32>
      %cst_21 = arith.constant 1.000000e+00 : f32
      %40 = vector.broadcast %cst_21 : f32 to vector<2x32xf32>
      %41 = arith.addf %40, %39 : vector<2x32xf32>
      %42 = arith.divf %40, %41 : vector<2x32xf32>
      %43 = arith.mulf %34, %18 : vector<2x32xf32>
      %44 = arith.mulf %28, %36 : vector<2x32xf32>
      %45 = arith.addf %43, %44 : vector<2x32xf32>
      %46 = math.tanh %45 : vector<2x32xf32>
      %47 = arith.mulf %42, %46 : vector<2x32xf32>
      %c2 = arith.constant 2 : index
      %c0_22 = arith.constant 0 : index
      %48 = vector.load %arg6[%c2, %c0_22] : memref<16x128xf32, #tpu.memory_space<vmem>>, vector<2x128xf32>
      %49 = arith.truncf %47 : vector<2x32xf32> to vector<2x32xbf16>
      %cst_23 = arith.constant dense<0.000000e+00> : vector<2x128xf32>
      %50 = tpu.matmul %49, %10, %cst_23 {dimension_numbers = #tpu.dot_dimension_numbers<[1], [0], [0], [1], [0, 0, 1, 1], [], []>} : vector<2x32xbf16>, vector<32x128xbf16>, vector<2x128xf32> -> vector<2x128xf32>
      %51 = arith.addf %48, %50 : vector<2x128xf32>
      %52 = vector.extract_strided_slice %51 {offsets = [0, 0], sizes = [2, 32], strides = [1, 1]} : vector<2x128xf32> to vector<2x32xf32>
      %53 = arith.negf %52 : vector<2x32xf32>
      %54 = math.exp %53 : vector<2x32xf32>
      %cst_24 = arith.constant 1.000000e+00 : f32
      %55 = vector.broadcast %cst_24 : f32 to vector<2x32xf32>
      %56 = arith.addf %55, %54 : vector<2x32xf32>
      %57 = arith.divf %55, %56 : vector<2x32xf32>
      %58 = vector.extract_strided_slice %51 {offsets = [0, 32], sizes = [2, 32], strides = [1, 1]} : vector<2x128xf32> to vector<2x32xf32>
      %59 = arith.negf %58 : vector<2x32xf32>
      %60 = math.exp %59 : vector<2x32xf32>
      %cst_25 = arith.constant 1.000000e+00 : f32
      %61 = vector.broadcast %cst_25 : f32 to vector<2x32xf32>
      %62 = arith.addf %61, %60 : vector<2x32xf32>
      %63 = arith.divf %61, %62 : vector<2x32xf32>
      %64 = vector.extract_strided_slice %51 {offsets = [0, 64], sizes = [2, 32], strides = [1, 1]} : vector<2x128xf32> to vector<2x32xf32>
      %65 = math.tanh %64 : vector<2x32xf32>
      %66 = vector.extract_strided_slice %51 {offsets = [0, 96], sizes = [2, 32], strides = [1, 1]} : vector<2x128xf32> to vector<2x32xf32>
      %67 = arith.negf %66 : vector<2x32xf32>
      %68 = math.exp %67 : vector<2x32xf32>
      %cst_26 = arith.constant 1.000000e+00 : f32
      %69 = vector.broadcast %cst_26 : f32 to vector<2x32xf32>
      %70 = arith.addf %69, %68 : vector<2x32xf32>
      %71 = arith.divf %69, %70 : vector<2x32xf32>
      %72 = arith.mulf %63, %45 : vector<2x32xf32>
      %73 = arith.mulf %57, %65 : vector<2x32xf32>
      %74 = arith.addf %72, %73 : vector<2x32xf32>
      %75 = math.tanh %74 : vector<2x32xf32>
      %76 = arith.mulf %71, %75 : vector<2x32xf32>
      %c4 = arith.constant 4 : index
      %c0_27 = arith.constant 0 : index
      %77 = vector.load %arg6[%c4, %c0_27] : memref<16x128xf32, #tpu.memory_space<vmem>>, vector<2x128xf32>
      %78 = arith.truncf %76 : vector<2x32xf32> to vector<2x32xbf16>
      %cst_28 = arith.constant dense<0.000000e+00> : vector<2x128xf32>
      %79 = tpu.matmul %78, %10, %cst_28 {dimension_numbers = #tpu.dot_dimension_numbers<[1], [0], [0], [1], [0, 0, 1, 1], [], []>} : vector<2x32xbf16>, vector<32x128xbf16>, vector<2x128xf32> -> vector<2x128xf32>
      %80 = arith.addf %77, %79 : vector<2x128xf32>
      %81 = vector.extract_strided_slice %80 {offsets = [0, 0], sizes = [2, 32], strides = [1, 1]} : vector<2x128xf32> to vector<2x32xf32>
      %82 = arith.negf %81 : vector<2x32xf32>
      %83 = math.exp %82 : vector<2x32xf32>
      %cst_29 = arith.constant 1.000000e+00 : f32
      %84 = vector.broadcast %cst_29 : f32 to vector<2x32xf32>
      %85 = arith.addf %84, %83 : vector<2x32xf32>
      %86 = arith.divf %84, %85 : vector<2x32xf32>
      %87 = vector.extract_strided_slice %80 {offsets = [0, 32], sizes = [2, 32], strides = [1, 1]} : vector<2x128xf32> to vector<2x32xf32>
      %88 = arith.negf %87 : vector<2x32xf32>
      %89 = math.exp %88 : vector<2x32xf32>
      %cst_30 = arith.constant 1.000000e+00 : f32
      %90 = vector.broadcast %cst_30 : f32 to vector<2x32xf32>
      %91 = arith.addf %90, %89 : vector<2x32xf32>
      %92 = arith.divf %90, %91 : vector<2x32xf32>
      %93 = vector.extract_strided_slice %80 {offsets = [0, 64], sizes = [2, 32], strides = [1, 1]} : vector<2x128xf32> to vector<2x32xf32>
      %94 = math.tanh %93 : vector<2x32xf32>
      %95 = vector.extract_strided_slice %80 {offsets = [0, 96], sizes = [2, 32], strides = [1, 1]} : vector<2x128xf32> to vector<2x32xf32>
      %96 = arith.negf %95 : vector<2x32xf32>
      %97 = math.exp %96 : vector<2x32xf32>
      %cst_31 = arith.constant 1.000000e+00 : f32
      %98 = vector.broadcast %cst_31 : f32 to vector<2x32xf32>
      %99 = arith.addf %98, %97 : vector<2x32xf32>
      %100 = arith.divf %98, %99 : vector<2x32xf32>
      %101 = arith.mulf %92, %74 : vector<2x32xf32>
      %102 = arith.mulf %86, %94 : vector<2x32xf32>
      %103 = arith.addf %101, %102 : vector<2x32xf32>
      %104 = math.tanh %103 : vector<2x32xf32>
      %105 = arith.mulf %100, %104 : vector<2x32xf32>
      %c6 = arith.constant 6 : index
      %c0_32 = arith.constant 0 : index
      %106 = vector.load %arg6[%c6, %c0_32] : memref<16x128xf32, #tpu.memory_space<vmem>>, vector<2x128xf32>
      %107 = arith.truncf %105 : vector<2x32xf32> to vector<2x32xbf16>
      %cst_33 = arith.constant dense<0.000000e+00> : vector<2x128xf32>
      %108 = tpu.matmul %107, %10, %cst_33 {dimension_numbers = #tpu.dot_dimension_numbers<[1], [0], [0], [1], [0, 0, 1, 1], [], []>} : vector<2x32xbf16>, vector<32x128xbf16>, vector<2x128xf32> -> vector<2x128xf32>
      %109 = arith.addf %106, %108 : vector<2x128xf32>
      %110 = vector.extract_strided_slice %109 {offsets = [0, 0], sizes = [2, 32], strides = [1, 1]} : vector<2x128xf32> to vector<2x32xf32>
      %111 = arith.negf %110 : vector<2x32xf32>
      %112 = math.exp %111 : vector<2x32xf32>
      %cst_34 = arith.constant 1.000000e+00 : f32
      %113 = vector.broadcast %cst_34 : f32 to vector<2x32xf32>
      %114 = arith.addf %113, %112 : vector<2x32xf32>
      %115 = arith.divf %113, %114 : vector<2x32xf32>
      %116 = vector.extract_strided_slice %109 {offsets = [0, 32], sizes = [2, 32], strides = [1, 1]} : vector<2x128xf32> to vector<2x32xf32>
      %117 = arith.negf %116 : vector<2x32xf32>
      %118 = math.exp %117 : vector<2x32xf32>
      %cst_35 = arith.constant 1.000000e+00 : f32
      %119 = vector.broadcast %cst_35 : f32 to vector<2x32xf32>
      %120 = arith.addf %119, %118 : vector<2x32xf32>
      %121 = arith.divf %119, %120 : vector<2x32xf32>
      %122 = vector.extract_strided_slice %109 {offsets = [0, 64], sizes = [2, 32], strides = [1, 1]} : vector<2x128xf32> to vector<2x32xf32>
      %123 = math.tanh %122 : vector<2x32xf32>
      %124 = vector.extract_strided_slice %109 {offsets = [0, 96], sizes = [2, 32], strides = [1, 1]} : vector<2x128xf32> to vector<2x32xf32>
      %125 = arith.negf %124 : vector<2x32xf32>
      %126 = math.exp %125 : vector<2x32xf32>
      %cst_36 = arith.constant 1.000000e+00 : f32
      %127 = vector.broadcast %cst_36 : f32 to vector<2x32xf32>
      %128 = arith.addf %127, %126 : vector<2x32xf32>
      %129 = arith.divf %127, %128 : vector<2x32xf32>
      %130 = arith.mulf %121, %103 : vector<2x32xf32>
      %131 = arith.mulf %115, %123 : vector<2x32xf32>
      %132 = arith.addf %130, %131 : vector<2x32xf32>
      %133 = math.tanh %132 : vector<2x32xf32>
      %134 = arith.mulf %129, %133 : vector<2x32xf32>
      %c8 = arith.constant 8 : index
      %c0_37 = arith.constant 0 : index
      %135 = vector.load %arg6[%c8, %c0_37] : memref<16x128xf32, #tpu.memory_space<vmem>>, vector<2x128xf32>
      %136 = arith.truncf %134 : vector<2x32xf32> to vector<2x32xbf16>
      %cst_38 = arith.constant dense<0.000000e+00> : vector<2x128xf32>
      %137 = tpu.matmul %136, %10, %cst_38 {dimension_numbers = #tpu.dot_dimension_numbers<[1], [0], [0], [1], [0, 0, 1, 1], [], []>} : vector<2x32xbf16>, vector<32x128xbf16>, vector<2x128xf32> -> vector<2x128xf32>
      %138 = arith.addf %135, %137 : vector<2x128xf32>
      %139 = vector.extract_strided_slice %138 {offsets = [0, 0], sizes = [2, 32], strides = [1, 1]} : vector<2x128xf32> to vector<2x32xf32>
      %140 = arith.negf %139 : vector<2x32xf32>
      %141 = math.exp %140 : vector<2x32xf32>
      %cst_39 = arith.constant 1.000000e+00 : f32
      %142 = vector.broadcast %cst_39 : f32 to vector<2x32xf32>
      %143 = arith.addf %142, %141 : vector<2x32xf32>
      %144 = arith.divf %142, %143 : vector<2x32xf32>
      %145 = vector.extract_strided_slice %138 {offsets = [0, 32], sizes = [2, 32], strides = [1, 1]} : vector<2x128xf32> to vector<2x32xf32>
      %146 = arith.negf %145 : vector<2x32xf32>
      %147 = math.exp %146 : vector<2x32xf32>
      %cst_40 = arith.constant 1.000000e+00 : f32
      %148 = vector.broadcast %cst_40 : f32 to vector<2x32xf32>
      %149 = arith.addf %148, %147 : vector<2x32xf32>
      %150 = arith.divf %148, %149 : vector<2x32xf32>
      %151 = vector.extract_strided_slice %138 {offsets = [0, 64], sizes = [2, 32], strides = [1, 1]} : vector<2x128xf32> to vector<2x32xf32>
      %152 = math.tanh %151 : vector<2x32xf32>
      %153 = vector.extract_strided_slice %138 {offsets = [0, 96], sizes = [2, 32], strides = [1, 1]} : vector<2x128xf32> to vector<2x32xf32>
      %154 = arith.negf %153 : vector<2x32xf32>
      %155 = math.exp %154 : vector<2x32xf32>
      %cst_41 = arith.constant 1.000000e+00 : f32
      %156 = vector.broadcast %cst_41 : f32 to vector<2x32xf32>
      %157 = arith.addf %156, %155 : vector<2x32xf32>
      %158 = arith.divf %156, %157 : vector<2x32xf32>
      %159 = arith.mulf %150, %132 : vector<2x32xf32>
      %160 = arith.mulf %144, %152 : vector<2x32xf32>
      %161 = arith.addf %159, %160 : vector<2x32xf32>
      %162 = math.tanh %161 : vector<2x32xf32>
      %163 = arith.mulf %158, %162 : vector<2x32xf32>
      %c10 = arith.constant 10 : index
      %c0_42 = arith.constant 0 : index
      %164 = vector.load %arg6[%c10, %c0_42] : memref<16x128xf32, #tpu.memory_space<vmem>>, vector<2x128xf32>
      %165 = arith.truncf %163 : vector<2x32xf32> to vector<2x32xbf16>
      %cst_43 = arith.constant dense<0.000000e+00> : vector<2x128xf32>
      %166 = tpu.matmul %165, %10, %cst_43 {dimension_numbers = #tpu.dot_dimension_numbers<[1], [0], [0], [1], [0, 0, 1, 1], [], []>} : vector<2x32xbf16>, vector<32x128xbf16>, vector<2x128xf32> -> vector<2x128xf32>
      %167 = arith.addf %164, %166 : vector<2x128xf32>
      %168 = vector.extract_strided_slice %167 {offsets = [0, 0], sizes = [2, 32], strides = [1, 1]} : vector<2x128xf32> to vector<2x32xf32>
      %169 = arith.negf %168 : vector<2x32xf32>
      %170 = math.exp %169 : vector<2x32xf32>
      %cst_44 = arith.constant 1.000000e+00 : f32
      %171 = vector.broadcast %cst_44 : f32 to vector<2x32xf32>
      %172 = arith.addf %171, %170 : vector<2x32xf32>
      %173 = arith.divf %171, %172 : vector<2x32xf32>
      %174 = vector.extract_strided_slice %167 {offsets = [0, 32], sizes = [2, 32], strides = [1, 1]} : vector<2x128xf32> to vector<2x32xf32>
      %175 = arith.negf %174 : vector<2x32xf32>
      %176 = math.exp %175 : vector<2x32xf32>
      %cst_45 = arith.constant 1.000000e+00 : f32
      %177 = vector.broadcast %cst_45 : f32 to vector<2x32xf32>
      %178 = arith.addf %177, %176 : vector<2x32xf32>
      %179 = arith.divf %177, %178 : vector<2x32xf32>
      %180 = vector.extract_strided_slice %167 {offsets = [0, 64], sizes = [2, 32], strides = [1, 1]} : vector<2x128xf32> to vector<2x32xf32>
      %181 = math.tanh %180 : vector<2x32xf32>
      %182 = vector.extract_strided_slice %167 {offsets = [0, 96], sizes = [2, 32], strides = [1, 1]} : vector<2x128xf32> to vector<2x32xf32>
      %183 = arith.negf %182 : vector<2x32xf32>
      %184 = math.exp %183 : vector<2x32xf32>
      %cst_46 = arith.constant 1.000000e+00 : f32
      %185 = vector.broadcast %cst_46 : f32 to vector<2x32xf32>
      %186 = arith.addf %185, %184 : vector<2x32xf32>
      %187 = arith.divf %185, %186 : vector<2x32xf32>
      %188 = arith.mulf %179, %161 : vector<2x32xf32>
      %189 = arith.mulf %173, %181 : vector<2x32xf32>
      %190 = arith.addf %188, %189 : vector<2x32xf32>
      %191 = math.tanh %190 : vector<2x32xf32>
      %192 = arith.mulf %187, %191 : vector<2x32xf32>
      %c12 = arith.constant 12 : index
      %c0_47 = arith.constant 0 : index
      %193 = vector.load %arg6[%c12, %c0_47] : memref<16x128xf32, #tpu.memory_space<vmem>>, vector<2x128xf32>
      %194 = arith.truncf %192 : vector<2x32xf32> to vector<2x32xbf16>
      %cst_48 = arith.constant dense<0.000000e+00> : vector<2x128xf32>
      %195 = tpu.matmul %194, %10, %cst_48 {dimension_numbers = #tpu.dot_dimension_numbers<[1], [0], [0], [1], [0, 0, 1, 1], [], []>} : vector<2x32xbf16>, vector<32x128xbf16>, vector<2x128xf32> -> vector<2x128xf32>
      %196 = arith.addf %193, %195 : vector<2x128xf32>
      %197 = vector.extract_strided_slice %196 {offsets = [0, 0], sizes = [2, 32], strides = [1, 1]} : vector<2x128xf32> to vector<2x32xf32>
      %198 = arith.negf %197 : vector<2x32xf32>
      %199 = math.exp %198 : vector<2x32xf32>
      %cst_49 = arith.constant 1.000000e+00 : f32
      %200 = vector.broadcast %cst_49 : f32 to vector<2x32xf32>
      %201 = arith.addf %200, %199 : vector<2x32xf32>
      %202 = arith.divf %200, %201 : vector<2x32xf32>
      %203 = vector.extract_strided_slice %196 {offsets = [0, 32], sizes = [2, 32], strides = [1, 1]} : vector<2x128xf32> to vector<2x32xf32>
      %204 = arith.negf %203 : vector<2x32xf32>
      %205 = math.exp %204 : vector<2x32xf32>
      %cst_50 = arith.constant 1.000000e+00 : f32
      %206 = vector.broadcast %cst_50 : f32 to vector<2x32xf32>
      %207 = arith.addf %206, %205 : vector<2x32xf32>
      %208 = arith.divf %206, %207 : vector<2x32xf32>
      %209 = vector.extract_strided_slice %196 {offsets = [0, 64], sizes = [2, 32], strides = [1, 1]} : vector<2x128xf32> to vector<2x32xf32>
      %210 = math.tanh %209 : vector<2x32xf32>
      %211 = vector.extract_strided_slice %196 {offsets = [0, 96], sizes = [2, 32], strides = [1, 1]} : vector<2x128xf32> to vector<2x32xf32>
      %212 = arith.negf %211 : vector<2x32xf32>
      %213 = math.exp %212 : vector<2x32xf32>
      %cst_51 = arith.constant 1.000000e+00 : f32
      %214 = vector.broadcast %cst_51 : f32 to vector<2x32xf32>
      %215 = arith.addf %214, %213 : vector<2x32xf32>
      %216 = arith.divf %214, %215 : vector<2x32xf32>
      %217 = arith.mulf %208, %190 : vector<2x32xf32>
      %218 = arith.mulf %202, %210 : vector<2x32xf32>
      %219 = arith.addf %217, %218 : vector<2x32xf32>
      %220 = math.tanh %219 : vector<2x32xf32>
      %221 = arith.mulf %216, %220 : vector<2x32xf32>
      %c14 = arith.constant 14 : index
      %c0_52 = arith.constant 0 : index
      %222 = vector.load %arg6[%c14, %c0_52] : memref<16x128xf32, #tpu.memory_space<vmem>>, vector<2x128xf32>
      %223 = arith.truncf %221 : vector<2x32xf32> to vector<2x32xbf16>
      %cst_53 = arith.constant dense<0.000000e+00> : vector<2x128xf32>
      %224 = tpu.matmul %223, %10, %cst_53 {dimension_numbers = #tpu.dot_dimension_numbers<[1], [0], [0], [1], [0, 0, 1, 1], [], []>} : vector<2x32xbf16>, vector<32x128xbf16>, vector<2x128xf32> -> vector<2x128xf32>
      %225 = arith.addf %222, %224 : vector<2x128xf32>
      %226 = vector.extract_strided_slice %225 {offsets = [0, 0], sizes = [2, 32], strides = [1, 1]} : vector<2x128xf32> to vector<2x32xf32>
      %227 = arith.negf %226 : vector<2x32xf32>
      %228 = math.exp %227 : vector<2x32xf32>
      %cst_54 = arith.constant 1.000000e+00 : f32
      %229 = vector.broadcast %cst_54 : f32 to vector<2x32xf32>
      %230 = arith.addf %229, %228 : vector<2x32xf32>
      %231 = arith.divf %229, %230 : vector<2x32xf32>
      %232 = vector.extract_strided_slice %225 {offsets = [0, 32], sizes = [2, 32], strides = [1, 1]} : vector<2x128xf32> to vector<2x32xf32>
      %233 = arith.negf %232 : vector<2x32xf32>
      %234 = math.exp %233 : vector<2x32xf32>
      %cst_55 = arith.constant 1.000000e+00 : f32
      %235 = vector.broadcast %cst_55 : f32 to vector<2x32xf32>
      %236 = arith.addf %235, %234 : vector<2x32xf32>
      %237 = arith.divf %235, %236 : vector<2x32xf32>
      %238 = vector.extract_strided_slice %225 {offsets = [0, 64], sizes = [2, 32], strides = [1, 1]} : vector<2x128xf32> to vector<2x32xf32>
      %239 = math.tanh %238 : vector<2x32xf32>
      %240 = vector.extract_strided_slice %225 {offsets = [0, 96], sizes = [2, 32], strides = [1, 1]} : vector<2x128xf32> to vector<2x32xf32>
      %241 = arith.negf %240 : vector<2x32xf32>
      %242 = math.exp %241 : vector<2x32xf32>
      %cst_56 = arith.constant 1.000000e+00 : f32
      %243 = vector.broadcast %cst_56 : f32 to vector<2x32xf32>
      %244 = arith.addf %243, %242 : vector<2x32xf32>
      %245 = arith.divf %243, %244 : vector<2x32xf32>
      %246 = arith.mulf %237, %219 : vector<2x32xf32>
      %247 = arith.mulf %231, %239 : vector<2x32xf32>
      %248 = arith.addf %246, %247 : vector<2x32xf32>
      %249 = math.tanh %248 : vector<2x32xf32>
      %250 = arith.mulf %245, %249 : vector<2x32xf32>
      %c0_57 = arith.constant 0 : index
      %c0_58 = arith.constant 0 : index
      %c0_59 = arith.constant 0 : index
      %251 = vector.load %arg5[%c0_57, %c0_58, %c0_59] : memref<1x2x32xf32, #tpu.memory_space<vmem>>, vector<1x2x32xf32>
      %252 = vector.shape_cast %251 : vector<1x2x32xf32> to vector<2x32xf32>
      %253 = vector.shape_cast %250 : vector<2x32xf32> to vector<1x2x32xf32>
      tpu.vector_store %arg5[%c0_57, %c0_58, %c0_59], %253 {strides = array<i32>} : memref<1x2x32xf32, #tpu.memory_space<vmem>>, vector<1x2x32xf32>,
    } else {
    }
    %c1_i32 = arith.constant 1 : i32
    %14 = arith.cmpi eq, %arg0, %c1_i32 : i32
    %15 = arith.extui %14 : i1 to i32
    %c0_i32_13 = arith.constant 0 : i32
    %16 = arith.cmpi ne, %15, %c0_i32_13 : i32
    scf.if %16 {
      %cst_14 = arith.constant 0.000000e+00 : f32
      %17 = vector.broadcast %cst_14 : f32 to vector<2x32xf32>
      %cst_15 = arith.constant 0.000000e+00 : f32
      %18 = vector.broadcast %cst_15 : f32 to vector<2x32xf32>
      %c14 = arith.constant 14 : index
      %c0_16 = arith.constant 0 : index
      %19 = vector.load %arg6[%c14, %c0_16] : memref<16x128xf32, #tpu.memory_space<vmem>>, vector<2x128xf32>
      %20 = arith.truncf %17 : vector<2x32xf32> to vector<2x32xbf16>
      %cst_17 = arith.constant dense<0.000000e+00> : vector<2x128xf32>
      %21 = tpu.matmul %20, %10, %cst_17 {dimension_numbers = #tpu.dot_dimension_numbers<[1], [0], [0], [1], [0, 0, 1, 1], [], []>} : vector<2x32xbf16>, vector<32x128xbf16>, vector<2x128xf32> -> vector<2x128xf32>
      %22 = arith.addf %19, %21 : vector<2x128xf32>
      %23 = vector.extract_strided_slice %22 {offsets = [0, 0], sizes = [2, 32], strides = [1, 1]} : vector<2x128xf32> to vector<2x32xf32>
      %24 = arith.negf %23 : vector<2x32xf32>
      %25 = math.exp %24 : vector<2x32xf32>
      %cst_18 = arith.constant 1.000000e+00 : f32
      %26 = vector.broadcast %cst_18 : f32 to vector<2x32xf32>
      %27 = arith.addf %26, %25 : vector<2x32xf32>
      %28 = arith.divf %26, %27 : vector<2x32xf32>
      %29 = vector.extract_strided_slice %22 {offsets = [0, 32], sizes = [2, 32], strides = [1, 1]} : vector<2x128xf32> to vector<2x32xf32>
      %30 = arith.negf %29 : vector<2x32xf32>
      %31 = math.exp %30 : vector<2x32xf32>
      %cst_19 = arith.constant 1.000000e+00 : f32
      %32 = vector.broadcast %cst_19 : f32 to vector<2x32xf32>
      %33 = arith.addf %32, %31 : vector<2x32xf32>
      %34 = arith.divf %32, %33 : vector<2x32xf32>
      %35 = vector.extract_strided_slice %22 {offsets = [0, 64], sizes = [2, 32], strides = [1, 1]} : vector<2x128xf32> to vector<2x32xf32>
      %36 = math.tanh %35 : vector<2x32xf32>
      %37 = vector.extract_strided_slice %22 {offsets = [0, 96], sizes = [2, 32], strides = [1, 1]} : vector<2x128xf32> to vector<2x32xf32>
      %38 = arith.negf %37 : vector<2x32xf32>
      %39 = math.exp %38 : vector<2x32xf32>
      %cst_20 = arith.constant 1.000000e+00 : f32
      %40 = vector.broadcast %cst_20 : f32 to vector<2x32xf32>
      %41 = arith.addf %40, %39 : vector<2x32xf32>
      %42 = arith.divf %40, %41 : vector<2x32xf32>
      %43 = arith.mulf %34, %18 : vector<2x32xf32>
      %44 = arith.mulf %28, %36 : vector<2x32xf32>
      %45 = arith.addf %43, %44 : vector<2x32xf32>
      %46 = math.tanh %45 : vector<2x32xf32>
      %47 = arith.mulf %42, %46 : vector<2x32xf32>
      %c0_21 = arith.constant 0 : index
      %c0_22 = arith.constant 0 : index
      %c0_23 = arith.constant 0 : index
      %48 = vector.load %arg5[%c0_21, %c0_22, %c0_23] : memref<1x2x32xf32, #tpu.memory_space<vmem>>, vector<1x2x32xf32>
      %49 = vector.shape_cast %48 : vector<1x2x32xf32> to vector<2x32xf32>
      %50 = vector.shape_cast %47 : vector<2x32xf32> to vector<1x2x32xf32>
      tpu.vector_store %arg5[%c0_21, %c0_22, %c0_23], %50 {strides = array<i32>} : memref<1x2x32xf32, #tpu.memory_space<vmem>>, vector<1x2x32xf32>,
    } else {
    }
    return
  }
  func.func @transform_0(%arg0: i32) -> (i32, i32) {
    %c0_i32 = arith.constant 0 : i32
    %c0_i32_0 = arith.constant 0 : i32
    %c0_i32_1 = arith.constant 0 : i32
    return %c0_i32, %c0_i32_0 : i32, i32
  }
  func.func @transform_1(%arg0: i32) -> (i32, i32, i32) {
    %c0_i32 = arith.constant 0 : i32
    %c0_i32_0 = arith.constant 0 : i32
    %c0_i32_1 = arith.constant 0 : i32
    return %arg0, %c0_i32, %c0_i32_0 : i32, i32, i32
  }
  func.func @transform_2(%arg0: i32) -> (i32, i32, i32) {
    %c0_i32 = arith.constant 0 : i32
    %c0_i32_0 = arith.constant 0 : i32
    %c0_i32_1 = arith.constant 0 : i32
    return %arg0, %c0_i32, %c0_i32_0 : i32, i32, i32
  }
  func.func @transform_3(%arg0: i32) -> (i32, i32, i32) {
    %c0_i32 = arith.constant 0 : i32
    %c0_i32_0 = arith.constant 0 : i32
    %c0_i32_1 = arith.constant 0 : i32
    return %arg0, %c0_i32, %c0_i32_0 : i32, i32, i32
  }
  func.func @transform_4(%arg0: i32) -> (i32, i32, i32) {
    %c0_i32 = arith.constant 0 : i32
    %c0_i32_0 = arith.constant 0 : i32
    %c0_i32_1 = arith.constant 0 : i32
    return %arg0, %c0_i32, %c0_i32_0 : i32, i32, i32
  }
}

module attributes {stable_mosaic.version = 11 : i64} {
  func.func @kernel(%arg0: memref<2x2x32xf32, #tpu.memory_space<vmem>>, %arg1: memref<64x64xbf16, #tpu.memory_space<vmem>>, %arg2: memref<1x64xf32, #tpu.memory_space<vmem>>, %arg3: memref<64x8xbf16, #tpu.memory_space<vmem>>, %arg4: memref<1x8xf32, #tpu.memory_space<vmem>>, %arg5: memref<2x64xf32, #tpu.memory_space<vmem>>, %arg6: memref<2x8xf32, #tpu.memory_space<vmem>>) attributes {dimension_semantics = [], scalar_prefetch = 0 : i64, scratch_operands = 0 : i64, tpu.core_type = #tpu.core_type<tc>} {
    %c0 = arith.constant 0 : index
    %c0_0 = arith.constant 0 : index
    %c0_1 = arith.constant 0 : index
    %0 = vector.load %arg0[%c0, %c0_0, %c0_1] : memref<2x2x32xf32, #tpu.memory_space<vmem>>, vector<1x2x32xf32>
    %1 = vector.shape_cast %0 : vector<1x2x32xf32> to vector<2x32xf32>
    %c1 = arith.constant 1 : index
    %c0_2 = arith.constant 0 : index
    %c0_3 = arith.constant 0 : index
    %2 = vector.load %arg0[%c1, %c0_2, %c0_3] : memref<2x2x32xf32, #tpu.memory_space<vmem>>, vector<1x2x32xf32>
    %3 = vector.shape_cast %2 : vector<1x2x32xf32> to vector<2x32xf32>
    %4 = tpu.concatenate %1, %3 in 1 : vector<2x32xf32>, vector<2x32xf32> -> vector<2x64xf32>
    %5 = arith.truncf %4 : vector<2x64xf32> to vector<2x64xbf16>
    %c0_4 = arith.constant 0 : index
    %c0_5 = arith.constant 0 : index
    %6 = vector.load %arg1[%c0_4, %c0_5] : memref<64x64xbf16, #tpu.memory_space<vmem>>, vector<64x64xbf16>
    %cst = arith.constant dense<0.000000e+00> : vector<2x64xf32>
    %7 = tpu.matmul %5, %6, %cst {dimension_numbers = #tpu.dot_dimension_numbers<[1], [0], [0], [1], [0, 0, 1, 1], [], []>} : vector<2x64xbf16>, vector<64x64xbf16>, vector<2x64xf32> -> vector<2x64xf32>
    %c0_6 = arith.constant 0 : index
    %c0_7 = arith.constant 0 : index
    %8 = vector.load %arg2[%c0_6, %c0_7] : memref<1x64xf32, #tpu.memory_space<vmem>>, vector<1x64xf32>
    %9 = vector.broadcast %8 : vector<1x64xf32> to vector<2x64xf32>
    %10 = arith.addf %7, %9 : vector<2x64xf32>
    %11 = arith.negf %10 : vector<2x64xf32>
    %12 = math.exp %11 : vector<2x64xf32>
    %cst_8 = arith.constant 1.000000e+00 : f32
    %13 = vector.broadcast %cst_8 : f32 to vector<2x64xf32>
    %14 = arith.addf %13, %12 : vector<2x64xf32>
    %15 = arith.divf %13, %14 : vector<2x64xf32>
    %16 = arith.truncf %15 : vector<2x64xf32> to vector<2x64xbf16>
    %c0_9 = arith.constant 0 : index
    %c0_10 = arith.constant 0 : index
    %17 = vector.load %arg3[%c0_9, %c0_10] : memref<64x8xbf16, #tpu.memory_space<vmem>>, vector<64x8xbf16>
    %cst_11 = arith.constant dense<0.000000e+00> : vector<2x8xf32>
    %18 = tpu.matmul %16, %17, %cst_11 {dimension_numbers = #tpu.dot_dimension_numbers<[1], [0], [0], [1], [0, 0, 1, 1], [], []>} : vector<2x64xbf16>, vector<64x8xbf16>, vector<2x8xf32> -> vector<2x8xf32>
    %c0_12 = arith.constant 0 : index
    %c0_13 = arith.constant 0 : index
    %19 = vector.load %arg4[%c0_12, %c0_13] : memref<1x8xf32, #tpu.memory_space<vmem>>, vector<1x8xf32>
    %20 = vector.broadcast %19 : vector<1x8xf32> to vector<2x8xf32>
    %21 = arith.addf %18, %20 : vector<2x8xf32>
    %cst_14 = arith.constant dense<0xFF800000> : vector<2xf32>
    %22 = vector.multi_reduction <maximumf>, %21, %cst_14 [1] : vector<2x8xf32> to vector<2xf32>
    %23 = vector.shape_cast %22 : vector<2xf32> to vector<2x1xf32>
    %24 = vector.broadcast %23 : vector<2x1xf32> to vector<2x8xf32>
    %25 = arith.subf %21, %24 : vector<2x8xf32>
    %26 = math.exp %25 : vector<2x8xf32>
    %cst_15 = arith.constant dense<0.000000e+00> : vector<2xf32>
    %27 = vector.multi_reduction <add>, %26, %cst_15 [1] : vector<2x8xf32> to vector<2xf32>
    %28 = vector.shape_cast %27 : vector<2xf32> to vector<2x1xf32>
    %29 = tpu.reciprocal %28 {approx = true} : vector<2x1xf32> -> vector<2x1xf32>
    %30 = vector.broadcast %29 : vector<2x1xf32> to vector<2x8xf32>
    %31 = arith.mulf %26, %30 : vector<2x8xf32>
    %c0_16 = arith.constant 0 : index
    %c0_17 = arith.constant 0 : index
    %32 = vector.load %arg5[%c0_16, %c0_17] : memref<2x64xf32, #tpu.memory_space<vmem>>, vector<2x64xf32>
    tpu.vector_store %arg5[%c0_16, %c0_17], %15 {strides = array<i32>} : memref<2x64xf32, #tpu.memory_space<vmem>>, vector<2x64xf32>,
    %c0_18 = arith.constant 0 : index
    %c0_19 = arith.constant 0 : index
    %33 = vector.load %arg6[%c0_18, %c0_19] : memref<2x8xf32, #tpu.memory_space<vmem>>, vector<2x8xf32>
    tpu.vector_store %arg6[%c0_18, %c0_19], %31 {strides = array<i32>} : memref<2x8xf32, #tpu.memory_space<vmem>>, vector<2x8xf32>,
    return
  }
}

</mosaic_0001>

<bundles_post_ra>
// kernel: lstm_classifier_forward.5
= control target key start
LH: loop header
LB: loop body
LE: loop exit
PB: predicated region body
PF: predicated region fallthrough
CT: control target
= control target key end

     0   :  { %12 = vsyncpa [#allocation3], 0  ;;  %s367_s23 = smov 32   ;;  %v368_v1 = vmov 0.0   ;;  %vm369_vm0 = vmmov 0   ;;  %s472_s0 = inlined_call_operand.vmem [shape: f32[2,2,32], index: 0, kind: input, shape index: {}]   ;;  %s473_s1 = inlined_call_operand.vmem [shape: bf16[64,64], index: 1, kind: input, shape index: {}]   ;;  %s474_s2 = inlined_call_operand.vmem [shape: f32[1,64], index: 2, kind: input, shape index: {}]   ;;  %s475_s3 = inlined_call_operand.vmem [shape: bf16[64,8], index: 3, kind: input, shape index: {}]   ;;  %s476_s4 = inlined_call_operand.vmem [shape: f32[1,8], index: 4, kind: input, shape index: {}]   ;;  %s477_s5 = inlined_call_operand.hbm [shape: f32[2,64], index: 5, kind: output, shape index: {0}]   ;;  %s478_s6 = inlined_call_operand.hbm [shape: f32[2,8], index: 6, kind: output, shape index: {1}]  }
   0x1   :  { %v250_v0 = vld [vmem:[%s472_s0 + $0x2] sm:$0x3]  ;;  %274 = vmatprep.subr.bf16.mxu0 %v368_v1  ;;  %286 = vmatprep.subr.bf16.mxu1 %v368_v1  ;;  %v304_v3 = vld [vmem:[%s473_s1 + $0x8] sm:$0xff]   ;;  %v305_v4 = vld [vmem:[%s473_s1 + $0x10] sm:$0xff]  }
   0x2   :  { %29 = vrot.lane.b32.xlu0 %v250_v0, %s367_s23  ;;  %v303_v2 = vld [vmem:[%s473_s1] sm:$0xff]   ;;  %282 = vmatprep.mubr.msk.bf16.mxu0 %vm369_vm0, %v368_v1 }
   0x3   :  { %275 = vmatpush3.bf16.msra.mxu0 %v303_v2  ;;  %294 = vmatprep.mubr.msk.bf16.mxu1 %vm369_vm0, %v368_v1 }
   0x4   :  { %276 = vmatprep.subr.bf16.mxu0 %v368_v1 }
   0x7   :  { %277 = vmatpush3.bf16.msra.mxu0 %v304_v3 }
   0x8   :  { %278 = vmatprep.subr.bf16.mxu0 %v368_v1 }
   0x9   :  { %13 = vsyncpa [#allocation5], 0  ;;  %v306_v5 = vld [vmem:[%s473_s1 + $0x18] sm:$0xff]   ;;  %vm32_vm1 = vcmask 261120   ;;  %v25_v6 = vld [vmem:[%s472_s0] sm:$0x3] }
   0xa   :  { %vm74_vm2 = vcmask 523264   ;;  %v307_v10 = vld [vmem:[%s475_s3] sm:$0xff]   ;;  %v308_v11 = vld [vmem:[%s475_s3 + $0x8] sm:$0xff]   ;;  %v309_v12 = vld [vmem:[%s475_s3 + $0x10] sm:$0xff]   ;;  %vm219_vm3 = vcmask 517120   ;;  %vm207_vm4 = vcmask 58368  }
   0xb   :  { %279 = vmatpush3.bf16.msra.mxu0 %v305_v4  ;;  %287 = vmatpush3.bf16.msra.mxu1 %v307_v10  ;;  %v310_v13 = vld [vmem:[%s475_s3 + $0x18] sm:$0xff]   ;;  %v251_v14 = vld [vmem:[%s474_s2] ss:$0 sm:$0xff]  ;;  %s370_s2 = smov [#allocation2]  }
   0xc   :  { %280 = vmatprep.subr.bf16.mxu0 %v368_v1  ;;  %288 = vmatprep.subr.bf16.mxu1 %v368_v1  ;;  %v258_v25 = vld [vmem:[%s476_s4] ss:$0 sm:$0xff]  ;;  %s228_s19 = sshll.u32 %s370_s2, 4  ;;  %s229_s19 = int_to_ptr.vmem [resolvable:$true] %s228_s19 }
   0xd   :  { %s319_s4 = scalar_lea.vmem %s229_s19, 32  ;;  %p324_p1 = scmp.lt.s32.totalorder %s229_s19, %s229_s19 }
   0xe   :  { %p320_p0 = scmp.ne.s32.totalorder %s229_s19, %s319_s4  ;;  %p325_p2 = scmp.lt.s32.totalorder %s319_s4, %s319_s4 }
   0xf   :  { %281 = vmatpush3.bf16.msra.mxu0 %v306_v5  ;;  %289 = vmatpush3.bf16.msra.mxu1 %v308_v11 }
  0x10   :  { %290 = vmatprep.subr.bf16.mxu1 %v368_v1  ;;  %p326_p3 = por %p325_p2, %p324_p1 }
  0x12   :  { %p327_p4 = pnand %p326_p3, %p320_p0 }
  0x13   :  { %291 = vmatpush3.bf16.msra.mxu1 %v309_v12 }
  0x14   :  { %292 = vmatprep.subr.bf16.mxu1 %v368_v1 }
  0x17   :  { %293 = vmatpush3.bf16.msra.mxu1 %v310_v13 }
  0x74   :  { %v30_v7 = vpop.permute.xlu0 %29 }
  0x75   :  { %v33_v8 = vsel %vm32_vm1, %v25_v6, %v30_v7 }
  0x76   :  { %v34_v9 = vpack.c.bf16 %v33_v8, %v33_v8 }
  0x78   :  { %283 = vmatmul.mubr.msk.bf16.vlgmr.msra.gmra.mrb[0].mxu0 %vm74_vm2, %v34_v9 }
 0x14b   :  { %v112_v15 = vpop.f32.mrb[0].mxu0 }
 0x14c   :  { %v113_v16 = vadd.f32 %v251_v14, %v112_v15  ;;  %v284_v17 = vpop.f32.mrb[1].mxu0 }
 0x14d   :  { %v115_v18 = vpop.f32.mrb[2].mxu0 }
 0x14e   :  { %v257_v19 = vmul.f32 -1.442695, %v113_v16  ;;  %v285_v20 = vpop.f32.mrb[3].mxu0 }
 0x150   :  { %311 = vpow2.f32 %v257_v19 }
 0x15a   :  { %v312_v21 = vpop.eup %311 }
 0x15b   :  { %v121_v22 = vadd.f32 1.0, %v312_v21 }
 0x15d   :  { %313 = vrcp.f32 %v121_v22 }
 0x167   :  { %v314_v23 = vpop.eup %313 }
 0x168   :  { %v124_v24 = vpack.c.bf16 %v314_v23, %v314_v23  ;;  %220 = vst.msk [vmem:[#allocation2] sm:$0x3] %vm219_vm3, %v314_v23 }
 0x16a   :  { %295 = vmatmul.mubr.msk.bf16.vlgmr.msra.gmra.mrb[0].mxu1 %vm74_vm2, %v124_v24 }
 0x23d   :  { %v201_v26 = vpop.f32.mrb[0].mxu1 }
 0x23e   :  { %v202_v27 = vadd.f32 %v258_v25, %v201_v26  ;;  %v296_v28 = vpop.f32.mrb[1].mxu1 }
 0x23f   :  { %v204_v29 = vpop.f32.mrb[2].mxu1 }
 0x240   :  { %v297_v30 = vpop.f32.mrb[3].mxu1  ;;  %v208_v31 = vsel %vm207_vm4, %v202_v27, -inf }
 0x241   :  { %209 = vmax.xlane.f32.xlu0 %v208_v31 }
 0x2ce   :  { %v210_v32 = vpop.xlane.xlu0 %209 }
 0x2cf   :  { %v211_v33 = vsub.f32 %v202_v27, %v210_v32 }
 0x2d1   :  { %v212_v34 = vmul.f32 1.442695, %v211_v33 }
 0x2d3   :  { %315 = vpow2.f32 %v212_v34 }
 0x2dd   :  { %v316_v35 = vpop.eup %315 }
 0x2de   :  { %v214_v36 = vsel %vm207_vm4, %v316_v35, 0.0 }
 0x2df   :  { %215 = vadd.xlane.f32.xlu1 %v214_v36 }
 0x2e0   :  { %330 = shalt.err (!%p327_p4)
}
 0x2e1   :  { %s331_s22 = scalar_lea.hbm %s477_s5, 32 }
 0x2e2   :  { %p332_p5 = scmp.ne.s32.totalorder %s477_s5, %s331_s22  ;;  %p335_p6 = scmp.lt.u32.totalorder %s331_s22, %s477_s5 }
 0x2e4   :  { %p337_p7 = pnand %p335_p6, %p332_p5 }
 0x2e6   :  { %340 = shalt.err (!%p337_p7)
}
 0x2e7   :  { %231 = dma.vmem_to_hbm [thread:$0]  %s229_s19, 32, %s477_s5, [#allocation3]  }
 0x2e8   :  { %s371_s29 = smov [#allocation4]  }
 0x2e9   :  { %s238_s30 = sshll.u32 %s371_s29, 4  ;;  %s239_s30 = int_to_ptr.vmem [resolvable:$true] %s238_s30 }
 0x2ea   :  { %s341_s7 = scalar_lea.vmem %s239_s30, 32  ;;  %p346_p9 = scmp.lt.s32.totalorder %s239_s30, %s239_s30 }
 0x2eb   :  { %p342_p8 = scmp.ne.s32.totalorder %s239_s30, %s341_s7  ;;  %p347_p10 = scmp.lt.s32.totalorder %s341_s7, %s341_s7 }
 0x2ed   :  { %p348_p11 = por %p347_p10, %p346_p9 }
 0x2ef   :  { %p349_p12 = pnand %p348_p11, %p342_p8 }
 0x36c   :  { %v216_v37 = vpop.xlane.xlu1 %215 }
 0x36d   :  { %317 = vrcp.f32 %v216_v37 }
 0x377   :  { %v318_v38 = vpop.eup %317 }
 0x378   :  { %v218_v39 = vmul.f32 %v318_v38, %v316_v35 }
 0x37a   :  { %221 = vst.msk [vmem:[#allocation4] sm:$0x3] %vm207_vm4, %v218_v39 }
 0x37b   :  { %352 = shalt.err (!%p349_p12)
}
 0x37c   :  { %s353_s5 = scalar_lea.hbm %s478_s6, 32 }
 0x37d   :  { %p354_p13 = scmp.ne.s32.totalorder %s478_s6, %s353_s5  ;;  %p357_p0 = scmp.lt.u32.totalorder %s353_s5, %s478_s6 }
 0x37f   :  { %p359_p1 = pnand %p357_p0, %p354_p13 }
 0x381   :  { %362 = shalt.err (!%p359_p1)
}
 0x382   :  { %241 = dma.vmem_to_hbm [thread:$0]  %s239_s30, 32, %s478_s6, [#allocation5]  }
 0x383   :  { %363 = dma.done.wait [#allocation3], 32  }
 0x384   :  { %364 = vsyncadd [#allocation3], 4294967264 }
 0x385   :  { %365 = dma.done.wait [#allocation5], 32  }
 0x386   :  { %366 = vsyncadd [#allocation5], 4294967264 }
 0x387   :  { %248 = vsyncpa [#allocation3], 1 }
 0x388   :  { %249 = vsyncpa [#allocation5], 1 }

// kernel: lstm_classifier_forward.4
= control target key start
LH: loop header
LB: loop body
LE: loop exit
PB: predicated region body
PF: predicated region fallthrough
CT: control target
= control target key end

     0   :  { %s1398_s15 = smov 0   ;;  %s1541_s0 = inlined_call_operand.vmem [shape: bf16[16,64], index: 0, kind: input, shape index: {}]   ;;  %s1542_s1 = inlined_call_operand.vmem [shape: bf16[2,64,128], index: 1, kind: input, shape index: {}]   ;;  %s1543_s2 = inlined_call_operand.vmem [shape: bf16[2,32,128], index: 2, kind: input, shape index: {}]   ;;  %s1544_s3 = inlined_call_operand.vmem [shape: f32[2,1,128], index: 3, kind: input, shape index: {}]   ;;  %s1545_s4 = inlined_call_operand.vmem [shape: f32[2,2,32], index: 4, kind: output, shape index: {}]  }
   0x1 LB: > { %s1404_s16 = sadd.s32 4294967295, %s1359_s15   ;;  %p1101_p0 = scmp.ge.s32.totalorder %s1359_s15, 1  ;;  %s1359_s15 = sphi %s1398_s15, %s14_s15  }
   0x2   : > { %p180_p1 = scmp.lt.s32.totalorder %s1359_s15, 3 }
   0x4   : > { %p181_p2 = pnand %p1101_p0, %p180_p1 }
   0x5   : > { %p213_p3 = scmp.lt.s32.totalorder (!%p181_p2), %s1404_s16, 1  ;;  %v1361_v0 = vmov (!%p181_p2), 0.0   ;;  %vm1362_vm0 = vmmov (!%p181_p2), 0   ;;  %v1280_v9 = vld [vmem:[%s1541_s0] sm:$0xff] (!%p181_p2)   ;;  %vm277_vm1 = vcmask (!%p181_p2), 523264   ;;  %p1114_p4 = scmp.ne.s32.totalorder (!%p181_p2), %s1404_s16, 0 }
   0x6   : > { %184 = sbr.rel (%p181_p2) target bundleno = 6591 (0x19bf), region = 36  ;;  %1172 = vmatprep.subr.bf16.mxu0 (!%p181_p2), %v1361_v0  ;;  %1180 = vmatprep.mubr.msk.bf16.mxu0 (!%p181_p2), %vm1362_vm0, %v1361_v0 }
   0xd   : > { %s214_s17 = scalar_select %p213_p3, %s1404_s16, 1 }
   0xe   : > { %v1363_v18 = vmov (!%p1114_p4), 0.0   ;;  %vm1364_vm2 = vmmov (!%p1114_p4), 0   ;;  %v1365_v20 = vmov (!%p1114_p4), 0   ;;  %s1366_s9 = smov (!%p1114_p4), 64   ;;  %s1367_s10 = smov (!%p1114_p4), 32   ;;  %vm345_vm3 = vcmask (!%p1114_p4), 261120  }
   0xf   : > { %s1138_s18 = sshll.u32 %s214_s17, 5  ;;  %s1139_s19 = sshll.u32 %s214_s17, 4  ;;  %1192 = vmatprep.subr.bf16.mxu1 (!%p1114_p4), %v1363_v18  ;;  %1196 = vmatprep.mubr.msk.bf16.mxu1 (!%p1114_p4), %vm1364_vm2, %v1363_v18  ;;  %vm929_vm4 = vcmask (!%p1114_p4), 254976  }
  0x10   : > { %s217_s22 = scalar_lea.vmem %s1542_s1, %s1138_s18  ;;  %s222_s25 = scalar_lea.vmem %s1543_s2, %s1139_s19 }
  0x11   : > { %s1106_s26 = sshll.u32 %s214_s17, 1  ;;  %v1276_v1 = vld [vmem:[%s217_s22] sm:$0xff]   ;;  %v1425_v4 = vld [vmem:[%s222_s25 + $0x8] sm:$0xf]  ;;  %v1427_v5 = vld [vmem:[%s222_s25 + $0xc] sm:$0xf]  ;;  %s225_s8 = scalar_lea.vmem %s1544_s3, %s214_s17 }
  0x12   : > { %s1419_s29 = scalar_lea.vmem %s1545_s4, %s1106_s26  ;;  %v1421_v2 = vld [vmem:[%s222_s25] sm:$0xf]  ;;  %v1423_v3 = vld [vmem:[%s222_s25 + $0x4] sm:$0xf]  ;;  %1173 = vmatpush3.bf16.msra.mxu0 %v1276_v1  ;;  %v1277_v6 = vld [vmem:[%s217_s22 + $0x8] sm:$0xff]   ;;  %v1446_v19 = vcombine.low (!%p1114_p4), %v1425_v4, %v1427_v5 }
  0x13   : > { %1174 = vmatprep.subr.bf16.mxu0 %v1361_v0  ;;  %v1278_v7 = vld [vmem:[%s217_s22 + $0x10] sm:$0xff]   ;;  %v1279_v8 = vld [vmem:[%s217_s22 + $0x18] sm:$0xff]   ;;  %v1107_v10 = vld [vmem:[%s225_s8] ss:$0 sm:$0xff]  ;;  %v1438_v17 = vcombine.low (!%p1114_p4), %v1421_v2, %v1423_v3 }
  0x15   : > { %1193 = vmatpush3.bf16.msra.mxu1 (!%p1114_p4), %v1438_v17 }
  0x16   : > { %1175 = vmatpush3.bf16.msra.mxu0 %v1277_v6  ;;  %1194 = vmatprep.subr.bf16.mxu1 (!%p1114_p4), %v1363_v18 }
  0x17   : > { %1176 = vmatprep.subr.bf16.mxu0 %v1361_v0 }
  0x19   : > { %1195 = vmatpush3.bf16.msra.mxu1 (!%p1114_p4), %v1446_v19 }
  0x1a   : > { %1177 = vmatpush3.bf16.msra.mxu0 %v1278_v7  ;;  %1208 = vmatprep.subr.bf16.mxu1 (!%p1114_p4), %v1363_v18 }
  0x1b   : > { %1178 = vmatprep.subr.bf16.mxu0 %v1361_v0 }
  0x1e   : > { %1179 = vmatpush3.bf16.msra.mxu0 %v1279_v8 }
  0x1f   : > { %1184 = vmatprep.subr.bf16.mxu0 (!%p1114_p4), %v1363_v18 }
  0x21   : > { %1181 = vmatmul.mubr.msk.bf16.vlgmr.msra.gmra.mrb[0].mxu0 %vm277_vm1, %v1280_v9 }
  0x22   : > { %1188 = vmatprep.mubr.msk.bf16.mxu0 (!%p1114_p4), %vm1364_vm2, %v1363_v18  ;;  %1185 = vmatpush3.bf16.msra.mxu0 (!%p1114_p4), %v1438_v17 }
  0x23   : > { %1186 = vmatprep.subr.bf16.mxu0 (!%p1114_p4), %v1363_v18 }
  0x26   : > { %1187 = vmatpush3.bf16.msra.mxu0 (!%p1114_p4), %v1446_v19 }
  0x27   : > { %1200 = vmatprep.subr.bf16.mxu0 (!%p1114_p4), %v1363_v18 }
  0xf3   : > { %331 = sbr.rel (%p1114_p4) target bundleno = 5878 (0x16f6), region = 40 }
  0xf4   : > { %v315_v11 = vpop.f32.mrb[0].mxu0 }
  0xf5   : > { %v316_v12 = vadd.f32 %v1107_v10, %v315_v11  ;;  %v1182_v13 = vpop.f32.mrb[1].mxu0 }
  0xf6   : > { %v318_v14 = vpop.f32.mrb[2].mxu0 }
  0xf7   : > { %322 = vst [vmem:[#allocation2] sm:$0xff] %v316_v12  ;;  %v319_v15 = vadd.f32 %v1107_v10, %v318_v14  ;;  %v1183_v16 = vpop.f32.mrb[3].mxu0  ;;  %1189 = vmatmul.mubr.bf16.vlgmr.msra.gmra.mrb[0].mxu0 (!%p1114_p4), %v1365_v20 }
  0xf8   : > { %1201 = vmatpush3.bf16.msra.mxu0 (!%p1114_p4), %v1438_v17  ;;  %1204 = vmatprep.mubr.msk.bf16.mxu0 (!%p1114_p4), %vm1364_vm2, %v1363_v18 }
  0xf9   : > { %323 = vst [vmem:[#allocation2 + $0x8] sm:$0xff] %v319_v15  ;;  %1202 = vmatprep.subr.bf16.mxu0 (!%p1114_p4), %v1363_v18 }
  0xfc   : > { %1203 = vmatpush3.bf16.msra.mxu0 %v1446_v19 }
  0xfd   : > { %1216 = vmatprep.subr.bf16.mxu0 %v1363_v18 }
  0xfe   : > { %v332_v21 = vld [vmem:[#allocation2] sm:$0x3]  ;;  %v414_v42 = vld [vmem:[#allocation2 + $0x2] sm:$0x3]  ;;  %v487_v63 = vld [vmem:[#allocation2 + $0x4] sm:$0x3] }
 0x1ca   : > { %v383_v22 = vpop.f32.mrb[0].mxu0 }
 0x1cb   : > { %v389_v23 = vadd.f32 %v383_v22, %v332_v21  ;;  %v1190_v24 = vpop.f32.mrb[1].mxu0 }
 0x1cc   : > { %v386_v25 = vpop.f32.mrb[2].mxu0 }
 0x1cd   : > { %1281 = vtanh.f32 %v389_v23  ;;  %v1191_v26 = vpop.f32.mrb[3].mxu0  ;;  %v1117_v28 = vmul.f32 -1.442695, %v389_v23 }
 0x1cf   : > { %1283 = vpow2.f32 %v1117_v28 }
 0x1d7   : > { %v1282_v27 = vpop.eup %1281 }
 0x1d8   : > { %399 = vrot.lane.b32.xlu0 %v1282_v27, %s1366_s9  ;;  %v560_v27 = vld [vmem:[#allocation2 + $0x6] sm:$0x3] }
 0x1d9   : > { %v1284_v29 = vpop.eup %1283 }
 0x1da   : > { %v393_v30 = vadd.f32 1.0, %v1284_v29 }
 0x1dc   : > { %1285 = vrcp.f32 %v393_v30 }
 0x1e6   : > { %v1286_v31 = vpop.eup %1285 }
 0x1e7   : > { %v397_v34 = vmul.f32 0.0, %v1286_v31 }
 0x24a   : > { %v400_v32 = vpop.permute.xlu0 %399 }
 0x24b   : > { %v402_v33 = vmul.f32 %v1286_v31, %v400_v32 }
 0x24d   : > { %404 = vrot.lane.b32.xlu0 %v402_v33, %s1367_s10 }
 0x2bf   : > { %v405_v35 = vpop.permute.xlu0 %404 }
 0x2c0   : > { %v407_v36 = vadd.f32 %v405_v35, %v397_v34 }
 0x2c2   : > { %1287 = vtanh.f32 %v407_v36 }
 0x2cc   : > { %v1288_v37 = vpop.eup %1287 }
 0x2cd   : > { %410 = vrot.lane.b32.xlu1 %v1288_v37, %s1366_s9 }
 0x33f   : > { %v411_v38 = vpop.permute.xlu1 %410 }
 0x340   : > { %v413_v39 = vmul.f32 %v1286_v31, %v411_v38 }
 0x342   : > { %v415_v40 = vpack.c.bf16 %v413_v39, %v413_v39 }
 0x344   : > { %417 = vrot.lane.b32.xlu1 %v415_v40, %s1367_s10 }
 0x3b6   : > { %v418_v41 = vpop.permute.xlu1 %417 }
 0x3b7   : > { %1197 = vmatmul.mubr.msk.bf16.vlgmr.msra.gmra.mrb[0].mxu1 %vm345_vm3, %v418_v41 }
 0x3b8   : > { %1209 = vmatpush3.bf16.msra.mxu1 %v1438_v17  ;;  %1212 = vmatprep.mubr.msk.bf16.mxu1 %vm1364_vm2, %v1363_v18 }
 0x3b9   : > { %1210 = vmatprep.subr.bf16.mxu1 %v1363_v18 }
 0x3bc   : > { %1211 = vmatpush3.bf16.msra.mxu1 %v1446_v19 }
 0x3bd   : > { %1224 = vmatprep.subr.bf16.mxu1 %v1363_v18 }
 0x48a   : > { %v456_v43 = vpop.f32.mrb[0].mxu1 }
 0x48b   : > { %v462_v44 = vadd.f32 %v456_v43, %v414_v42  ;;  %v1198_v45 = vpop.f32.mrb[1].mxu1 }
 0x48c   : > { %v459_v46 = vpop.f32.mrb[2].mxu1 }
 0x48d   : > { %1289 = vtanh.f32 %v462_v44  ;;  %v1199_v47 = vpop.f32.mrb[3].mxu1  ;;  %v1119_v49 = vmul.f32 -1.442695, %v462_v44 }
 0x48f   : > { %1291 = vpow2.f32 %v1119_v49 }
 0x497   : > { %v1290_v48 = vpop.eup %1289 }
 0x498   : > { %472 = vrot.lane.b32.xlu0 %v1290_v48, %s1366_s9  ;;  %v633_v48 = vld [vmem:[#allocation2 + $0x8] sm:$0x3] }
 0x499   : > { %v1292_v50 = vpop.eup %1291 }
 0x49a   : > { %v466_v51 = vadd.f32 1.0, %v1292_v50 }
 0x49c   : > { %1293 = vrcp.f32 %v466_v51 }
 0x4a6   : > { %v1294_v52 = vpop.eup %1293 }
 0x4a7   : > { %v470_v55 = vmul.f32 %v1294_v52, %v407_v36 }
 0x50a   : > { %v473_v53 = vpop.permute.xlu0 %472 }
 0x50b   : > { %v475_v54 = vmul.f32 %v1294_v52, %v473_v53 }
 0x50d   : > { %477 = vrot.lane.b32.xlu1 %v475_v54, %s1367_s10 }
 0x57f   : > { %v478_v56 = vpop.permute.xlu1 %477 }
 0x580   : > { %v480_v57 = vadd.f32 %v478_v56, %v470_v55 }
 0x582   : > { %1295 = vtanh.f32 %v480_v57 }
 0x58c   : > { %v1296_v58 = vpop.eup %1295 }
 0x58d   : > { %483 = vrot.lane.b32.xlu0 %v1296_v58, %s1366_s9 }
 0x5ff   : > { %v484_v59 = vpop.permute.xlu0 %483 }
 0x600   : > { %v486_v60 = vmul.f32 %v1294_v52, %v484_v59 }
 0x602   : > { %v488_v61 = vpack.c.bf16 %v486_v60, %v486_v60 }
 0x604   : > { %490 = vrot.lane.b32.xlu1 %v488_v61, %s1367_s10 }
 0x676   : > { %v491_v62 = vpop.permute.xlu1 %490 }
 0x677   : > { %1205 = vmatmul.mubr.msk.bf16.vlgmr.msra.gmra.mrb[4].mxu0 %vm345_vm3, %v491_v62 }
 0x678   : > { %1217 = vmatpush3.bf16.msra.mxu0 %v1438_v17  ;;  %1220 = vmatprep.mubr.msk.bf16.mxu0 %vm1364_vm2, %v1363_v18 }
 0x679   : > { %1218 = vmatprep.subr.bf16.mxu0 %v1363_v18 }
 0x67c   : > { %1219 = vmatpush3.bf16.msra.mxu0 %v1446_v19 }
 0x67d   : > { %1232 = vmatprep.subr.bf16.mxu0 %v1363_v18 }
 0x74a   : > { %v529_v0 = vpop.f32.mrb[4].mxu0 }
 0x74b   : > { %v535_v1 = vadd.f32 %v529_v0, %v487_v63  ;;  %v1206_v6 = vpop.f32.mrb[5].mxu0 }
 0x74c   : > { %v532_v7 = vpop.f32.mrb[6].mxu0 }
 0x74d   : > { %1297 = vtanh.f32 %v535_v1  ;;  %v1207_v8 = vpop.f32.mrb[7].mxu0  ;;  %v1121_v10 = vmul.f32 -1.442695, %v535_v1 }
 0x74f   : > { %1299 = vpow2.f32 %v1121_v10 }
 0x757   : > { %v1298_v9 = vpop.eup %1297 }
 0x758   : > { %545 = vrot.lane.b32.xlu0 %v1298_v9, %s1366_s9  ;;  %v706_v9 = vld [vmem:[#allocation2 + $0xa] sm:$0x3] }
 0x759   : > { %v1300_v11 = vpop.eup %1299 }
 0x75a   : > { %v539_v12 = vadd.f32 1.0, %v1300_v11 }
 0x75c   : > { %1301 = vrcp.f32 %v539_v12 }
 0x766   : > { %v1302_v13 = vpop.eup %1301 }
 0x767   : > { %v543_v16 = vmul.f32 %v1302_v13, %v480_v57 }
 0x7ca   : > { %v546_v14 = vpop.permute.xlu0 %545 }
 0x7cb   : > { %v548_v15 = vmul.f32 %v1302_v13, %v546_v14 }
 0x7cd   : > { %550 = vrot.lane.b32.xlu1 %v548_v15, %s1367_s10 }
 0x83f   : > { %v551_v20 = vpop.permute.xlu1 %550 }
 0x840   : > { %v553_v21 = vadd.f32 %v551_v20, %v543_v16 }
 0x842   : > { %1303 = vtanh.f32 %v553_v21 }
 0x84c   : > { %v1304_v22 = vpop.eup %1303 }
 0x84d   : > { %556 = vrot.lane.b32.xlu0 %v1304_v22, %s1366_s9 }
 0x8bf   : > { %v557_v23 = vpop.permute.xlu0 %556 }
 0x8c0   : > { %v559_v24 = vmul.f32 %v1302_v13, %v557_v23 }
 0x8c2   : > { %v561_v25 = vpack.c.bf16 %v559_v24, %v559_v24 }
 0x8c4   : > { %563 = vrot.lane.b32.xlu1 %v561_v25, %s1367_s10 }
 0x936   : > { %v564_v26 = vpop.permute.xlu1 %563 }
 0x937   : > { %1213 = vmatmul.mubr.msk.bf16.vlgmr.msra.gmra.mrb[4].mxu1 %vm345_vm3, %v564_v26 }
 0x938   : > { %1225 = vmatpush3.bf16.msra.mxu1 %v1438_v17  ;;  %1228 = vmatprep.mubr.msk.bf16.mxu1 %vm1364_vm2, %v1363_v18 }
 0x939   : > { %1226 = vmatprep.subr.bf16.mxu1 %v1363_v18 }
 0x93c   : > { %1227 = vmatpush3.bf16.msra.mxu1 %v1446_v19 }
 0x93d   : > { %1240 = vmatprep.subr.bf16.mxu1 %v1363_v18 }
 0xa0a   : > { %v602_v28 = vpop.f32.mrb[4].mxu1 }
 0xa0b   : > { %v608_v29 = vadd.f32 %v602_v28, %v560_v27  ;;  %v1214_v30 = vpop.f32.mrb[5].mxu1 }
 0xa0c   : > { %v605_v31 = vpop.f32.mrb[6].mxu1  ;;  %v779_v30 = vld [vmem:[#allocation2 + $0xc] sm:$0x3] }
 0xa0d   : > { %1305 = vtanh.f32 %v608_v29  ;;  %v1215_v32 = vpop.f32.mrb[7].mxu1  ;;  %v1123_v34 = vmul.f32 -1.442695, %v608_v29 }
 0xa0f   : > { %1307 = vpow2.f32 %v1123_v34 }
 0xa17   : > { %v1306_v33 = vpop.eup %1305 }
 0xa18   : > { %618 = vrot.lane.b32.xlu0 %v1306_v33, %s1366_s9 }
 0xa19   : > { %v1308_v35 = vpop.eup %1307 }
 0xa1a   : > { %v612_v36 = vadd.f32 1.0, %v1308_v35 }
 0xa1c   : > { %1309 = vrcp.f32 %v612_v36 }
 0xa26   : > { %v1310_v37 = vpop.eup %1309 }
 0xa27   : > { %v616_v40 = vmul.f32 %v1310_v37, %v553_v21 }
 0xa8a   : > { %v619_v38 = vpop.permute.xlu0 %618 }
 0xa8b   : > { %v621_v39 = vmul.f32 %v1310_v37, %v619_v38 }
 0xa8d   : > { %623 = vrot.lane.b32.xlu1 %v621_v39, %s1367_s10 }
 0xaff   : > { %v624_v41 = vpop.permute.xlu1 %623 }
 0xb00   : > { %v626_v42 = vadd.f32 %v624_v41, %v616_v40 }
 0xb02   : > { %1311 = vtanh.f32 %v626_v42 }
 0xb0c   : > { %v1312_v43 = vpop.eup %1311 }
 0xb0d   : > { %629 = vrot.lane.b32.xlu0 %v1312_v43, %s1366_s9 }
 0xb7f   : > { %v630_v44 = vpop.permute.xlu0 %629 }
 0xb80   : > { %v632_v45 = vmul.f32 %v1310_v37, %v630_v44 }
 0xb82   : > { %v634_v46 = vpack.c.bf16 %v632_v45, %v632_v45 }
 0xb84   : > { %636 = vrot.lane.b32.xlu1 %v634_v46, %s1367_s10 }
 0xbf6   : > { %v637_v47 = vpop.permute.xlu1 %636 }
 0xbf7   : > { %1221 = vmatmul.mubr.msk.bf16.vlgmr.msra.gmra.mrb[8].mxu0 %vm345_vm3, %v637_v47 }
 0xbf8   : > { %1233 = vmatpush3.bf16.msra.mxu0 %v1438_v17  ;;  %1236 = vmatprep.mubr.msk.bf16.mxu0 %vm1364_vm2, %v1363_v18 }
 0xbf9   : > { %1234 = vmatprep.subr.bf16.mxu0 %v1363_v18 }
 0xbfc   : > { %1235 = vmatpush3.bf16.msra.mxu0 %v1446_v19 }
 0xcca   : > { %v675_v49 = vpop.f32.mrb[8].mxu0 }
 0xccb   : > { %v681_v50 = vadd.f32 %v675_v49, %v633_v48  ;;  %v1222_v51 = vpop.f32.mrb[9].mxu0 }
 0xccc   : > { %v678_v52 = vpop.f32.mrb[10].mxu0  ;;  %v852_v51 = vld [vmem:[#allocation2 + $0xe] sm:$0x3] }
 0xccd   : > { %1313 = vtanh.f32 %v681_v50  ;;  %v1223_v53 = vpop.f32.mrb[11].mxu0  ;;  %v1125_v55 = vmul.f32 -1.442695, %v681_v50 }
 0xccf   : > { %1315 = vpow2.f32 %v1125_v55 }
 0xcd7   : > { %v1314_v54 = vpop.eup %1313 }
 0xcd8   : > { %691 = vrot.lane.b32.xlu0 %v1314_v54, %s1366_s9 }
 0xcd9   : > { %v1316_v56 = vpop.eup %1315 }
 0xcda   : > { %v685_v57 = vadd.f32 1.0, %v1316_v56 }
 0xcdc   : > { %1317 = vrcp.f32 %v685_v57 }
 0xce6   : > { %v1318_v58 = vpop.eup %1317 }
 0xce7   : > { %v689_v61 = vmul.f32 %v1318_v58, %v626_v42 }
 0xd4a   : > { %v692_v59 = vpop.permute.xlu0 %691 }
 0xd4b   : > { %v694_v60 = vmul.f32 %v1318_v58, %v692_v59 }
 0xd4d   : > { %696 = vrot.lane.b32.xlu1 %v694_v60, %s1367_s10 }
 0xdbf   : > { %v697_v62 = vpop.permute.xlu1 %696 }
 0xdc0   : > { %v699_v63 = vadd.f32 %v697_v62, %v689_v61 }
 0xdc2   : > { %1319 = vtanh.f32 %v699_v63 }
 0xdcc   : > { %v1320_v0 = vpop.eup %1319 }
 0xdcd   : > { %702 = vrot.lane.b32.xlu0 %v1320_v0, %s1366_s9 }
 0xe3f   : > { %v703_v1 = vpop.permute.xlu0 %702 }
 0xe40   : > { %v705_v6 = vmul.f32 %v1318_v58, %v703_v1 }
 0xe42   : > { %v707_v7 = vpack.c.bf16 %v705_v6, %v705_v6 }
 0xe44   : > { %709 = vrot.lane.b32.xlu1 %v707_v7, %s1367_s10 }
 0xeb6   : > { %v710_v8 = vpop.permute.xlu1 %709 }
 0xeb7   : > { %1229 = vmatmul.mubr.msk.bf16.vlgmr.msra.gmra.mrb[8].mxu1 %vm345_vm3, %v710_v8 }
 0xeb8   : > { %1241 = vmatpush3.bf16.msra.mxu1 %v1438_v17  ;;  %1244 = vmatprep.mubr.msk.bf16.mxu1 %vm1364_vm2, %v1363_v18 }
 0xeb9   : > { %1242 = vmatprep.subr.bf16.mxu1 %v1363_v18 }
 0xebc   : > { %1243 = vmatpush3.bf16.msra.mxu1 %v1446_v19 }
 0xf8a   : > { %v748_v10 = vpop.f32.mrb[8].mxu1 }
 0xf8b   : > { %v754_v11 = vadd.f32 %v748_v10, %v706_v9  ;;  %v1230_v12 = vpop.f32.mrb[9].mxu1 }
 0xf8c   : > { %v751_v13 = vpop.f32.mrb[10].mxu1 }
 0xf8d   : > { %1321 = vtanh.f32 %v754_v11  ;;  %v1231_v14 = vpop.f32.mrb[11].mxu1  ;;  %v1127_v16 = vmul.f32 -1.442695, %v754_v11 }
 0xf8f   : > { %1323 = vpow2.f32 %v1127_v16 }
 0xf97   : > { %v1322_v15 = vpop.eup %1321 }
 0xf98   : > { %764 = vrot.lane.b32.xlu0 %v1322_v15, %s1366_s9 }
 0xf99   : > { %v1324_v17 = vpop.eup %1323 }
 0xf9a   : > { %v758_v20 = vadd.f32 1.0, %v1324_v17 }
 0xf9c   : > { %1325 = vrcp.f32 %v758_v20 }
 0xfa6   : > { %v1326_v21 = vpop.eup %1325 }
 0xfa7   : > { %v762_v19 = vmul.f32 %v1326_v21, %v699_v63 }
0x100a   : > { %v765_v22 = vpop.permute.xlu0 %764 }
0x100b   : > { %v767_v18 = vmul.f32 %v1326_v21, %v765_v22 }
0x100d   : > { %769 = vrot.lane.b32.xlu1 %v767_v18, %s1367_s10 }
0x107f   : > { %v770_v23 = vpop.permute.xlu1 %769 }
0x1080   : > { %v772_v24 = vadd.f32 %v770_v23, %v762_v19 }
0x1082   : > { %1327 = vtanh.f32 %v772_v24 }
0x108c   : > { %v1328_v25 = vpop.eup %1327 }
0x108d   : > { %775 = vrot.lane.b32.xlu0 %v1328_v25, %s1366_s9 }
0x10ff   : > { %v776_v26 = vpop.permute.xlu0 %775 }
0x1100   : > { %v778_v27 = vmul.f32 %v1326_v21, %v776_v26 }
0x1102   : > { %v780_v28 = vpack.c.bf16 %v778_v27, %v778_v27 }
0x1104   : > { %782 = vrot.lane.b32.xlu1 %v780_v28, %s1367_s10 }
0x1176   : > { %v783_v29 = vpop.permute.xlu1 %782 }
0x1177   : > { %1237 = vmatmul.mubr.msk.bf16.vlgmr.msra.gmra.mrb[12].mxu0 %vm345_vm3, %v783_v29 }
0x124a   : > { %v821_v31 = vpop.f32.mrb[12].mxu0 }
0x124b   : > { %v827_v32 = vadd.f32 %v821_v31, %v779_v30  ;;  %v1238_v33 = vpop.f32.mrb[13].mxu0 }
0x124c   : > { %v824_v34 = vpop.f32.mrb[14].mxu0 }
0x124d   : > { %1329 = vtanh.f32 %v827_v32  ;;  %v1239_v35 = vpop.f32.mrb[15].mxu0  ;;  %v1129_v37 = vmul.f32 -1.442695, %v827_v32 }
0x124f   : > { %1331 = vpow2.f32 %v1129_v37 }
0x1257   : > { %v1330_v36 = vpop.eup %1329 }
0x1258   : > { %837 = vrot.lane.b32.xlu0 %v1330_v36, %s1366_s9 }
0x1259   : > { %v1332_v38 = vpop.eup %1331 }
0x125a   : > { %v831_v39 = vadd.f32 1.0, %v1332_v38 }
0x125c   : > { %1333 = vrcp.f32 %v831_v39 }
0x1266   : > { %v1334_v40 = vpop.eup %1333 }
0x1267   : > { %v835_v43 = vmul.f32 %v1334_v40, %v772_v24 }
0x12ca   : > { %v838_v41 = vpop.permute.xlu0 %837 }
0x12cb   : > { %v840_v42 = vmul.f32 %v1334_v40, %v838_v41 }
0x12cd   : > { %842 = vrot.lane.b32.xlu1 %v840_v42, %s1367_s10 }
0x133f   : > { %v843_v44 = vpop.permute.xlu1 %842 }
0x1340   : > { %v845_v45 = vadd.f32 %v843_v44, %v835_v43 }
0x1342   : > { %1335 = vtanh.f32 %v845_v45 }
0x134c   : > { %v1336_v46 = vpop.eup %1335 }
0x134d   : > { %848 = vrot.lane.b32.xlu0 %v1336_v46, %s1366_s9 }
0x13bf   : > { %v849_v47 = vpop.permute.xlu0 %848 }
0x13c0   : > { %v851_v48 = vmul.f32 %v1334_v40, %v849_v47 }
0x13c2   : > { %v853_v49 = vpack.c.bf16 %v851_v48, %v851_v48 }
0x13c4   : > { %855 = vrot.lane.b32.xlu1 %v853_v49, %s1367_s10 }
0x1436   : > { %v856_v50 = vpop.permute.xlu1 %855 }
0x1437   : > { %1245 = vmatmul.mubr.msk.bf16.vlgmr.msra.gmra.mrb[12].mxu1 %vm345_vm3, %v856_v50 }
0x150a   : > { %v894_v52 = vpop.f32.mrb[12].mxu1 }
0x150b   : > { %v900_v53 = vadd.f32 %v894_v52, %v852_v51  ;;  %v1246_v54 = vpop.f32.mrb[13].mxu1 }
0x150c   : > { %v897_v55 = vpop.f32.mrb[14].mxu1 }
0x150d   : > { %1337 = vtanh.f32 %v900_v53  ;;  %v1247_v56 = vpop.f32.mrb[15].mxu1  ;;  %v1131_v58 = vmul.f32 -1.442695, %v900_v53 }
0x150f   : > { %1339 = vpow2.f32 %v1131_v58 }
0x1517   : > { %v1338_v57 = vpop.eup %1337 }
0x1518   : > { %910 = vrot.lane.b32.xlu0 %v1338_v57, %s1366_s9 }
0x1519   : > { %v1340_v59 = vpop.eup %1339 }
0x151a   : > { %v904_v60 = vadd.f32 1.0, %v1340_v59 }
0x151c   : > { %1341 = vrcp.f32 %v904_v60 }
0x1526   : > { %v1342_v61 = vpop.eup %1341 }
0x1527   : > { %v908_v0 = vmul.f32 %v1342_v61, %v845_v45 }
0x158a   : > { %v911_v62 = vpop.permute.xlu0 %910 }
0x158b   : > { %v913_v63 = vmul.f32 %v1342_v61, %v911_v62 }
0x158d   : > { %915 = vrot.lane.b32.xlu1 %v913_v63, %s1367_s10 }
0x15ff   : > { %v916_v1 = vpop.permute.xlu1 %915 }
0x1600   : > { %v918_v6 = vadd.f32 %v916_v1, %v908_v0 }
0x1602   : > { %1343 = vtanh.f32 %v918_v6 }
0x160c   : > { %v1344_v7 = vpop.eup %1343 }
0x160d   : > { %921 = vrot.lane.b32.xlu0 %v1344_v7, %s1366_s9 }
0x167f   : > { %v922_v8 = vpop.permute.xlu0 %921 }
0x1680   : > { %v924_v9 = vmul.f32 %v1342_v61, %v922_v8 }
0x1682   : > { %926 = vrot.lane.b32.xlu1 %v924_v9, %s1367_s10 }
0x16f4   : > { %v927_v10 = vpop.permute.xlu1 %926 }
0x16f5   : > { %930 = vst.msk [vmem:[%s1419_s29] sm:$0x3] %vm929_vm4, %v927_v10 }
0x16f6 PF: > { %p1132_p5 = scmp.ne.s32.totalorder %s1404_s16, 1 }
0x16f7   : > { %v1133_v11 = vcombine.low (!%p1132_p5), %v1421_v2, %v1423_v3  ;;  %v1368_v12 = vmov (!%p1132_p5), 0.0   ;;  %vm1369_vm5 = vmmov (!%p1132_p5), 0   ;;  %v1134_v13 = vcombine.low (!%p1132_p5), %v1425_v4, %v1427_v5  ;;  %s1371_s11 = smov (!%p1132_p5), 64   ;;  %s1372_s12 = smov (!%p1132_p5), 32  }
0x16f8   : > { %934 = sbr.rel (%p1132_p5) target bundleno = 6591 (0x19bf), region = 44  ;;  %1248 = vmatprep.subr.bf16.mxu0 (!%p1132_p5), %v1368_v12  ;;  %1252 = vmatprep.mubr.msk.bf16.mxu0 (!%p1132_p5), %vm1369_vm5, %v1368_v12  ;;  %v1370_v14 = vmov (!%p1132_p5), 0   ;;  %vm1021_vm6 = vcmask (!%p1132_p5), 254976  }
0x16f9   : > { %1249 = vmatpush3.bf16.msra.mxu0 (!%p1132_p5), %v1133_v11 }
0x16fa   : > { %1250 = vmatprep.subr.bf16.mxu0 (!%p1132_p5), %v1368_v12 }
0x16fc   : > { %v935_v15 = vld [vmem:[#allocation2 + $0xe] sm:$0x3] (!%p1132_p5) }
0x16fd   : > { %1251 = vmatpush3.bf16.msra.mxu0 (!%p1132_p5), %v1134_v13 }
0x1700   : > { %1253 = vmatmul.mubr.bf16.vlgmr.msra.gmra.mrb[0].mxu0 %v1370_v14 }
0x17d3   : > { %v986_v16 = vpop.f32.mrb[0].mxu0 }
0x17d4   : > { %v992_v17 = vadd.f32 %v986_v16, %v935_v15  ;;  %v1254_v20 = vpop.f32.mrb[1].mxu0 }
0x17d5   : > { %v989_v21 = vpop.f32.mrb[2].mxu0 }
0x17d6   : > { %1345 = vtanh.f32 %v992_v17  ;;  %v1255_v22 = vpop.f32.mrb[3].mxu0  ;;  %v1135_v3 = vmul.f32 -1.442695, %v992_v17 }
0x17d8   : > { %1347 = vpow2.f32 %v1135_v3 }
0x17e0   : > { %v1346_v2 = vpop.eup %1345 }
0x17e1   : > { %1002 = vrot.lane.b32.xlu0 %v1346_v2, %s1371_s11 }
0x17e2   : > { %v1348_v18 = vpop.eup %1347 }
0x17e3   : > { %v996_v19 = vadd.f32 1.0, %v1348_v18 }
0x17e5   : > { %1349 = vrcp.f32 %v996_v19 }
0x17ef   : > { %v1350_v4 = vpop.eup %1349 }
0x17f0   : > { %v1000_v24 = vmul.f32 0.0, %v1350_v4 }
0x1853   : > { %v1003_v5 = vpop.permute.xlu0 %1002 }
0x1854   : > { %v1005_v23 = vmul.f32 %v1350_v4, %v1003_v5 }
0x1856   : > { %1007 = vrot.lane.b32.xlu0 %v1005_v23, %s1372_s12 }
0x18c8   : > { %v1008_v25 = vpop.permute.xlu0 %1007 }
0x18c9   : > { %v1010_v26 = vadd.f32 %v1008_v25, %v1000_v24 }
0x18cb   : > { %1351 = vtanh.f32 %v1010_v26 }
0x18d5   : > { %v1352_v27 = vpop.eup %1351 }
0x18d6   : > { %1013 = vrot.lane.b32.xlu1 %v1352_v27, %s1371_s11 }
0x1948   : > { %v1014_v28 = vpop.permute.xlu1 %1013 }
0x1949   : > { %v1016_v29 = vmul.f32 %v1350_v4, %v1014_v28 }
0x194b   : > { %1018 = vrot.lane.b32.xlu1 %v1016_v29, %s1372_s12 }
0x19bd   : > { %v1019_v30 = vpop.permute.xlu1 %1018 }
0x19be   : > { %1022 = vst.msk [vmem:[%s1419_s29] sm:$0x3] %vm1021_vm6, %v1019_v30 }
0x19bf PF: > { %s14_s15 = sadd.s32 1, %s1359_s15  }
0x19c0   : > { %p11_p6 = scmp.ge.s32.totalorder %s14_s15, 4  }
0x19c2   :  { %13 = sbr.rel (!%p11_p6) target bundleno = 1 (0x1), region = 80 }

// kernel: lstm_classifier_forward.3
= control target key start
LH: loop header
LB: loop body
LE: loop exit
PB: predicated region body
PF: predicated region fallthrough
CT: control target
= control target key end

     0   :  { %11 = vsyncpa [#allocation4], 0  ;;  %s2949_s0 = inlined_call_operand.vmem [shape: bf16[16,16], index: 0, kind: input, shape index: {}]   ;;  %s2950_s1 = inlined_call_operand.vmem [shape: bf16[2,16,128], index: 1, kind: input, shape index: {}]   ;;  %s2951_s2 = inlined_call_operand.vmem [shape: bf16[2,32,128], index: 2, kind: input, shape index: {}]   ;;  %s2952_s3 = inlined_call_operand.vmem [shape: f32[2,1,128], index: 3, kind: input, shape index: {}]   ;;  %s2953_s4 = inlined_call_operand.vmem [shape: bf16[2,8,2,32], index: 4, kind: output, shape index: {0}]   ;;  %s2954_s5 = inlined_call_operand.hbm [shape: f32[2,2,32], index: 5, kind: output, shape index: {1}]  }
   0x1   :  { %13 = vsyncpa [#allocation4 + $0x1], 0  ;;  %s2527_s18 = smov 0   ;;  %s2529_s19 = smov 0  }
   0x2   :  { %s2531_s20 = smov 0   ;;  %s2533_s21 = smov 0  }
   0x3 LB: > { %s2548_s22 = sadd.s32 4294967295, %s2480_s21   ;;  %s1981_s23 = sadd.s32 4294967294, %s2480_s21   ;;  %s2480_s21 = sphi %s2533_s21, %s2960_s21   ;;  %s2476_s20 = sphi %s2531_s20, %s2959_s20   ;;  %s2472_s19 = sphi %s2529_s19, %s2958_s19   ;;  %s2468_s18 = sphi %s2527_s18, %s2957_s18  }
   0x4   : > { %s2552_s24 = sadd.s32 1, %s2480_s21   ;;  %s151_s25 = sadd.s32 1, %s2476_s20 }
   0x5   : > { %s148_s26 = ssub.s32 %s2480_s21, %s2552_s24  ;;  %p161_p0 = scmp.ne.s32.totalorder %s2476_s20, %s2472_s19 }
   0x6   : > { %p149_p1 = scmp.eq.s32.totalorder %s148_s26, 0  ;;  %p162_p2 = scmp.eq.s32.totalorder %s2548_s22, 1 }
   0x7   : > { %p167_p3 = scmp.ne.s32.totalorder %s2472_s19, %s2468_s18  ;;  %p168_p4 = scmp.eq.s32.totalorder %s1981_s23, 1 }
   0x8   : > { %s2563_s27 = scalar_select %p149_p1, %s2476_s20, %s151_s25  }
   0x9   : > { %p2565_p5 = por %p162_p2, %p161_p0  ;;  %p2569_p6 = por %p168_p4, %p167_p3 }
   0xa   : > { %p1984_p7 = scmp.ge.s32.totalorder %s2480_s21, 1  ;;  %p211_p8 = scmp.lt.s32.totalorder %s2480_s21, 3 }
   0xc   : > { %p212_p9 = pnand %p1984_p7, %p211_p8 }
   0xd   : > { %s248_s30 = sand.u32 (!%p212_p9), 1, %s2472_s19   ;;  %p251_p10 = scmp.lt.s32.totalorder (!%p212_p9), %s2548_s22, 1  ;;  %v2482_v0 = vmov (!%p212_p9), 0.0   ;;  %vm2483_vm0 = vmmov (!%p212_p9), 0   ;;  %v2289_v1 = vld [vmem:[%s2949_s0] sm:$0xff] (!%p212_p9)   ;;  %vm291_vm1 = vcmask (!%p212_p9), 130048  }
   0xe   : > { %215 = sbr.rel (%p212_p9) target bundleno = 11551 (0x2d1f), region = 36  ;;  %s1985_s6 = sshll.u32 (!%p212_p9), %s248_s30, 1  ;;  %2101 = vmatprep.subr.bf16.mxu0 (!%p212_p9), %v2482_v0  ;;  %2103 = vmatprep.mubr.msk.bf16.mxu0 (!%p212_p9), %vm2483_vm0, %v2482_v0 }
   0xf   : > { %p1995_p11 = scmp.ne.s32.totalorder (!%p212_p9), %s2548_s22, 0 }
  0x15   : > { %s252_s7 = scalar_select %p251_p10, %s2548_s22, 1 }
  0x16   : > { %v2484_v15 = vmov (!%p1995_p11), 0.0   ;;  %vm2485_vm2 = vmmov (!%p1995_p11), 0   ;;  %v2486_v17 = vmov (!%p1995_p11), 0   ;;  %vm359_vm3 = vcmask (!%p1995_p11), 261120  }
  0x17   : > { %s2049_s8 = sshll.u32 %s252_s7, 3  ;;  %s2050_s9 = sshll.u32 %s252_s7, 4  ;;  %2115 = vmatprep.subr.bf16.mxu1 (!%p1995_p11), %v2484_v15  ;;  %2119 = vmatprep.mubr.msk.bf16.mxu1 (!%p1995_p11), %vm2485_vm2, %v2484_v15  ;;  %vm447_vm4 = vcmask (!%p1995_p11), 253952   ;;  %vm1097_vm5 = vcmask (!%p1995_p11), 254976  }
  0x18   : > { %s255_s12 = scalar_lea.vmem %s2950_s1, %s2049_s8  ;;  %s260_s15 = scalar_lea.vmem %s2951_s2, %s2050_s9 }
  0x19   : > { %s2592_s26 = scalar_lea.vmem %s2953_s4, %s2049_s8  ;;  %v2288_v2 = vld [vmem:[%s255_s12] sm:$0xff]   ;;  %v2598_v5 = vld [vmem:[%s260_s15 + $0x8] sm:$0xf]  ;;  %v2600_v6 = vld [vmem:[%s260_s15 + $0xc] sm:$0xf]  ;;  %s263_s11 = scalar_lea.vmem %s2952_s3, %s252_s7 }
  0x1a   : > { %v2594_v3 = vld [vmem:[%s260_s15] sm:$0xf]  ;;  %v2596_v4 = vld [vmem:[%s260_s15 + $0x4] sm:$0xf]  ;;  %2102 = vmatpush3.bf16.msra.mxu0 %v2288_v2  ;;  %s2605_s8 = scalar_lea.vmem [#allocation3], %s1985_s6  ;;  %v2618_v16 = vcombine.low (!%p1995_p11), %v2598_v5, %v2600_v6  ;;  %s2487_s6 = smov (!%p1995_p11), 64  }
  0x1b   : > { %v1991_v7 = vld [vmem:[%s263_s11] ss:$0 sm:$0xff]  ;;  %v2610_v14 = vcombine.low (!%p1995_p11), %v2594_v3, %v2596_v4  ;;  %2107 = vmatprep.subr.bf16.mxu0 (!%p1995_p11), %v2484_v15  ;;  %s2488_s7 = smov (!%p1995_p11), 32  }
  0x1d   : > { %2104 = vmatmul.mubr.msk.bf16.vlgmr.msra.gmra.mrb[0].mxu0 %vm291_vm1, %v2289_v1  ;;  %2116 = vmatpush3.bf16.msra.mxu1 (!%p1995_p11), %v2610_v14 }
  0x1e   : > { %2111 = vmatprep.mubr.msk.bf16.mxu0 (!%p1995_p11), %vm2485_vm2, %v2484_v15  ;;  %2108 = vmatpush3.bf16.msra.mxu0 (!%p1995_p11), %v2610_v14 }
  0x1f   : > { %2109 = vmatprep.subr.bf16.mxu0 (!%p1995_p11), %v2484_v15  ;;  %2117 = vmatprep.subr.bf16.mxu1 (!%p1995_p11), %v2484_v15 }
  0x21   : > { %2118 = vmatpush3.bf16.msra.mxu1 (!%p1995_p11), %v2618_v16 }
  0x22   : > { %2110 = vmatpush3.bf16.msra.mxu0 (!%p1995_p11), %v2618_v16  ;;  %2131 = vmatprep.subr.bf16.mxu1 (!%p1995_p11), %v2484_v15 }
  0x23   : > { %2123 = vmatprep.subr.bf16.mxu0 (!%p1995_p11), %v2484_v15 }
  0xef   : > { %345 = sbr.rel (%p1995_p11) target bundleno = 5880 (0x16f8), region = 40 }
  0xf0   : > { %v329_v8 = vpop.f32.mrb[0].mxu0 }
  0xf1   : > { %v330_v9 = vadd.f32 %v1991_v7, %v329_v8  ;;  %v2105_v10 = vpop.f32.mrb[1].mxu0 }
  0xf2   : > { %v332_v11 = vpop.f32.mrb[2].mxu0 }
  0xf3   : > { %336 = vst [vmem:[#allocation2] sm:$0xff] %v330_v9  ;;  %v333_v12 = vadd.f32 %v1991_v7, %v332_v11  ;;  %v2106_v13 = vpop.f32.mrb[3].mxu0  ;;  %2112 = vmatmul.mubr.bf16.vlgmr.msra.gmra.mrb[0].mxu0 (!%p1995_p11), %v2486_v17 }
  0xf4   : > { %2124 = vmatpush3.bf16.msra.mxu0 (!%p1995_p11), %v2610_v14  ;;  %2127 = vmatprep.mubr.msk.bf16.mxu0 (!%p1995_p11), %vm2485_vm2, %v2484_v15 }
  0xf5   : > { %337 = vst [vmem:[#allocation2 + $0x8] sm:$0xff] %v333_v12  ;;  %2125 = vmatprep.subr.bf16.mxu0 (!%p1995_p11), %v2484_v15 }
  0xf8   : > { %2126 = vmatpush3.bf16.msra.mxu0 %v2618_v16 }
  0xf9   : > { %2139 = vmatprep.subr.bf16.mxu0 %v2484_v15 }
  0xfa   : > { %v346_v18 = vld [vmem:[#allocation2] sm:$0x3]  ;;  %v449_v39 = vld [vmem:[#allocation2 + $0x2] sm:$0x3]  ;;  %v541_v60 = vld [vmem:[#allocation2 + $0x4] sm:$0x3] }
 0x1c6   : > { %v397_v19 = vpop.f32.mrb[0].mxu0 }
 0x1c7   : > { %v403_v20 = vadd.f32 %v397_v19, %v346_v18  ;;  %v2113_v21 = vpop.f32.mrb[1].mxu0 }
 0x1c8   : > { %v400_v22 = vpop.f32.mrb[2].mxu0 }
 0x1c9   : > { %2290 = vtanh.f32 %v403_v20  ;;  %v2114_v23 = vpop.f32.mrb[3].mxu0  ;;  %v1998_v25 = vmul.f32 -1.442695, %v403_v20 }
 0x1cb   : > { %2292 = vpow2.f32 %v1998_v25 }
 0x1d3   : > { %v2291_v24 = vpop.eup %2290 }
 0x1d4   : > { %413 = vrot.lane.b32.xlu0 %v2291_v24, %s2487_s6  ;;  %v633_v24 = vld [vmem:[#allocation2 + $0x6] sm:$0x3] }
 0x1d5   : > { %v2293_v26 = vpop.eup %2292 }
 0x1d6   : > { %v407_v27 = vadd.f32 1.0, %v2293_v26 }
 0x1d8   : > { %2294 = vrcp.f32 %v407_v27 }
 0x1e2   : > { %v2295_v28 = vpop.eup %2294 }
 0x1e3   : > { %v411_v31 = vmul.f32 0.0, %v2295_v28 }
 0x246   : > { %v414_v29 = vpop.permute.xlu0 %413 }
 0x247   : > { %v416_v30 = vmul.f32 %v2295_v28, %v414_v29 }
 0x249   : > { %418 = vrot.lane.b32.xlu0 %v416_v30, %s2488_s7 }
 0x2bb   : > { %v419_v32 = vpop.permute.xlu0 %418 }
 0x2bc   : > { %v421_v33 = vadd.f32 %v419_v32, %v411_v31 }
 0x2be   : > { %2296 = vtanh.f32 %v421_v33 }
 0x2c8   : > { %v2297_v34 = vpop.eup %2296 }
 0x2c9   : > { %424 = vrot.lane.b32.xlu1 %v2297_v34, %s2487_s6 }
 0x33b   : > { %v425_v35 = vpop.permute.xlu1 %424 }
 0x33c   : > { %v427_v36 = vmul.f32 %v2295_v28, %v425_v35 }
 0x33e   : > { %v2639_v37 = vpack.c.bf16 %v427_v36, %v427_v36 }
 0x340   : > { %450 = vrot.lane.b32.xlu1 %v2639_v37, %s2488_s7 }
 0x3b2   : > { %v451_v38 = vpop.permute.xlu1 %450 }
 0x3b3   : > { %2120 = vmatmul.mubr.msk.bf16.vlgmr.msra.gmra.mrb[0].mxu1 %vm359_vm3, %v451_v38 }
 0x3b4   : > { %2132 = vmatpush3.bf16.msra.mxu1 %v2610_v14  ;;  %2135 = vmatprep.mubr.msk.bf16.mxu1 %vm2485_vm2, %v2484_v15 }
 0x3b5   : > { %2133 = vmatprep.subr.bf16.mxu1 %v2484_v15 }
 0x3b8   : > { %2134 = vmatpush3.bf16.msra.mxu1 %v2618_v16 }
 0x3b9   : > { %2147 = vmatprep.subr.bf16.mxu1 %v2484_v15 }
 0x486   : > { %v489_v40 = vpop.f32.mrb[0].mxu1 }
 0x487   : > { %v495_v41 = vadd.f32 %v489_v40, %v449_v39  ;;  %v2121_v42 = vpop.f32.mrb[1].mxu1 }
 0x488   : > { %v492_v43 = vpop.f32.mrb[2].mxu1 }
 0x489   : > { %2298 = vtanh.f32 %v495_v41  ;;  %v2122_v44 = vpop.f32.mrb[3].mxu1  ;;  %v2000_v46 = vmul.f32 -1.442695, %v495_v41 }
 0x48b   : > { %2300 = vpow2.f32 %v2000_v46  ;;  %v725_v46 = vld [vmem:[#allocation2 + $0x8] sm:$0x3] }
 0x493   : > { %v2299_v45 = vpop.eup %2298 }
 0x494   : > { %505 = vrot.lane.b32.xlu0 %v2299_v45, %s2487_s6 }
 0x495   : > { %v2301_v47 = vpop.eup %2300 }
 0x496   : > { %v499_v48 = vadd.f32 1.0, %v2301_v47 }
 0x498   : > { %2302 = vrcp.f32 %v499_v48 }
 0x4a2   : > { %v2303_v49 = vpop.eup %2302 }
 0x4a3   : > { %v503_v52 = vmul.f32 %v2303_v49, %v421_v33 }
 0x506   : > { %v506_v50 = vpop.permute.xlu0 %505 }
 0x507   : > { %v508_v51 = vmul.f32 %v2303_v49, %v506_v50 }
 0x509   : > { %510 = vrot.lane.b32.xlu1 %v508_v51, %s2488_s7 }
 0x57b   : > { %v511_v53 = vpop.permute.xlu1 %510 }
 0x57c   : > { %v513_v54 = vadd.f32 %v511_v53, %v503_v52 }
 0x57e   : > { %2304 = vtanh.f32 %v513_v54 }
 0x588   : > { %v2305_v55 = vpop.eup %2304 }
 0x589   : > { %516 = vrot.lane.b32.xlu0 %v2305_v55, %s2487_s6 }
 0x5fb   : > { %v517_v56 = vpop.permute.xlu0 %516 }
 0x5fc   : > { %v519_v57 = vmul.f32 %v2303_v49, %v517_v56 }
 0x5fe   : > { %v2653_v58 = vpack.c.bf16 %v519_v57, %v519_v57 }
 0x600   : > { %542 = vrot.lane.b32.xlu1 %v2653_v58, %s2488_s7 }
 0x672   : > { %v543_v59 = vpop.permute.xlu1 %542 }
 0x673   : > { %2128 = vmatmul.mubr.msk.bf16.vlgmr.msra.gmra.mrb[4].mxu0 %vm359_vm3, %v543_v59 }
 0x674   : > { %2140 = vmatpush3.bf16.msra.mxu0 %v2610_v14  ;;  %2143 = vmatprep.mubr.msk.bf16.mxu0 %vm2485_vm2, %v2484_v15 }
 0x675   : > { %2141 = vmatprep.subr.bf16.mxu0 %v2484_v15 }
 0x678   : > { %2142 = vmatpush3.bf16.msra.mxu0 %v2618_v16 }
 0x679   : > { %2155 = vmatprep.subr.bf16.mxu0 %v2484_v15 }
 0x746   : > { %v581_v61 = vpop.f32.mrb[4].mxu0 }
 0x747   : > { %v587_v62 = vadd.f32 %v581_v61, %v541_v60  ;;  %v2129_v63 = vpop.f32.mrb[5].mxu0 }
 0x748   : > { %v584_v0 = vpop.f32.mrb[6].mxu0 }
 0x749   : > { %2306 = vtanh.f32 %v587_v62  ;;  %v2130_v1 = vpop.f32.mrb[7].mxu0  ;;  %v2003_v7 = vmul.f32 -1.442695, %v587_v62 }
 0x74b   : > { %2308 = vpow2.f32 %v2003_v7 }
 0x753   : > { %v2307_v2 = vpop.eup %2306 }
 0x754   : > { %597 = vrot.lane.b32.xlu0 %v2307_v2, %s2487_s6 }
 0x755   : > { %v2309_v8 = vpop.eup %2308 }
 0x756   : > { %v591_v9 = vadd.f32 1.0, %v2309_v8  ;;  %v817_v8 = vld [vmem:[#allocation2 + $0xa] sm:$0x3] }
 0x758   : > { %2310 = vrcp.f32 %v591_v9 }
 0x762   : > { %v2311_v10 = vpop.eup %2310 }
 0x763   : > { %v595_v13 = vmul.f32 %v2311_v10, %v513_v54 }
 0x7c6   : > { %v598_v11 = vpop.permute.xlu0 %597 }
 0x7c7   : > { %v600_v12 = vmul.f32 %v2311_v10, %v598_v11 }
 0x7c9   : > { %602 = vrot.lane.b32.xlu1 %v600_v12, %s2488_s7 }
 0x83b   : > { %v603_v17 = vpop.permute.xlu1 %602 }
 0x83c   : > { %v605_v18 = vadd.f32 %v603_v17, %v595_v13 }
 0x83e   : > { %2312 = vtanh.f32 %v605_v18 }
 0x848   : > { %v2313_v19 = vpop.eup %2312 }
 0x849   : > { %608 = vrot.lane.b32.xlu0 %v2313_v19, %s2487_s6 }
 0x8bb   : > { %v609_v20 = vpop.permute.xlu0 %608 }
 0x8bc   : > { %v611_v21 = vmul.f32 %v2311_v10, %v609_v20 }
 0x8be   : > { %v2667_v22 = vpack.c.bf16 %v611_v21, %v611_v21 }
 0x8c0   : > { %634 = vrot.lane.b32.xlu1 %v2667_v22, %s2488_s7 }
 0x932   : > { %v635_v23 = vpop.permute.xlu1 %634 }
 0x933   : > { %2136 = vmatmul.mubr.msk.bf16.vlgmr.msra.gmra.mrb[4].mxu1 %vm359_vm3, %v635_v23 }
 0x934   : > { %2148 = vmatpush3.bf16.msra.mxu1 %v2610_v14  ;;  %2151 = vmatprep.mubr.msk.bf16.mxu1 %vm2485_vm2, %v2484_v15 }
 0x935   : > { %2149 = vmatprep.subr.bf16.mxu1 %v2484_v15 }
 0x938   : > { %2150 = vmatpush3.bf16.msra.mxu1 %v2618_v16 }
 0x939   : > { %2163 = vmatprep.subr.bf16.mxu1 %v2484_v15 }
 0xa06   : > { %v673_v25 = vpop.f32.mrb[4].mxu1 }
 0xa07   : > { %v679_v26 = vadd.f32 %v673_v25, %v633_v24  ;;  %v2137_v27 = vpop.f32.mrb[5].mxu1 }
 0xa08   : > { %v676_v28 = vpop.f32.mrb[6].mxu1 }
 0xa09   : > { %2314 = vtanh.f32 %v679_v26  ;;  %v2138_v29 = vpop.f32.mrb[7].mxu1  ;;  %v2006_v31 = vmul.f32 -1.442695, %v679_v26 }
 0xa0b   : > { %2316 = vpow2.f32 %v2006_v31 }
 0xa13   : > { %v2315_v30 = vpop.eup %2314 }
 0xa14   : > { %689 = vrot.lane.b32.xlu0 %v2315_v30, %s2487_s6  ;;  %v909_v30 = vld [vmem:[#allocation2 + $0xc] sm:$0x3] }
 0xa15   : > { %v2317_v32 = vpop.eup %2316 }
 0xa16   : > { %v683_v33 = vadd.f32 1.0, %v2317_v32 }
 0xa18   : > { %2318 = vrcp.f32 %v683_v33 }
 0xa22   : > { %v2319_v34 = vpop.eup %2318 }
 0xa23   : > { %v687_v38 = vmul.f32 %v2319_v34, %v605_v18 }
 0xa86   : > { %v690_v35 = vpop.permute.xlu0 %689 }
 0xa87   : > { %v692_v36 = vmul.f32 %v2319_v34, %v690_v35 }
 0xa89   : > { %694 = vrot.lane.b32.xlu1 %v692_v36, %s2488_s7 }
 0xafb   : > { %v695_v39 = vpop.permute.xlu1 %694 }
 0xafc   : > { %v697_v40 = vadd.f32 %v695_v39, %v687_v38 }
 0xafe   : > { %2320 = vtanh.f32 %v697_v40 }
 0xb08   : > { %v2321_v41 = vpop.eup %2320 }
 0xb09   : > { %700 = vrot.lane.b32.xlu0 %v2321_v41, %s2487_s6 }
 0xb7b   : > { %v701_v42 = vpop.permute.xlu0 %700 }
 0xb7c   : > { %v703_v43 = vmul.f32 %v2319_v34, %v701_v42 }
 0xb7e   : > { %v2681_v44 = vpack.c.bf16 %v703_v43, %v703_v43 }
 0xb80   : > { %726 = vrot.lane.b32.xlu1 %v2681_v44, %s2488_s7 }
 0xbf2   : > { %v727_v45 = vpop.permute.xlu1 %726 }
 0xbf3   : > { %2144 = vmatmul.mubr.msk.bf16.vlgmr.msra.gmra.mrb[8].mxu0 %vm359_vm3, %v727_v45 }
 0xbf4   : > { %2156 = vmatpush3.bf16.msra.mxu0 %v2610_v14  ;;  %2159 = vmatprep.mubr.msk.bf16.mxu0 %vm2485_vm2, %v2484_v15 }
 0xbf5   : > { %2157 = vmatprep.subr.bf16.mxu0 %v2484_v15 }
 0xbf8   : > { %2158 = vmatpush3.bf16.msra.mxu0 %v2618_v16 }
 0xcc6   : > { %v765_v47 = vpop.f32.mrb[8].mxu0 }
 0xcc7   : > { %v771_v48 = vadd.f32 %v765_v47, %v725_v46  ;;  %v2145_v49 = vpop.f32.mrb[9].mxu0 }
 0xcc8   : > { %v768_v50 = vpop.f32.mrb[10].mxu0 }
 0xcc9   : > { %2322 = vtanh.f32 %v771_v48  ;;  %v2146_v51 = vpop.f32.mrb[11].mxu0  ;;  %v2009_v53 = vmul.f32 -1.442695, %v771_v48 }
 0xccb   : > { %2324 = vpow2.f32 %v2009_v53  ;;  %v1001_v53 = vld [vmem:[#allocation2 + $0xe] sm:$0x3] }
 0xcd3   : > { %v2323_v52 = vpop.eup %2322 }
 0xcd4   : > { %781 = vrot.lane.b32.xlu0 %v2323_v52, %s2487_s6 }
 0xcd5   : > { %v2325_v54 = vpop.eup %2324 }
 0xcd6   : > { %v775_v55 = vadd.f32 1.0, %v2325_v54 }
 0xcd8   : > { %2326 = vrcp.f32 %v775_v55 }
 0xce2   : > { %v2327_v56 = vpop.eup %2326 }
 0xce3   : > { %v779_v60 = vmul.f32 %v2327_v56, %v697_v40 }
 0xd46   : > { %v782_v57 = vpop.permute.xlu0 %781 }
 0xd47   : > { %v784_v59 = vmul.f32 %v2327_v56, %v782_v57 }
 0xd49   : > { %786 = vrot.lane.b32.xlu1 %v784_v59, %s2488_s7 }
 0xdbb   : > { %v787_v61 = vpop.permute.xlu1 %786 }
 0xdbc   : > { %v789_v62 = vadd.f32 %v787_v61, %v779_v60 }
 0xdbe   : > { %2328 = vtanh.f32 %v789_v62 }
 0xdc8   : > { %v2329_v63 = vpop.eup %2328 }
 0xdc9   : > { %792 = vrot.lane.b32.xlu0 %v2329_v63, %s2487_s6 }
 0xe3b   : > { %v793_v0 = vpop.permute.xlu0 %792 }
 0xe3c   : > { %v795_v1 = vmul.f32 %v2327_v56, %v793_v0  ;;  %v2489_v0 = vmov 1966171168  }
 0xe3e   : > { %v2694_v2 = vpack.c.bf16 %v795_v1, %v795_v1  ;;  %v431_v1 = vunpack.c.l.s4 %v2489_v0 }
 0xe40   : > { %818 = vrot.lane.b32.xlu1 %v2694_v2, %s2488_s7 }
 0xeb2   : > { %v819_v7 = vpop.permute.xlu1 %818 }
 0xeb3   : > { %2152 = vmatmul.mubr.msk.bf16.vlgmr.msra.gmra.mrb[8].mxu1 %vm359_vm3, %v819_v7  ;;  %v433_v7 = vlaneseq }
 0xeb4   : > { %2164 = vmatpush3.bf16.msra.mxu1 %v2610_v14  ;;  %2167 = vmatprep.mubr.msk.bf16.mxu1 %vm2485_vm2, %v2484_v15 }
 0xeb5   : > { %2165 = vmatprep.subr.bf16.mxu1 %v2484_v15 }
 0xeb8   : > { %2166 = vmatpush3.bf16.msra.mxu1 %v2618_v16 }
 0xf86   : > { %v857_v9 = vpop.f32.mrb[8].mxu1 }
 0xf87   : > { %v863_v10 = vadd.f32 %v857_v9, %v817_v8  ;;  %v2153_v11 = vpop.f32.mrb[9].mxu1  ;;  %v432_v8 = vunpack.c.0.s8 %v431_v1  ;;  %v434_v9 = vshrl.u32 %v433_v7, 7 }
 0xf88   : > { %v860_v12 = vpop.f32.mrb[10].mxu1 }
 0xf89   : > { %2330 = vtanh.f32 %v863_v10  ;;  %v2154_v13 = vpop.f32.mrb[11].mxu1  ;;  %v2012_v18 = vmul.f32 -1.442695, %v863_v10  ;;  %v435_v10 = vsub.s32 %v432_v8, %v434_v9 }
 0xf8b   : > { %2332 = vpow2.f32 %v2012_v18  ;;  %v436_v13 = vrot.slane %v2639_v37, %v435_v10  ;;  %v620_v18 = vrot.slane %v2667_v22, %v435_v10 }
 0xf93   : > { %v2331_v17 = vpop.eup %2330 }
 0xf94   : > { %873 = vrot.lane.b32.xlu0 %v2331_v17, %s2487_s6 }
 0xf95   : > { %v2333_v14 = vpop.eup %2332 }
 0xf96   : > { %v867_v19 = vadd.f32 1.0, %v2333_v14  ;;  %v443_v14 = vrot.slane %v436_v13, %v435_v10 }
 0xf98   : > { %2334 = vrcp.f32 %v867_v19  ;;  %v804_v19 = vrot.slane %v2694_v2, %v435_v10 }
 0xfa2   : > { %v2335_v20 = vpop.eup %2334 }
 0xfa3   : > { %v871_v16 = vmul.f32 %v2335_v20, %v789_v62 }
0x1006   : > { %v874_v21 = vpop.permute.xlu0 %873 }
0x1007   : > { %v876_v15 = vmul.f32 %v2335_v20, %v874_v21 }
0x1009   : > { %878 = vrot.lane.b32.xlu1 %v876_v15, %s2488_s7  ;;  %v811_v15 = vrot.slane %v804_v19, %v435_v10 }
0x107b   : > { %v879_v23 = vpop.permute.xlu1 %878 }
0x107c   : > { %v881_v24 = vadd.f32 %v879_v23, %v871_v16 }
0x107e   : > { %2336 = vtanh.f32 %v881_v24 }
0x1088   : > { %v2337_v25 = vpop.eup %2336 }
0x1089   : > { %884 = vrot.lane.b32.xlu0 %v2337_v25, %s2487_s6  ;;  %v528_v25 = vrot.slane %v2653_v58, %v435_v10 }
0x10fb   : > { %v885_v26 = vpop.permute.xlu0 %884 }
0x10fc   : > { %v887_v27 = vmul.f32 %v2335_v20, %v885_v26  ;;  %v627_v20 = vrot.slane %v620_v18, %v435_v10 }
0x10fe   : > { %v2707_v28 = vpack.c.bf16 %v887_v27, %v887_v27 }
0x1100   : > { %910 = vrot.lane.b32.xlu1 %v2707_v28, %s2488_s7 }
0x1172   : > { %v911_v29 = vpop.permute.xlu1 %910 }
0x1173   : > { %2160 = vmatmul.mubr.msk.bf16.vlgmr.msra.gmra.mrb[12].mxu0 %vm359_vm3, %v911_v29  ;;  %v712_v29 = vrot.slane %v2681_v44, %v435_v10 }
0x1246   : > { %v949_v31 = vpop.f32.mrb[12].mxu0 }
0x1247   : > { %v955_v32 = vadd.f32 %v949_v31, %v909_v30  ;;  %v2161_v33 = vpop.f32.mrb[13].mxu0  ;;  %v535_v31 = vrot.slane %v528_v25, %v435_v10 }
0x1248   : > { %v952_v34 = vpop.f32.mrb[14].mxu0  ;;  %v719_v33 = vrot.slane %v712_v29, %v435_v10 }
0x1249   : > { %2338 = vtanh.f32 %v955_v32  ;;  %v2162_v35 = vpop.f32.mrb[15].mxu0  ;;  %v2015_v38 = vmul.f32 -1.442695, %v955_v32  ;;  %v896_v32 = vrot.slane %v2707_v28, %v435_v10 }
0x124b   : > { %2340 = vpow2.f32 %v2015_v38  ;;  %v903_v58 = vrot.slane %v896_v32, %v435_v10 }
0x1253   : > { %v2339_v36 = vpop.eup %2338 }
0x1254   : > { %965 = vrot.lane.b32.xlu0 %v2339_v36, %s2487_s6 }
0x1255   : > { %v2341_v39 = vpop.eup %2340 }
0x1256   : > { %v959_v40 = vadd.f32 1.0, %v2341_v39 }
0x1258   : > { %2342 = vrcp.f32 %v959_v40 }
0x1262   : > { %v2343_v41 = vpop.eup %2342 }
0x1263   : > { %v963_v45 = vmul.f32 %v2343_v41, %v881_v24 }
0x12c6   : > { %v966_v42 = vpop.permute.xlu0 %965 }
0x12c7   : > { %v968_v43 = vmul.f32 %v2343_v41, %v966_v42 }
0x12c9   : > { %970 = vrot.lane.b32.xlu1 %v968_v43, %s2488_s7 }
0x133b   : > { %v971_v46 = vpop.permute.xlu1 %970 }
0x133c   : > { %v973_v47 = vadd.f32 %v971_v46, %v963_v45 }
0x133e   : > { %2344 = vtanh.f32 %v973_v47 }
0x1348   : > { %v2345_v48 = vpop.eup %2344 }
0x1349   : > { %976 = vrot.lane.b32.xlu0 %v2345_v48, %s2487_s6 }
0x13bb   : > { %v977_v49 = vpop.permute.xlu0 %976 }
0x13bc   : > { %v979_v50 = vmul.f32 %v2343_v41, %v977_v49 }
0x13be   : > { %v980_v51 = vpack.c.bf16 %v979_v50, %v979_v50 }
0x13c0   : > { %1002 = vrot.lane.b32.xlu1 %v980_v51, %s2488_s7  ;;  %v988_v21 = vrot.slane %v980_v51, %v435_v10 }
0x13c2   : > { %v995_v37 = vrot.slane %v988_v21, %v435_v10 }
0x1432   : > { %v1003_v52 = vpop.permute.xlu1 %1002 }
0x1433   : > { %2168 = vmatmul.mubr.msk.bf16.vlgmr.msra.gmra.mrb[12].mxu1 %vm359_vm3, %v1003_v52 }
0x1506   : > { %v1041_v54 = vpop.f32.mrb[12].mxu1 }
0x1507   : > { %v1047_v55 = vadd.f32 %v1041_v54, %v1001_v53  ;;  %v2169_v56 = vpop.f32.mrb[13].mxu1 }
0x1508   : > { %v1044_v57 = vpop.f32.mrb[14].mxu1 }
0x1509   : > { %2346 = vtanh.f32 %v1047_v55  ;;  %v2170_v59 = vpop.f32.mrb[15].mxu1  ;;  %v2018_v61 = vmul.f32 -1.442695, %v1047_v55 }
0x150b   : > { %2348 = vpow2.f32 %v2018_v61 }
0x1513   : > { %v2347_v60 = vpop.eup %2346 }
0x1514   : > { %1057 = vrot.lane.b32.xlu0 %v2347_v60, %s2487_s6 }
0x1515   : > { %v2349_v62 = vpop.eup %2348 }
0x1516   : > { %v1051_v63 = vadd.f32 1.0, %v2349_v62 }
0x1518   : > { %2350 = vrcp.f32 %v1051_v63 }
0x1522   : > { %v2351_v11 = vpop.eup %2350 }
0x1523   : > { %v1055_v16 = vmul.f32 %v2351_v11, %v973_v47 }
0x1586   : > { %v1058_v12 = vpop.permute.xlu0 %1057 }
0x1587   : > { %v1060_v17 = vmul.f32 %v2351_v11, %v1058_v12 }
0x1589   : > { %1062 = vrot.lane.b32.xlu1 %v1060_v17, %s2488_s7 }
0x158d   : > { %444 = vrot.lane.b32.xlu1 %v443_v14, %s2488_s7 }
0x1591   : > { %628 = vrot.lane.b32.xlu1 %v627_v20, %s2488_s7 }
0x1595   : > { %812 = vrot.lane.b32.xlu1 %v811_v15, %s2488_s7 }
0x1599   : > { %996 = vrot.lane.b32.xlu1 %v995_v37, %s2488_s7 }
0x15fb   : > { %v1063_v22 = vpop.permute.xlu1 %1062 }
0x15fc   : > { %v1065_v23 = vadd.f32 %v1063_v22, %v1055_v16 }
0x15fe   : > { %2352 = vtanh.f32 %v1065_v23 }
0x15ff   : > { %v445_v24 = vpop.permute.xlu1 %444 }
0x1600   : > { %448 = vst.msk [vmem:[%s2592_s26] sm:$0x1] %vm447_vm4, %v445_v24 }
0x1603   : > { %v629_v2 = vpop.permute.xlu1 %628 }
0x1604   : > { %2004 = vst.msk [vmem:[%s2592_s26 + $0x2] sm:$0x1] %vm447_vm4, %v629_v2 }
0x1607   : > { %v813_v26 = vpop.permute.xlu1 %812 }
0x1608   : > { %v2353_v27 = vpop.eup %2352  ;;  %2010 = vst.msk [vmem:[%s2592_s26 + $0x4] sm:$0x1] %vm447_vm4, %v813_v26 }
0x1609   : > { %1068 = vrot.lane.b32.xlu0 %v2353_v27, %s2487_s6 }
0x160b   : > { %v997_v30 = vpop.permute.xlu1 %996 }
0x160c   : > { %2016 = vst.msk [vmem:[%s2592_s26 + $0x6] sm:$0x1] %vm447_vm4, %v997_v30 }
0x160d   : > { %536 = vrot.lane.b32.xlu0 %v535_v31, %s2488_s7 }
0x1611   : > { %720 = vrot.lane.b32.xlu0 %v719_v33, %s2488_s7 }
0x1615   : > { %904 = vrot.lane.b32.xlu0 %v903_v58, %s2488_s7 }
0x167b   : > { %v1069_v34 = vpop.permute.xlu0 %1068 }
0x167c   : > { %v1071_v44 = vmul.f32 %v2351_v11, %v1069_v34 }
0x167e   : > { %v1072_v35 = vpack.c.bf16 %v1071_v44, %v1071_v44  ;;  %1094 = vrot.lane.b32.xlu1 %v1071_v44, %s2488_s7 }
0x167f   : > { %v537_v36 = vpop.permute.xlu0 %536 }
0x1680   : > { %v1080_v38 = vrot.slane %v1072_v35, %v435_v10  ;;  %2001 = vst.msk [vmem:[%s2592_s26 + $0x1] sm:$0x1] %vm447_vm4, %v537_v36 }
0x1682   : > { %v1087_v39 = vrot.slane %v1080_v38, %v435_v10 }
0x1683   : > { %v721_v28 = vpop.permute.xlu0 %720 }
0x1684   : > { %2007 = vst.msk [vmem:[%s2592_s26 + $0x3] sm:$0x1] %vm447_vm4, %v721_v28  ;;  %1088 = vrot.lane.b32.xlu0 %v1087_v39, %s2488_s7 }
0x1687   : > { %v905_v40 = vpop.permute.xlu0 %904 }
0x1688   : > { %2013 = vst.msk [vmem:[%s2592_s26 + $0x5] sm:$0x1] %vm447_vm4, %v905_v40 }
0x16f0   : > { %v1095_v41 = vpop.permute.xlu1 %1094 }
0x16f1   : > { %1098 = vst.msk [vmem:[%s2605_s8] sm:$0x3] %vm1097_vm5, %v1095_v41 }
0x16f6   : > { %v1089_v42 = vpop.permute.xlu0 %1088 }
0x16f7   : > { %2019 = vst.msk [vmem:[%s2592_s26 + $0x7] sm:$0x1] %vm447_vm4, %v1089_v42 }
0x16f8 PF: > { %p2020_p12 = scmp.ne.s32.totalorder %s2548_s22, 1 }
0x16f9   : > { %v2755_v43 = vcombine.low (!%p2020_p12), %v2594_v3, %v2596_v4  ;;  %v2490_v45 = vmov (!%p2020_p12), 0.0   ;;  %vm2491_vm6 = vmmov (!%p2020_p12), 0   ;;  %v2763_v46 = vcombine.low (!%p2020_p12), %v2598_v5, %v2600_v6  ;;  %s2493_s12 = smov (!%p2020_p12), 64   ;;  %s2494_s13 = smov (!%p2020_p12), 32  }
0x16fa   : > { %1102 = sbr.rel (%p2020_p12) target bundleno = 11527 (0x2d07), region = 44  ;;  %2171 = vmatprep.subr.bf16.mxu0 (!%p2020_p12), %v2490_v45  ;;  %2175 = vmatprep.mubr.msk.bf16.mxu0 (!%p2020_p12), %vm2491_vm6, %v2490_v45  ;;  %v2492_v3 = vmov (!%p2020_p12), 0   ;;  %vm1116_vm7 = vcmask (!%p2020_p12), 261120   ;;  %vm1205_vm8 = vcmask (!%p2020_p12), 253952   ;;  %vm1211_vm9 = vcmask (!%p2020_p12), 254976  }
0x16fb   : > { %2172 = vmatpush3.bf16.msra.mxu0 (!%p2020_p12), %v2755_v43  ;;  %2179 = vmatprep.subr.bf16.mxu1 (!%p2020_p12), %v2490_v45 }
0x16fc   : > { %2173 = vmatprep.subr.bf16.mxu0 (!%p2020_p12), %v2490_v45  ;;  %2180 = vmatpush3.bf16.msra.mxu1 (!%p2020_p12), %v2755_v43 }
0x16fd   : > { %2181 = vmatprep.subr.bf16.mxu1 (!%p2020_p12), %v2490_v45  ;;  %2183 = vmatprep.mubr.msk.bf16.mxu1 (!%p2020_p12), %vm2491_vm6, %v2490_v45 }
0x16fe   : > { %v1103_v4 = vld [vmem:[#allocation2 + $0xe] sm:$0x3] (!%p2020_p12)  ;;  %v1213_v7 = vld [vmem:[#allocation2 + $0xc] sm:$0x3] (!%p2020_p12)  ;;  %v1305_v26 = vld [vmem:[#allocation2 + $0xa] sm:$0x3] (!%p2020_p12) }
0x16ff   : > { %2174 = vmatpush3.bf16.msra.mxu0 (!%p2020_p12), %v2763_v46 }
0x1700   : > { %2182 = vmatpush3.bf16.msra.mxu1 (!%p2020_p12), %v2763_v46  ;;  %2187 = vmatprep.subr.bf16.mxu0 (!%p2020_p12), %v2490_v45 }
0x1701   : > { %2195 = vmatprep.subr.bf16.mxu1 %v2490_v45 }
0x1702   : > { %2176 = vmatmul.mubr.bf16.vlgmr.msra.gmra.mrb[0].mxu0 %v2492_v3 }
0x1703   : > { %2188 = vmatpush3.bf16.msra.mxu0 %v2755_v43  ;;  %2191 = vmatprep.mubr.msk.bf16.mxu0 %vm2491_vm6, %v2490_v45 }
0x1704   : > { %2189 = vmatprep.subr.bf16.mxu0 %v2490_v45 }
0x1707   : > { %2190 = vmatpush3.bf16.msra.mxu0 %v2763_v46 }
0x1708   : > { %2203 = vmatprep.subr.bf16.mxu0 %v2490_v45 }
0x17d5   : > { %v1154_v5 = vpop.f32.mrb[0].mxu0 }
0x17d6   : > { %v1160_v6 = vadd.f32 %v1154_v5, %v1103_v4  ;;  %v2177_v47 = vpop.f32.mrb[1].mxu0 }
0x17d7   : > { %v1157_v48 = vpop.f32.mrb[2].mxu0 }
0x17d8   : > { %2354 = vtanh.f32 %v1160_v6  ;;  %v2178_v49 = vpop.f32.mrb[3].mxu0  ;;  %v2023_v51 = vmul.f32 -1.442695, %v1160_v6  ;;  %v1397_v6 = vld [vmem:[#allocation2 + $0x8] sm:$0x3] }
0x17da   : > { %2356 = vpow2.f32 %v2023_v51 }
0x17e2   : > { %v2355_v50 = vpop.eup %2354 }
0x17e3   : > { %1170 = vrot.lane.b32.xlu0 %v2355_v50, %s2493_s12 }
0x17e4   : > { %v2357_v52 = vpop.eup %2356 }
0x17e5   : > { %v1164_v53 = vadd.f32 1.0, %v2357_v52 }
0x17e7   : > { %2358 = vrcp.f32 %v1164_v53 }
0x17f1   : > { %v2359_v54 = vpop.eup %2358 }
0x17f2   : > { %v1168_v57 = vmul.f32 0.0, %v2359_v54 }
0x1855   : > { %v1171_v55 = vpop.permute.xlu0 %1170 }
0x1856   : > { %v1173_v56 = vmul.f32 %v2359_v54, %v1171_v55 }
0x1858   : > { %1175 = vrot.lane.b32.xlu0 %v1173_v56, %s2494_s13 }
0x18ca   : > { %v1176_v59 = vpop.permute.xlu0 %1175 }
0x18cb   : > { %v1178_v60 = vadd.f32 %v1176_v59, %v1168_v57 }
0x18cd   : > { %2360 = vtanh.f32 %v1178_v60 }
0x18d7   : > { %v2361_v61 = vpop.eup %2360 }
0x18d8   : > { %1181 = vrot.lane.b32.xlu1 %v2361_v61, %s2493_s12 }
0x194a   : > { %v1182_v62 = vpop.permute.xlu1 %1181 }
0x194b   : > { %v2784_v63 = vmul.f32 %v2359_v54, %v1182_v62 }
0x194d   : > { %v2788_v0 = vpack.c.bf16 %v2784_v63, %v2784_v63 }
0x194f   : > { %1214 = vrot.lane.b32.xlu1 %v2788_v0, %s2494_s13 }
0x19c1   : > { %v1215_v1 = vpop.permute.xlu1 %1214 }
0x19c2   : > { %2184 = vmatmul.mubr.msk.bf16.vlgmr.msra.gmra.mrb[0].mxu1 %vm1116_vm7, %v1215_v1 }
0x19c3   : > { %2196 = vmatpush3.bf16.msra.mxu1 %v2755_v43  ;;  %2199 = vmatprep.mubr.msk.bf16.mxu1 %vm2491_vm6, %v2490_v45 }
0x19c4   : > { %2197 = vmatprep.subr.bf16.mxu1 %v2490_v45 }
0x19c7   : > { %2198 = vmatpush3.bf16.msra.mxu1 %v2763_v46 }
0x19c8   : > { %2211 = vmatprep.subr.bf16.mxu1 %v2490_v45 }
0x1a95   : > { %v1253_v8 = vpop.f32.mrb[0].mxu1 }
0x1a96   : > { %v1259_v9 = vadd.f32 %v1253_v8, %v1213_v7  ;;  %v2185_v10 = vpop.f32.mrb[1].mxu1 }
0x1a97   : > { %v1256_v11 = vpop.f32.mrb[2].mxu1 }
0x1a98   : > { %2362 = vtanh.f32 %v1259_v9  ;;  %v2186_v12 = vpop.f32.mrb[3].mxu1  ;;  %v2026_v17 = vmul.f32 -1.442695, %v1259_v9  ;;  %v1489_v11 = vld [vmem:[#allocation2 + $0x6] sm:$0x3] }
0x1a9a   : > { %2364 = vpow2.f32 %v2026_v17 }
0x1aa2   : > { %v2363_v13 = vpop.eup %2362 }
0x1aa3   : > { %1269 = vrot.lane.b32.xlu0 %v2363_v13, %s2493_s12 }
0x1aa4   : > { %v2365_v18 = vpop.eup %2364 }
0x1aa5   : > { %v1263_v14 = vadd.f32 1.0, %v2365_v18 }
0x1aa7   : > { %2366 = vrcp.f32 %v1263_v14 }
0x1ab1   : > { %v2367_v19 = vpop.eup %2366 }
0x1ab2   : > { %v1267_v15 = vmul.f32 %v2367_v19, %v1178_v60 }
0x1b15   : > { %v1270_v20 = vpop.permute.xlu0 %1269 }
0x1b16   : > { %v1272_v21 = vmul.f32 %v2367_v19, %v1270_v20 }
0x1b18   : > { %1274 = vrot.lane.b32.xlu1 %v1272_v21, %s2494_s13 }
0x1b8a   : > { %v1275_v37 = vpop.permute.xlu1 %1274 }
0x1b8b   : > { %v1277_v16 = vadd.f32 %v1275_v37, %v1267_v15 }
0x1b8d   : > { %2368 = vtanh.f32 %v1277_v16 }
0x1b97   : > { %v2369_v22 = vpop.eup %2368 }
0x1b98   : > { %1280 = vrot.lane.b32.xlu0 %v2369_v22, %s2493_s12 }
0x1c0a   : > { %v1281_v23 = vpop.permute.xlu0 %1280 }
0x1c0b   : > { %v1283_v24 = vmul.f32 %v2367_v19, %v1281_v23 }
0x1c0d   : > { %v2802_v2 = vpack.c.bf16 %v1283_v24, %v1283_v24 }
0x1c0f   : > { %1306 = vrot.lane.b32.xlu1 %v2802_v2, %s2494_s13 }
0x1c81   : > { %v1307_v25 = vpop.permute.xlu1 %1306 }
0x1c82   : > { %2192 = vmatmul.mubr.msk.bf16.vlgmr.msra.gmra.mrb[4].mxu0 %vm1116_vm7, %v1307_v25 }
0x1c83   : > { %2204 = vmatpush3.bf16.msra.mxu0 %v2755_v43  ;;  %2207 = vmatprep.mubr.msk.bf16.mxu0 %vm2491_vm6, %v2490_v45 }
0x1c84   : > { %2205 = vmatprep.subr.bf16.mxu0 %v2490_v45 }
0x1c87   : > { %2206 = vmatpush3.bf16.msra.mxu0 %v2763_v46 }
0x1c88   : > { %2219 = vmatprep.subr.bf16.mxu0 %v2490_v45 }
0x1d55   : > { %v1345_v27 = vpop.f32.mrb[4].mxu0 }
0x1d56   : > { %v1351_v29 = vadd.f32 %v1345_v27, %v1305_v26  ;;  %v2193_v30 = vpop.f32.mrb[5].mxu0 }
0x1d57   : > { %v1348_v31 = vpop.f32.mrb[6].mxu0 }
0x1d58   : > { %2370 = vtanh.f32 %v1351_v29  ;;  %v2194_v32 = vpop.f32.mrb[7].mxu0  ;;  %v2029_v58 = vmul.f32 -1.442695, %v1351_v29 }
0x1d59   : > { %v1581_v32 = vld [vmem:[#allocation2 + $0x4] sm:$0x3] }
0x1d5a   : > { %2372 = vpow2.f32 %v2029_v58 }
0x1d62   : > { %v2371_v33 = vpop.eup %2370 }
0x1d63   : > { %1361 = vrot.lane.b32.xlu0 %v2371_v33, %s2493_s12 }
0x1d64   : > { %v2373_v34 = vpop.eup %2372 }
0x1d65   : > { %v1355_v44 = vadd.f32 1.0, %v2373_v34 }
0x1d67   : > { %2374 = vrcp.f32 %v1355_v44 }
0x1d71   : > { %v2375_v35 = vpop.eup %2374 }
0x1d72   : > { %v1359_v39 = vmul.f32 %v2375_v35, %v1277_v16 }
0x1dd5   : > { %v1362_v36 = vpop.permute.xlu0 %1361 }
0x1dd6   : > { %v1364_v38 = vmul.f32 %v2375_v35, %v1362_v36 }
0x1dd8   : > { %1366 = vrot.lane.b32.xlu1 %v1364_v38, %s2494_s13 }
0x1e4a   : > { %v1367_v28 = vpop.permute.xlu1 %1366 }
0x1e4b   : > { %v1369_v40 = vadd.f32 %v1367_v28, %v1359_v39 }
0x1e4d   : > { %2376 = vtanh.f32 %v1369_v40 }
0x1e57   : > { %v2377_v41 = vpop.eup %2376 }
0x1e58   : > { %1372 = vrot.lane.b32.xlu0 %v2377_v41, %s2493_s12 }
0x1eca   : > { %v1373_v42 = vpop.permute.xlu0 %1372 }
0x1ecb   : > { %v1375_v3 = vmul.f32 %v2375_v35, %v1373_v42 }
0x1ecd   : > { %v2816_v4 = vpack.c.bf16 %v1375_v3, %v1375_v3 }
0x1ecf   : > { %1398 = vrot.lane.b32.xlu1 %v2816_v4, %s2494_s13 }
0x1f41   : > { %v1399_v5 = vpop.permute.xlu1 %1398 }
0x1f42   : > { %2200 = vmatmul.mubr.msk.bf16.vlgmr.msra.gmra.mrb[4].mxu1 %vm1116_vm7, %v1399_v5 }
0x1f43   : > { %2212 = vmatpush3.bf16.msra.mxu1 %v2755_v43  ;;  %2215 = vmatprep.mubr.msk.bf16.mxu1 %vm2491_vm6, %v2490_v45 }
0x1f44   : > { %2213 = vmatprep.subr.bf16.mxu1 %v2490_v45 }
0x1f47   : > { %2214 = vmatpush3.bf16.msra.mxu1 %v2763_v46 }
0x1f48   : > { %2227 = vmatprep.subr.bf16.mxu1 %v2490_v45 }
0x2015   : > { %v1437_v47 = vpop.f32.mrb[4].mxu1 }
0x2016   : > { %v1443_v48 = vadd.f32 %v1437_v47, %v1397_v6  ;;  %v2201_v49 = vpop.f32.mrb[5].mxu1 }
0x2017   : > { %v1440_v50 = vpop.f32.mrb[6].mxu1  ;;  %v1673_v49 = vld [vmem:[#allocation2 + $0x2] sm:$0x3] }
0x2018   : > { %2378 = vtanh.f32 %v1443_v48  ;;  %v2202_v51 = vpop.f32.mrb[7].mxu1  ;;  %v2032_v53 = vmul.f32 -1.442695, %v1443_v48 }
0x201a   : > { %2380 = vpow2.f32 %v2032_v53 }
0x2022   : > { %v2379_v52 = vpop.eup %2378 }
0x2023   : > { %1453 = vrot.lane.b32.xlu0 %v2379_v52, %s2493_s12 }
0x2024   : > { %v2381_v54 = vpop.eup %2380 }
0x2025   : > { %v1447_v55 = vadd.f32 1.0, %v2381_v54 }
0x2027   : > { %2382 = vrcp.f32 %v1447_v55 }
0x2031   : > { %v2383_v56 = vpop.eup %2382 }
0x2032   : > { %v1451_v60 = vmul.f32 %v2383_v56, %v1369_v40 }
0x2095   : > { %v1454_v57 = vpop.permute.xlu0 %1453 }
0x2096   : > { %v1456_v59 = vmul.f32 %v2383_v56, %v1454_v57 }
0x2098   : > { %1458 = vrot.lane.b32.xlu1 %v1456_v59, %s2494_s13 }
0x210a   : > { %v1459_v61 = vpop.permute.xlu1 %1458 }
0x210b   : > { %v1461_v62 = vadd.f32 %v1459_v61, %v1451_v60 }
0x210d   : > { %2384 = vtanh.f32 %v1461_v62 }
0x2117   : > { %v2385_v1 = vpop.eup %2384 }
0x2118   : > { %1464 = vrot.lane.b32.xlu0 %v2385_v1, %s2493_s12 }
0x218a   : > { %v1465_v7 = vpop.permute.xlu0 %1464 }
0x218b   : > { %v1467_v8 = vmul.f32 %v2383_v56, %v1465_v7 }
0x218d   : > { %v2830_v9 = vpack.c.bf16 %v1467_v8, %v1467_v8 }
0x218f   : > { %1490 = vrot.lane.b32.xlu1 %v2830_v9, %s2494_s13 }
0x2201   : > { %v1491_v10 = vpop.permute.xlu1 %1490 }
0x2202   : > { %2208 = vmatmul.mubr.msk.bf16.vlgmr.msra.gmra.mrb[8].mxu0 %vm1116_vm7, %v1491_v10 }
0x2203   : > { %2220 = vmatpush3.bf16.msra.mxu0 %v2755_v43  ;;  %2223 = vmatprep.mubr.msk.bf16.mxu0 %vm2491_vm6, %v2490_v45 }
0x2204   : > { %2221 = vmatprep.subr.bf16.mxu0 %v2490_v45 }
0x2207   : > { %2222 = vmatpush3.bf16.msra.mxu0 %v2763_v46 }
0x22d5   : > { %v1529_v12 = vpop.f32.mrb[8].mxu0 }
0x22d6   : > { %v1535_v13 = vadd.f32 %v1529_v12, %v1489_v11  ;;  %v2209_v17 = vpop.f32.mrb[9].mxu0 }
0x22d7   : > { %v1532_v18 = vpop.f32.mrb[10].mxu0 }
0x22d8   : > { %2386 = vtanh.f32 %v1535_v13  ;;  %v2210_v14 = vpop.f32.mrb[11].mxu0  ;;  %v2035_v20 = vmul.f32 -1.442695, %v1535_v13  ;;  %v1765_v18 = vld [vmem:[#allocation2] sm:$0x3] }
0x22da   : > { %2388 = vpow2.f32 %v2035_v20 }
0x22e2   : > { %v2387_v19 = vpop.eup %2386 }
0x22e3   : > { %1545 = vrot.lane.b32.xlu0 %v2387_v19, %s2493_s12 }
0x22e4   : > { %v2389_v21 = vpop.eup %2388 }
0x22e5   : > { %v1539_v15 = vadd.f32 1.0, %v2389_v21 }
0x22e7   : > { %2390 = vrcp.f32 %v1539_v15 }
0x22f1   : > { %v2391_v37 = vpop.eup %2390 }
0x22f2   : > { %v1543_v23 = vmul.f32 %v2391_v37, %v1461_v62 }
0x2355   : > { %v1546_v16 = vpop.permute.xlu0 %1545 }
0x2356   : > { %v1548_v22 = vmul.f32 %v2391_v37, %v1546_v16 }
0x2358   : > { %1550 = vrot.lane.b32.xlu1 %v1548_v22, %s2494_s13 }
0x23ca   : > { %v1551_v24 = vpop.permute.xlu1 %1550 }
0x23cb   : > { %v1553_v25 = vadd.f32 %v1551_v24, %v1543_v23  ;;  %v2495_v24 = vmov 1966171168  }
0x23cd   : > { %2392 = vtanh.f32 %v1553_v25 }
0x23d7   : > { %v2393_v26 = vpop.eup %2392 }
0x23d8   : > { %1556 = vrot.lane.b32.xlu0 %v2393_v26, %s2493_s12  ;;  %v1190_v26 = vlaneseq }
0x244a   : > { %v1557_v27 = vpop.permute.xlu0 %1556 }
0x244b   : > { %v1559_v29 = vmul.f32 %v2391_v37, %v1557_v27 }
0x244d   : > { %v2843_v30 = vpack.c.bf16 %v1559_v29, %v1559_v29  ;;  %v1191_v29 = vshrl.u32 %v1190_v26, 7 }
0x244f   : > { %1582 = vrot.lane.b32.xlu1 %v2843_v30, %s2494_s13 }
0x24c1   : > { %v1583_v31 = vpop.permute.xlu1 %1582 }
0x24c2   : > { %2216 = vmatmul.mubr.msk.bf16.vlgmr.msra.gmra.mrb[8].mxu1 %vm1116_vm7, %v1583_v31 }
0x24c3   : > { %2228 = vmatpush3.bf16.msra.mxu1 %v2755_v43  ;;  %2231 = vmatprep.mubr.msk.bf16.mxu1 %vm2491_vm6, %v2490_v45 }
0x24c4   : > { %2229 = vmatprep.subr.bf16.mxu1 %v2490_v45 }
0x24c7   : > { %2230 = vmatpush3.bf16.msra.mxu1 %v2763_v46 }
0x2595   : > { %v1621_v33 = vpop.f32.mrb[8].mxu1 }
0x2596   : > { %v1627_v58 = vadd.f32 %v1621_v33, %v1581_v32  ;;  %v2217_v34 = vpop.f32.mrb[9].mxu1 }
0x2597   : > { %v1624_v44 = vpop.f32.mrb[10].mxu1 }
0x2598   : > { %2394 = vtanh.f32 %v1627_v58  ;;  %v2218_v35 = vpop.f32.mrb[11].mxu1  ;;  %v2038_v38 = vmul.f32 -1.442695, %v1627_v58 }
0x259a   : > { %2396 = vpow2.f32 %v2038_v38 }
0x25a2   : > { %v2395_v36 = vpop.eup %2394 }
0x25a3   : > { %1637 = vrot.lane.b32.xlu0 %v2395_v36, %s2493_s12 }
0x25a4   : > { %v2397_v43 = vpop.eup %2396 }
0x25a5   : > { %v1631_v39 = vadd.f32 1.0, %v2397_v43 }
0x25a7   : > { %2398 = vrcp.f32 %v1631_v39 }
0x25b1   : > { %v2399_v28 = vpop.eup %2398 }
0x25b2   : > { %v1635_v46 = vmul.f32 %v2399_v28, %v1553_v25  ;;  %v1188_v25 = vunpack.c.l.s4 %v2495_v24 }
0x25b4   : > { %v1189_v27 = vunpack.c.0.s8 %v1188_v25 }
0x25b6   : > { %v1192_v31 = vsub.s32 %v1189_v27, %v1191_v29 }
0x25b8   : > { %v1193_v58 = vrot.slane %v2788_v0, %v1192_v31  ;;  %v1292_v44 = vrot.slane %v2802_v2, %v1192_v31  ;;  %v1476_v36 = vrot.slane %v2830_v9, %v1192_v31 }
0x25ba   : > { %v1200_v35 = vrot.slane %v1193_v58, %v1192_v31  ;;  %v1299_v38 = vrot.slane %v1292_v44, %v1192_v31  ;;  %v1483_v39 = vrot.slane %v1476_v36, %v1192_v31 }
0x2615   : > { %v1638_v40 = vpop.permute.xlu0 %1637 }
0x2616   : > { %v1640_v45 = vmul.f32 %v2399_v28, %v1638_v40 }
0x2618   : > { %1642 = vrot.lane.b32.xlu1 %v1640_v45, %s2494_s13 }
0x268a   : > { %v1643_v41 = vpop.permute.xlu1 %1642 }
0x268b   : > { %v1645_v42 = vadd.f32 %v1643_v41, %v1635_v46 }
0x268d   : > { %2400 = vtanh.f32 %v1645_v42 }
0x2697   : > { %v2401_v3 = vpop.eup %2400 }
0x2698   : > { %1648 = vrot.lane.b32.xlu0 %v2401_v3, %s2493_s12 }
0x270a   : > { %v1649_v5 = vpop.permute.xlu0 %1648 }
0x270b   : > { %v1651_v6 = vmul.f32 %v2399_v28, %v1649_v5  ;;  %v1568_v5 = vrot.slane %v2843_v30, %v1192_v31 }
0x270d   : > { %v2856_v47 = vpack.c.bf16 %v1651_v6, %v1651_v6 }
0x270f   : > { %1674 = vrot.lane.b32.xlu1 %v2856_v47, %s2494_s13  ;;  %v1660_v43 = vrot.slane %v2856_v47, %v1192_v31 }
0x2711   : > { %v1667_v0 = vrot.slane %v1660_v43, %v1192_v31 }
0x2781   : > { %v1675_v48 = vpop.permute.xlu1 %1674 }
0x2782   : > { %2224 = vmatmul.mubr.msk.bf16.vlgmr.msra.gmra.mrb[12].mxu0 %vm1116_vm7, %v1675_v48  ;;  %v1575_v48 = vrot.slane %v1568_v5, %v1192_v31 }
0x2855   : > { %v1713_v50 = vpop.f32.mrb[12].mxu0 }
0x2856   : > { %v1719_v51 = vadd.f32 %v1713_v50, %v1673_v49  ;;  %v2225_v52 = vpop.f32.mrb[13].mxu0 }
0x2857   : > { %v1716_v53 = vpop.f32.mrb[14].mxu0 }
0x2858   : > { %2402 = vtanh.f32 %v1719_v51  ;;  %v2226_v54 = vpop.f32.mrb[15].mxu0  ;;  %v2041_v56 = vmul.f32 -1.442695, %v1719_v51 }
0x285a   : > { %2404 = vpow2.f32 %v2041_v56 }
0x2862   : > { %v2403_v55 = vpop.eup %2402 }
0x2863   : > { %1729 = vrot.lane.b32.xlu0 %v2403_v55, %s2493_s12 }
0x2864   : > { %v2405_v57 = vpop.eup %2404 }
0x2865   : > { %v1723_v59 = vadd.f32 1.0, %v2405_v57 }
0x2867   : > { %2406 = vrcp.f32 %v1723_v59 }
0x2871   : > { %v2407_v60 = vpop.eup %2406 }
0x2872   : > { %v1727_v1 = vmul.f32 %v2407_v60, %v1645_v42  ;;  %v1384_v42 = vrot.slane %v2816_v4, %v1192_v31 }
0x2874   : > { %v1391_v6 = vrot.slane %v1384_v42, %v1192_v31 }
0x28d5   : > { %v1730_v61 = vpop.permute.xlu0 %1729 }
0x28d6   : > { %v1732_v62 = vmul.f32 %v2407_v60, %v1730_v61 }
0x28d8   : > { %1734 = vrot.lane.b32.xlu1 %v1732_v62, %s2494_s13 }
0x294a   : > { %v1735_v7 = vpop.permute.xlu1 %1734 }
0x294b   : > { %v1737_v8 = vadd.f32 %v1735_v7, %v1727_v1 }
0x294d   : > { %2408 = vtanh.f32 %v1737_v8 }
0x2957   : > { %v2409_v10 = vpop.eup %2408 }
0x2958   : > { %1740 = vrot.lane.b32.xlu0 %v2409_v10, %s2493_s12 }
0x29ca   : > { %v1741_v11 = vpop.permute.xlu0 %1740 }
0x29cb   : > { %v1743_v12 = vmul.f32 %v2407_v60, %v1741_v11 }
0x29cd   : > { %v2864_v13 = vpack.c.bf16 %v1743_v12, %v1743_v12 }
0x29cf   : > { %1766 = vrot.lane.b32.xlu1 %v2864_v13, %s2494_s13  ;;  %v1752_v47 = vrot.slane %v2864_v13, %v1192_v31 }
0x29d1   : > { %v1759_v4 = vrot.slane %v1752_v47, %v1192_v31 }
0x2a41   : > { %v1767_v17 = vpop.permute.xlu1 %1766 }
0x2a42   : > { %2232 = vmatmul.mubr.msk.bf16.vlgmr.msra.gmra.mrb[12].mxu1 %vm1116_vm7, %v1767_v17 }
0x2b15   : > { %v1805_v14 = vpop.f32.mrb[12].mxu1 }
0x2b16   : > { %v1811_v19 = vadd.f32 %v1805_v14, %v1765_v18  ;;  %v2233_v20 = vpop.f32.mrb[13].mxu1 }
0x2b17   : > { %v1808_v21 = vpop.f32.mrb[14].mxu1 }
0x2b18   : > { %2410 = vtanh.f32 %v1811_v19  ;;  %v2234_v15 = vpop.f32.mrb[15].mxu1  ;;  %v2044_v16 = vmul.f32 -1.442695, %v1811_v19 }
0x2b1a   : > { %2412 = vpow2.f32 %v2044_v16 }
0x2b22   : > { %v2411_v37 = vpop.eup %2410 }
0x2b23   : > { %1821 = vrot.lane.b32.xlu0 %v2411_v37, %s2493_s12 }
0x2b24   : > { %v2413_v22 = vpop.eup %2412 }
0x2b25   : > { %v1815_v23 = vadd.f32 1.0, %v2413_v22 }
0x2b27   : > { %2414 = vrcp.f32 %v1815_v23 }
0x2b31   : > { %v2415_v32 = vpop.eup %2414 }
0x2b32   : > { %v1819_v2 = vmul.f32 %v2415_v32, %v1737_v8 }
0x2b95   : > { %v1822_v33 = vpop.permute.xlu0 %1821 }
0x2b96   : > { %v1824_v34 = vmul.f32 %v2415_v32, %v1822_v33 }
0x2b98   : > { %1826 = vrot.lane.b32.xlu1 %v1824_v34, %s2494_s13 }
0x2b9c   : > { %1201 = vrot.lane.b32.xlu1 %v1200_v35, %s2494_s13 }
0x2ba0   : > { %1300 = vrot.lane.b32.xlu1 %v1299_v38, %s2494_s13 }
0x2ba4   : > { %1484 = vrot.lane.b32.xlu1 %v1483_v39, %s2494_s13 }
0x2ba8   : > { %1668 = vrot.lane.b32.xlu1 %v1667_v0, %s2494_s13 }
0x2c0a   : > { %v1827_v28 = vpop.permute.xlu1 %1826 }
0x2c0b   : > { %v1829_v40 = vadd.f32 %v1827_v28, %v1819_v2 }
0x2c0d   : > { %2416 = vtanh.f32 %v1829_v40 }
0x2c0e   : > { %v1202_v9 = vpop.permute.xlu1 %1201 }
0x2c0f   : > { %2024 = vst.msk [vmem:[%s2592_s26 + $0x7] sm:$0x1] %vm1205_vm8, %v1202_v9 }
0x2c12   : > { %v1301_v45 = vpop.permute.xlu1 %1300 }
0x2c13   : > { %2027 = vst.msk [vmem:[%s2592_s26 + $0x6] sm:$0x1] %vm1205_vm8, %v1301_v45 }
0x2c16   : > { %v1485_v46 = vpop.permute.xlu1 %1484 }
0x2c17   : > { %v2417_v41 = vpop.eup %2416  ;;  %2033 = vst.msk [vmem:[%s2592_s26 + $0x4] sm:$0x1] %vm1205_vm8, %v1485_v46 }
0x2c18   : > { %1832 = vrot.lane.b32.xlu0 %v2417_v41, %s2493_s12 }
0x2c1a   : > { %v1669_v3 = vpop.permute.xlu1 %1668 }
0x2c1b   : > { %2039 = vst.msk [vmem:[%s2592_s26 + $0x2] sm:$0x1] %vm1205_vm8, %v1669_v3 }
0x2c1c   : > { %1208 = vrot.lane.b32.xlu0 %v2784_v63, %s2494_s13 }
0x2c20   : > { %1392 = vrot.lane.b32.xlu0 %v1391_v6, %s2494_s13 }
0x2c24   : > { %1576 = vrot.lane.b32.xlu0 %v1575_v48, %s2494_s13 }
0x2c28   : > { %1760 = vrot.lane.b32.xlu0 %v1759_v4, %s2494_s13 }
0x2c8a   : > { %v1833_v49 = vpop.permute.xlu0 %1832 }
0x2c8b   : > { %v1835_v50 = vmul.f32 %v2415_v32, %v1833_v49 }
0x2c8d   : > { %v1836_v63 = vpack.c.bf16 %v1835_v50, %v1835_v50 }
0x2c8e   : > { %v1209_v30 = vpop.permute.xlu0 %1208 }
0x2c8f   : > { %v1844_v51 = vrot.slane %v1836_v63, %v1192_v31  ;;  %1212 = vst.msk [vmem:[%s2605_s8] sm:$0x3] %vm1211_vm9, %v1209_v30 }
0x2c91   : > { %v1851_v52 = vrot.slane %v1844_v51, %v1192_v31 }
0x2c92   : > { %v1393_v53 = vpop.permute.xlu0 %1392 }
0x2c93   : > { %2030 = vst.msk [vmem:[%s2592_s26 + $0x5] sm:$0x1] %vm1205_vm8, %v1393_v53  ;;  %1852 = vrot.lane.b32.xlu1 %v1851_v52, %s2494_s13 }
0x2c96   : > { %v1577_v54 = vpop.permute.xlu0 %1576 }
0x2c97   : > { %2036 = vst.msk [vmem:[%s2592_s26 + $0x3] sm:$0x1] %vm1205_vm8, %v1577_v54 }
0x2c9a   : > { %v1761_v55 = vpop.permute.xlu0 %1760 }
0x2c9b   : > { %2042 = vst.msk [vmem:[%s2592_s26 + $0x1] sm:$0x1] %vm1205_vm8, %v1761_v55 }
0x2d05   : > { %v1853_v56 = vpop.permute.xlu1 %1852 }
0x2d06   : > { %1855 = vst.msk [vmem:[%s2592_s26] sm:$0x1] %vm1205_vm8, %v1853_v56 }
0x2d07 PF: > { %s2046_s14 = sshll.u32 %s2548_s22, 5  ;;  %s1877_s23 = sshll.u32 %s2605_s8, 4  ;;  %s1878_s23 = int_to_ptr.vmem [resolvable:$true] %s1877_s23 }
0x2d08   : > { %s2910_s17 = scalar_lea.hbm %s2954_s5, %s2046_s14  ;;  %s1861_s25 = scalar_lea.sflag [#allocation4], %s248_s30 }
0x2d09   : > { %s2418_s9 = scalar_lea.vmem %s1878_s23, 32  ;;  %s2496_s26 = smov [#allocation3]  }
0x2d0a   : > { %p2419_p13 = scmp.ne.s32.totalorder %s1878_s23, %s2418_s9  ;;  %s2422_s10 = sshll.u32 %s2496_s26, 4  ;;  %s2423_s10 = int_to_ptr.vmem [resolvable:$false] %s2422_s10 }
0x2d0b   : > { %s2424_s11 = scalar_lea.vmem %s2423_s10, 64  ;;  %p2425_p2 = scmp.lt.s32.totalorder %s1878_s23, %s2423_s10 }
0x2d0c   : > { %p2420_p0 = pnand %p2419_p13, %p2565_p5  ;;  %p2426_p3 = scmp.lt.s32.totalorder %s2424_s11, %s2418_s9 }
0x2d0e   : > { %p2421_p1 = pneg %p2420_p0  ;;  %p2427_p4 = por %p2426_p3, %p2425_p2 }
0x2d10   : > { %p2428_p7 = pnand %p2427_p4, %p2421_p1 }
0x2d12   : > { %2431 = shalt.err (!%p2428_p7)
}
0x2d13   : > { %s2432_s22 = scalar_lea.hbm %s2910_s17, 32  ;;  %s2436_s6 = scalar_lea.hbm %s2954_s5, 64 }
0x2d14   : > { %p2433_p8 = scmp.ne.s32.totalorder %s2910_s17, %s2432_s22  ;;  %p2437_p11 = scmp.lt.u32.totalorder %s2910_s17, %s2954_s5 }
0x2d15   : > { %p2438_p12 = scmp.lt.u32.totalorder %s2436_s6, %s2432_s22  ;;  %p2440_p0 = scmp.lt.u32.totalorder %s2432_s22, %s2910_s17 }
0x2d16   : > { %p2434_p9 = pnand %p2433_p8, %p2565_p5 }
0x2d17   : > { %p2439_p13 = por %p2438_p12, %p2437_p11 }
0x2d18   : > { %p2435_p10 = pneg %p2434_p9 }
0x2d19   : > { %p2441_p1 = por %p2440_p0, %p2439_p13 }
0x2d1b   : > { %p2442_p2 = pnand %p2441_p1, %p2435_p10 }
0x2d1d   : > { %2445 = shalt.err (!%p2442_p2)
}
0x2d1e   : > { %2235 = dma.vmem_to_hbm [thread:$0]  (%p2565_p5), %s1878_s23, 32, %s2910_s17, %s1861_s25  }
0x2d1f PF: > { %p2241_p3 = scmp.ge.s32.totalorder %s2480_s21, 2  ;;  %s1896_s13 = sand.u32 1, %s2468_s18  }
0x2d20   : > { %s1897_s14 = scalar_lea.sflag [#allocation4], %s1896_s13 }
0x2d21   : > { %p2238_p4 = pnand %p2241_p3, %p2569_p6 }
0x2d23   : > { %2463 = dma.done.wait (!%p2238_p4), %s1897_s14, 32  }
0x2d24   : > { %2465 = vsyncadd (!%p2238_p4), %s1897_s14, 4294967264  ;;  %p16_p7 = scmp.ge.s32.totalorder %s2552_s24, 4   ;;  %s2957_s18 = smov %s2472_s19 }
0x2d25   : > { %s2958_s19 = smov %s2476_s20  ;;  %s2959_s20 = smov %s2563_s27 }
0x2d26   : > { %s2960_s21 = smov %s2552_s24  ;;  %18 = sbr.rel (!%p16_p7) target bundleno = 3 (0x3), region = 111 }
0x2d2d   :  { %1902 = vsyncpa [#allocation4], 1 }
0x2d2e   :  { %1904 = vsyncpa [#allocation4 + $0x1], 1 }

</bundles_post_ra>
